<compile_context>
chip_gen: v5e
topology: v5e:2x2
jax: 0.10.0
libtpu: 0.0.40
codegen_flags: <defaults>
</compile_context>

<pallas_src>
import functools
from typing import NamedTuple

import jax
import jax.numpy as jnp
from jax.experimental import pallas as pl
from jax.experimental.pallas import tpu as pltpu


class _Config(NamedTuple):
    n_nodes: int
    n_edges: int               # true (unpadded) edge count -> BatchNorm divisor
    tile_e: int
    eps: float
    normalization_factor: float
    aggregation_method: str    # "sum" | "mean"
    tanh: bool
    coords_range: float
    cache_x: bool              # cache x1/x2 in VMEM (else recompute per phase)


def _equivariant_update_kernel(cfg: _Config,
                               col_ref, hcat_ref, ea_ref, cd_ref,
                               coord_ref, lig_ref,
                               w1_ref, w1c_ref, b1_ref, g1_ref, be1_ref,
                               w2_ref, b2_ref, g2_ref, be2_ref, w5_ref,
                               out_ref,
                               stats_ref, bn_ref, agg_ref, cache_ref=None):
    f32 = jnp.float32
    bf16 = jnp.bfloat16
    phase = pl.program_id(0)          # 0: BN1 stats, 1: BN2 stats, 2: output
    t = pl.program_id(1)              # edge tile
    n_tiles = pl.num_programs(1)
    tile = cfg.tile_e
    cdim = coord_ref.shape[-1]

    # ---- init persistent accumulators once, at the very first grid step ----
    @pl.when(jnp.logical_and(phase == 0, t == 0))
    def _():
        stats_ref[...] = jnp.zeros_like(stats_ref)
        agg_ref[...] = jnp.zeros_like(agg_ref)

    # padded edges (beyond cfg.n_edges) are excluded from the BN statistics
    rows = jax.lax.broadcasted_iota(jnp.int32, (tile, 1), 0)
    valid = (t * tile + rows) < cfg.n_edges                       # [T, 1] bool

    inv_e = 1.0 / float(cfg.n_edges)

    def linear1():
        # x1 = cat([h[col], h[row]]) @ w1 + edge_attr @ w1c + b1   (bf16 MXU)
        x = jnp.dot(hcat_ref[...], w1_ref[...], preferred_element_type=f32)
        x = x + jnp.dot(ea_ref[...], w1c_ref[...], preferred_element_type=f32)
        return x + b1_ref[...]

    def bn_apply(x, slot):            # y = x * scale + shift (precomputed)
        return x * bn_ref[slot:slot + 1, :] + bn_ref[slot + 1:slot + 2, :]

    def linear2(y1):
        return (jnp.dot(y1.astype(bf16), w2_ref[...],
                        preferred_element_type=f32) + b2_ref[...])

    def accumulate_stats(x, slot):
        # masked per-channel sum / sum-of-squares on the VPU + XLU (not MXU)
        xm = jnp.where(valid, x, 0.0)
        stats_ref[slot:slot + 1, :] += jnp.sum(xm, axis=0, keepdims=True)
        stats_ref[slot + 1:slot + 2, :] += jnp.sum(xm * xm, axis=0, keepdims=True)

    def finalize_bn(slot, gamma, beta):
        mu = stats_ref[slot:slot + 1, :] * inv_e
        var = jnp.maximum(stats_ref[slot + 1:slot + 2, :] * inv_e - mu * mu, 0.0)
        scale = gamma * jax.lax.rsqrt(var + cfg.eps)
        bn_ref[slot:slot + 1, :] = scale
        bn_ref[slot + 1:slot + 2, :] = beta - mu * scale

    # ---- phase 0: Linear1 + BatchNorm-1 statistics (cache x1) --------------
    @pl.when(phase == 0)
    def _():
        x1 = linear1()
        accumulate_stats(x1, 0)
        if cfg.cache_x:
            cache_ref[t] = x1.astype(bf16)

        @pl.when(t == n_tiles - 1)
        def _():
            finalize_bn(0, g1_ref[...], be1_ref[...])

    # ---- phase 1: BN1 + Linear2 + BatchNorm-2 statistics (cache x2) --------
    @pl.when(phase == 1)
    def _():
        if cfg.cache_x:
            x1 = cache_ref[t].astype(f32)
        else:
            x1 = linear1()
        x2 = linear2(bn_apply(x1, 0))
        accumulate_stats(x2, 2)
        if cfg.cache_x:
            cache_ref[t] = x2.astype(bf16)

        @pl.when(t == n_tiles - 1)
        def _():
            finalize_bn(2, g2_ref[...], be2_ref[...])

    # ---- phase 2: BN2 + Linear(H->1), scatter-accumulate, residual write ---
    @pl.when(phase == 2)
    def _():
        if cfg.cache_x:
            x2 = cache_ref[t].astype(f32)
        else:
            x2 = linear2(bn_apply(linear1(), 0))
        y2 = bn_apply(x2, 2)
        o = jnp.dot(y2, w5_ref[...], preferred_element_type=f32)        # [T,1]
        if cfg.tanh:
            o = jnp.tanh(o) * cfg.coords_range

        # cd_ref carries [coord_diff | 1] in the mean path: scale the coord
        # columns by o and leave the count column alone.  Padded edge rows of
        # cd_ref are all-zero, so they contribute nothing to the scatter.
        w = cd_ref.shape[-1]
        if w > cdim:
            lane = jax.lax.broadcasted_iota(jnp.int32, (1, w), 1)
            rhs = cd_ref[...] * jnp.where(lane < cdim, o, 1.0)          # [T,w]
        else:
            rhs = cd_ref[...] * o                                       # [T,cdim]

        # scatter-sum: one [N, T] one-hot matmul, all f32 (trans kept exact)
        node_ids = jax.lax.broadcasted_iota(jnp.int32, (cfg.n_nodes, tile), 0)
        onehot = (node_ids == col_ref[...]).astype(f32)                 # [N,T]
        agg_ref[...] += jnp.dot(onehot, rhs, preferred_element_type=f32)

        @pl.when(t == n_tiles - 1)
        def _():
            acc = agg_ref[:, 0:cdim]
            if cfg.aggregation_method == "mean":
                acc = acc / jnp.maximum(agg_ref[:, cdim:cdim + 1], 1.0)
            acc = acc * (1.0 / cfg.normalization_factor)
            out_ref[...] = coord_ref[...] + acc * lig_ref[...]


def equivariant_update(h, coord, edge_index, coord_diff, edge_attr, params, *,
                       normalization_factor=100.0, aggregation_method="sum",
                       tanh=False, coords_range=10.0, eps=1e-5,
                       ligand_diff=None, tile_e=512, cache_x=None,
                       vmem_limit_bytes=None):
    """Pallas TPU forward of EquivariantUpdate.
    h: [N, H] f32, coord: [N, 3] f32, edge_index: [2, E] int32,
    coord_diff: [E, 3] f32, edge_attr: [E, d_e] f32 -> new coord [N, 3]."""
    if aggregation_method not in ("sum", "mean"):
        # TODO(synk): torch_scatter reduce='min'/'max' have no cheap matmul form.
        raise NotImplementedError(f"aggregation_method={aggregation_method!r}")
    row, col = edge_index[0], edge_index[1]
    n_nodes, hidden = h.shape
    n_edges = int(row.shape[0])
    if n_edges == 0:
        raise ValueError("zero edges: BatchNorm over an empty batch is undefined")
    d_e = edge_attr.shape[1]
    cdim = coord.shape[1]
    assert coord_diff.shape == (n_edges, cdim)
    assert tile_e % 128 == 0, "tile_e must be a multiple of the 128-lane width"

    n_tiles = -(-n_edges // tile_e)
    e_pad = n_tiles * tile_e
    pad = e_pad - n_edges

    f32, bf16 = jnp.float32, jnp.bfloat16
    col_p = jnp.pad(col.astype(jnp.int32), (0, pad))   # pad node 0; rhs rows are 0
    row_p = jnp.pad(row.astype(jnp.int32), (0, pad))
    h32 = h.astype(f32)
    # XLA-side row gather + lane concat -> [E_pad, 2H] bf16 Linear1 operand
    # (K = 2H matches the 256-deep MXU on v6e/v7x; bf16 halves HBM traffic).
    hcat = jnp.concatenate([jnp.take(h32, col_p, axis=0),
                            jnp.take(h32, row_p, axis=0)], axis=1).astype(bf16)
    ea_p = jnp.pad(edge_attr.astype(f32), ((0, pad), (0, 0))).astype(bf16)
    cd_p = jnp.pad(coord_diff.astype(f32), ((0, pad), (0, 0)))
    if aggregation_method == "mean":
        ones = jnp.pad(jnp.ones((n_edges, 1), f32), ((0, pad), (0, 0)))
        cd_in = jnp.concatenate([cd_p, ones], axis=1)          # [E_pad, cdim+1]
        agg_w = cdim + 1
    else:
        cd_in = cd_p
        agg_w = cdim
    coord32 = coord.astype(f32)
    lig = (jnp.ones_like(coord32) if ligand_diff is None
           else jnp.broadcast_to(ligand_diff.astype(f32), coord32.shape))

    w1 = jnp.concatenate([params["w1a"], params["w1b"]], axis=0).astype(bf16)
    w1c = params["w1c"].astype(bf16)
    w2 = params["w2"].astype(bf16)
    b1 = params["b1"].astype(f32)
    g1 = params["gamma1"].astype(f32)
    be1 = params["beta1"].astype(f32)
    b2 = params["b2"].astype(f32)
    g2 = params["gamma2"].astype(f32)
    be2 = params["beta2"].astype(f32)
    w5 = params["w5"].astype(f32)
    weights = [w1, w1c, b1, g1, be1, w2, b2, g2, be2, w5]

    if cache_x is None:
        # bf16 x1/x2 cache; fall back to recompute if it would eat too much VMEM.
        cache_x = e_pad * hidden * 2 <= 16 * 1024 * 1024
    cache_x = bool(cache_x)

    if vmem_limit_bytes is None:
        try:
            phys = int(pltpu.get_tpu_info().vmem_capacity_bytes)
        except Exception:
            phys = 64 * 1024 * 1024            # conservative (v7x per-TC VMEM)
        # headroom for compiler scratch / double buffers, cap at ~100 MiB
        vmem_limit_bytes = min(phys - 16 * 1024 * 1024, 100 * 1024 * 1024)

    def resident(shape):                       # VMEM-resident across the grid
        return pl.BlockSpec(shape, lambda p, t: (0,) * len(shape))

    if cache_x:
        # hcat/ea only consumed in phase 0 -> stop re-streaming them in 1/2
        x_map = lambda p, t: (jnp.where(p == 0, t, 0), 0)
    else:
        x_map = lambda p, t: (t, 0)
    cd_map = lambda p, t: (jnp.where(p == 2, t, 0), 0)     # only read in phase 2
    col_map = lambda p, t: (0, jnp.where(p == 2, t, 0))

    in_specs = [
        pl.BlockSpec((1, tile_e), col_map),                # col indices (lane-major)
        pl.BlockSpec((tile_e, 2 * hidden), x_map),         # [h[col] | h[row]] bf16
        pl.BlockSpec((tile_e, d_e), x_map),                # edge_attr bf16
        pl.BlockSpec((tile_e, agg_w), cd_map),             # coord_diff (| ones)
        resident((n_nodes, cdim)),                         # coord
        resident((n_nodes, cdim)),                         # ligand mask
        *[resident(w.shape) for w in weights],
    ]

    scratch_shapes = [
        pltpu.VMEM((4, hidden), f32),          # [Σx1, Σx1², Σx2, Σx2²]
        pltpu.VMEM((4, hidden), f32),          # [scale1, shift1, scale2, shift2]
        pltpu.VMEM((n_nodes, agg_w), f32),     # scatter accumulator (+ degree)
    ]
    if cache_x:
        scratch_shapes.append(pltpu.VMEM((n_tiles, tile_e, hidden), bf16))

    cfg = _Config(n_nodes=n_nodes, n_edges=n_edges, tile_e=tile_e, eps=float(eps),
                  normalization_factor=float(normalization_factor),
                  aggregation_method=aggregation_method, tanh=bool(tanh),
                  coords_range=float(coords_range), cache_x=cache_x)

    # Advisory cost estimate.
    l1 = 2 * e_pad * (2 * hidden + d_e) * hidden
    l2 = 2 * e_pad * hidden * hidden
    flops = int((1 if cache_x else 3) * l1 + (1 if cache_x else 2) * l2
                + 2 * e_pad * hidden + 2 * n_nodes * e_pad * agg_w)
    edge_stream = e_pad * (2 * hidden + d_e) * 2           # bf16 hcat + ea
    bytes_accessed = int((1 if cache_x else 3) * edge_stream
                         + e_pad * (agg_w * 4 + 4)
                         + sum(int(w.size) * (2 if w.dtype == jnp.bfloat16 else 4)
                               for w in weights)
                         + 3 * n_nodes * cdim * 4)
    cost = pl.CostEstimate(flops=flops,
                           transcendentals=int(2 * hidden + (e_pad if tanh else 0)),
                           bytes_accessed=bytes_accessed)

    return pl.pallas_call(
        functools.partial(_equivariant_update_kernel, cfg),
        out_shape=jax.ShapeDtypeStruct((n_nodes, cdim), f32),
        grid_spec=pltpu.PrefetchScalarGridSpec(
            num_scalar_prefetch=0,
            grid=(3, n_tiles),                       # (phase, edge-tile)
            in_specs=in_specs,
            out_specs=pl.BlockSpec((n_nodes, cdim), lambda p, t: (0, 0)),
            scratch_shapes=scratch_shapes),
        # TODO(synk): v7x megacore split of the edge-tile axis needs per-core BN
        # stats / scatter partials plus a combine step; kept sequential here.
        compiler_params=pltpu.CompilerParams(
            dimension_semantics=("arbitrary", "arbitrary"),
            vmem_limit_bytes=int(vmem_limit_bytes)),
        cost_estimate=cost,
    )(col_p.reshape(1, e_pad), hcat, ea_p, cd_in, coord32, lig, *weights)


def equivariant_update_reference(h, coord, edge_index, coord_diff, edge_attr, params, *,
                                 normalization_factor=100.0, aggregation_method="sum",
                                 tanh=False, coords_range=10.0, eps=1e-5,
                                 ligand_diff=None):
    """Pure-JAX reference with identical semantics (DenseLayer activation never
    applied; BatchNorm1d training-mode batch stats, biased variance)."""
    row, col = edge_index[0], edge_index[1]
    n_nodes = h.shape[0]
    x = jnp.concatenate([h[col], h[row], edge_attr], axis=1)
    w1 = jnp.concatenate([params["w1a"], params["w1b"], params["w1c"]], axis=0)

    def batchnorm(v, gamma, beta):
        mu = v.mean(axis=0, keepdims=True)
        var = ((v - mu) ** 2).mean(axis=0, keepdims=True)
        return (v - mu) / jnp.sqrt(var + eps) * gamma + beta

    x1 = x @ w1 + params["b1"]
    y1 = batchnorm(x1, params["gamma1"], params["beta1"])
    x2 = y1 @ params["w2"] + params["b2"]
    y2 = batchnorm(x2, params["gamma2"], params["beta2"])
    o = y2 @ params["w5"]                       # Linear(hidden, 1, bias=False)
    if tanh:
        o = jnp.tanh(o) * coords_range
    trans = coord_diff * o
    agg = jax.ops.segment_sum(trans, col, num_segments=n_nodes)
    if aggregation_method == "mean":
        cnt = jax.ops.segment_sum(jnp.ones((trans.shape[0], 1), trans.dtype), col,
                                  num_segments=n_nodes)
        agg = agg / jnp.maximum(cnt, 1.0)
    agg = agg / normalization_factor
    if ligand_diff is not None:
        agg = agg * ligand_diff
    return coord + agg


def init_params(key, hidden_nf, edges_in_d):
    """Init matching EquivariantUpdate: DenseLayer = kaiming_uniform_(a=sqrt(5))
    -> U(+-1/sqrt(fan_in)) with zero bias; BatchNorm gamma=1, beta=0; final
    Linear(hidden,1,bias=False) = xavier_uniform_(gain=1e-3).
    Linear weights stored transposed as [in_features, out_features]."""
    k1, k2, k3 = jax.random.split(key, 3)
    H, d = hidden_nf, edges_in_d
    in1 = 2 * H + d

    def uniform(k, bound, shape):
        return jax.random.uniform(k, shape, jnp.float32, -bound, bound)

    w1 = uniform(k1, 1.0 / float(in1) ** 0.5, (in1, H))
    w2 = uniform(k2, 1.0 / float(H) ** 0.5, (H, H))
    w5 = uniform(k3, 1e-3 * (6.0 / (H + 1)) ** 0.5, (H, 1))
    zeros = lambda: jnp.zeros((1, H), jnp.float32)
    return {
        "w1a": w1[:H], "w1b": w1[H:2 * H], "w1c": w1[2 * H:], "b1": zeros(),
        "gamma1": jnp.ones((1, H), jnp.float32), "beta1": zeros(),
        "w2": w2, "b2": zeros(),
        "gamma2": jnp.ones((1, H), jnp.float32), "beta2": zeros(),
        "w5": w5,
    }


if __name__ == "__main__":
    N, E = 32, 300
    hidden_nf = 128            # lane-dense hidden dim (fills 128-lane vregs / MXU)
    edges_in_d = 8

    key = jax.random.PRNGKey(0)
    k_h, k_c, k_cd, k_e, k_ei, k_p, k_l = jax.random.split(key, 7)

    h = jax.random.normal(k_h, (N, hidden_nf), jnp.float32)
    coord = jax.random.normal(k_c, (N, 3), jnp.float32)
    coord_diff = jax.random.normal(k_cd, (E, 3), jnp.float32)
    edge_attr = jax.random.normal(k_e, (E, edges_in_d), jnp.float32)
    row = jax.random.randint(k_ei, (E,), 0, N, dtype=jnp.int32)
    col = (row + 1 + jax.random.randint(jax.random.fold_in(k_ei, 1), (E,), 0, N - 1,
                                        dtype=jnp.int32)) % N
    edge_index = jnp.stack([row, col], axis=0)
    ligand_diff = (jax.random.uniform(k_l, (N, 1)) > 0.3).astype(jnp.float32)

    params = init_params(k_p, hidden_nf, edges_in_d)

    # Case 1: sum aggregation, no tanh, no ligand mask (common EGNN config).
    out = equivariant_update(h, coord, edge_index, coord_diff, edge_attr, params,
                             normalization_factor=100.0, aggregation_method="sum")
    out = jax.block_until_ready(out)
    ref = equivariant_update_reference(h, coord, edge_index, coord_diff, edge_attr,
                                       params, normalization_factor=100.0,
                                       aggregation_method="sum")
    assert out.shape == (N, 3)
    err = float(jnp.max(jnp.abs(out - ref)))
    assert err < 5e-4, f"sum-path max abs err {err}"

    # Case 2: mean aggregation + tanh clamp + ligand mask.
    out2 = equivariant_update(h, coord, edge_index, coord_diff, edge_attr, params,
                              normalization_factor=10.0, aggregation_method="mean",
                              tanh=True, coords_range=10.0, ligand_diff=ligand_diff)
    out2 = jax.block_until_ready(out2)
    ref2 = equivariant_update_reference(h, coord, edge_index, coord_diff, edge_attr,
                                        params, normalization_factor=10.0,
                                        aggregation_method="mean", tanh=True,
                                        coords_range=10.0, ligand_diff=ligand_diff)
    err2 = float(jnp.max(jnp.abs(out2 - ref2)))
    assert err2 < 5e-4, f"mean-path max abs err {err2}"

    print("KERNEL_OK")
</pallas_src>

<mosaic_0001>
module attributes {stable_mosaic.version = 11 : i64} {
  func.func @_equivariant_update_kernel(%arg0: i32, %arg1: i32, %arg2: memref<1x512xi32, #tpu.memory_space<vmem>>, %arg3: memref<512x256xbf16, #tpu.memory_space<vmem>>, %arg4: memref<512x8xbf16, #tpu.memory_space<vmem>>, %arg5: memref<512x3xf32, #tpu.memory_space<vmem>>, %arg6: memref<32x3xf32, #tpu.memory_space<vmem>>, %arg7: memref<32x3xf32, #tpu.memory_space<vmem>>, %arg8: memref<256x128xbf16, #tpu.memory_space<vmem>>, %arg9: memref<8x128xbf16, #tpu.memory_space<vmem>>, %arg10: memref<1x128xf32, #tpu.memory_space<vmem>>, %arg11: memref<1x128xf32, #tpu.memory_space<vmem>>, %arg12: memref<1x128xf32, #tpu.memory_space<vmem>>, %arg13: memref<128x128xbf16, #tpu.memory_space<vmem>>, %arg14: memref<1x128xf32, #tpu.memory_space<vmem>>, %arg15: memref<1x128xf32, #tpu.memory_space<vmem>>, %arg16: memref<1x128xf32, #tpu.memory_space<vmem>>, %arg17: memref<128x1xf32, #tpu.memory_space<vmem>>, %arg18: memref<32x3xf32, #tpu.memory_space<vmem>>, %arg19: memref<4x128xf32, #tpu.memory_space<vmem>>, %arg20: memref<4x128xf32, #tpu.memory_space<vmem>>, %arg21: memref<32x3xf32, #tpu.memory_space<vmem>>, %arg22: memref<1x512x128xbf16, #tpu.memory_space<vmem>>) attributes {dimension_semantics = [#tpu.dimension_semantics<arbitrary>, #tpu.dimension_semantics<arbitrary>], iteration_bounds = array<i64: 3, 1>, scalar_prefetch = 0 : i64, scratch_operands = 4 : i64, tpu.core_type = #tpu.core_type<tc>, window_params = [{transform_indices = @transform_0, window_bounds = array<i64: 1, 512>}, {transform_indices = @transform_1, window_bounds = array<i64: 512, 256>}, {transform_indices = @transform_2, window_bounds = array<i64: 512, 8>}, {transform_indices = @transform_3, window_bounds = array<i64: 512, 3>}, {pipeline_mode = #tpu.pipeline_mode<synchronous>, transform_indices = @transform_4, window_bounds = array<i64: 32, 3>}, {pipeline_mode = #tpu.pipeline_mode<synchronous>, transform_indices = @transform_5, window_bounds = array<i64: 32, 3>}, {pipeline_mode = #tpu.pipeline_mode<synchronous>, transform_indices = @transform_6, window_bounds = array<i64: 256, 128>}, {pipeline_mode = #tpu.pipeline_mode<synchronous>, transform_indices = @transform_7, window_bounds = array<i64: 8, 128>}, {pipeline_mode = #tpu.pipeline_mode<synchronous>, transform_indices = @transform_8, window_bounds = array<i64: 1, 128>}, {pipeline_mode = #tpu.pipeline_mode<synchronous>, transform_indices = @transform_9, window_bounds = array<i64: 1, 128>}, {pipeline_mode = #tpu.pipeline_mode<synchronous>, transform_indices = @transform_10, window_bounds = array<i64: 1, 128>}, {pipeline_mode = #tpu.pipeline_mode<synchronous>, transform_indices = @transform_11, window_bounds = array<i64: 128, 128>}, {pipeline_mode = #tpu.pipeline_mode<synchronous>, transform_indices = @transform_12, window_bounds = array<i64: 1, 128>}, {pipeline_mode = #tpu.pipeline_mode<synchronous>, transform_indices = @transform_13, window_bounds = array<i64: 1, 128>}, {pipeline_mode = #tpu.pipeline_mode<synchronous>, transform_indices = @transform_14, window_bounds = array<i64: 1, 128>}, {pipeline_mode = #tpu.pipeline_mode<synchronous>, transform_indices = @transform_15, window_bounds = array<i64: 128, 1>}, {pipeline_mode = #tpu.pipeline_mode<synchronous>, transform_indices = @transform_16, window_bounds = array<i64: 32, 3>}]} {
    %c0_i32 = arith.constant 0 : i32
    %0 = arith.cmpi eq, %arg0, %c0_i32 : i32
    %c0_i32_0 = arith.constant 0 : i32
    %1 = arith.cmpi eq, %arg1, %c0_i32_0 : i32
    %2 = arith.andi %0, %1 : i1
    %3 = arith.extui %2 : i1 to i32
    %c0_i32_1 = arith.constant 0 : i32
    %4 = arith.cmpi ne, %3, %c0_i32_1 : i32
    scf.if %4 {
      %cst = arith.constant 0.000000e+00 : f32
      %20 = vector.broadcast %cst : f32 to vector<4x128xf32>
      %c0 = arith.constant 0 : index
      %c0_6 = arith.constant 0 : index
      %21 = vector.load %arg19[%c0, %c0_6] : memref<4x128xf32, #tpu.memory_space<vmem>>, vector<4x128xf32>
      tpu.vector_store %arg19[%c0, %c0_6], %20 {strides = array<i32>} : memref<4x128xf32, #tpu.memory_space<vmem>>, vector<4x128xf32>,
      %cst_7 = arith.constant 0.000000e+00 : f32
      %22 = vector.broadcast %cst_7 : f32 to vector<32x3xf32>
      %c0_8 = arith.constant 0 : index
      %c0_9 = arith.constant 0 : index
      %23 = vector.load %arg21[%c0_8, %c0_9] : memref<32x3xf32, #tpu.memory_space<vmem>>, vector<32x3xf32>
      tpu.vector_store %arg21[%c0_8, %c0_9], %22 {strides = array<i32>} : memref<32x3xf32, #tpu.memory_space<vmem>>, vector<32x3xf32>,
    } else {
    }
    %5 = tpu.iota {dimensions = array<i32: 0>} : vector<512x1xi32>
    %c512_i32 = arith.constant 512 : i32
    %6 = arith.muli %arg1, %c512_i32 : i32
    %7 = vector.broadcast %6 : i32 to vector<512x1xi32>
    %8 = arith.addi %7, %5 : vector<512x1xi32>
    %c300_i32 = arith.constant 300 : i32
    %9 = vector.broadcast %c300_i32 : i32 to vector<512x1xi32>
    %10 = arith.cmpi slt, %8, %9 : vector<512x1xi32>
    %c0_i32_2 = arith.constant 0 : i32
    %11 = arith.cmpi eq, %arg0, %c0_i32_2 : i32
    %12 = arith.extui %11 : i1 to i32
    %c0_i32_3 = arith.constant 0 : i32
    %13 = arith.cmpi ne, %12, %c0_i32_3 : i32
    scf.if %13 {
      %c0 = arith.constant 0 : index
      %c0_6 = arith.constant 0 : index
      %20 = vector.load %arg3[%c0, %c0_6] : memref<512x256xbf16, #tpu.memory_space<vmem>>, vector<512x256xbf16>
      %c0_7 = arith.constant 0 : index
      %c0_8 = arith.constant 0 : index
      %21 = vector.load %arg8[%c0_7, %c0_8] : memref<256x128xbf16, #tpu.memory_space<vmem>>, vector<256x128xbf16>
      %cst = arith.constant dense<0.000000e+00> : vector<512x128xf32>
      %22 = tpu.matmul %20, %21, %cst {dimension_numbers = #tpu.dot_dimension_numbers<[1], [0], [0], [1], [0, 0, 1, 1], [], []>} : vector<512x256xbf16>, vector<256x128xbf16>, vector<512x128xf32> -> vector<512x128xf32>
      %c0_9 = arith.constant 0 : index
      %c0_10 = arith.constant 0 : index
      %23 = vector.load %arg4[%c0_9, %c0_10] : memref<512x8xbf16, #tpu.memory_space<vmem>>, vector<512x8xbf16>
      %c0_11 = arith.constant 0 : index
      %c0_12 = arith.constant 0 : index
      %24 = vector.load %arg9[%c0_11, %c0_12] : memref<8x128xbf16, #tpu.memory_space<vmem>>, vector<8x128xbf16>
      %cst_13 = arith.constant dense<0.000000e+00> : vector<512x128xf32>
      %25 = tpu.matmul %23, %24, %cst_13 {dimension_numbers = #tpu.dot_dimension_numbers<[1], [0], [0], [1], [0, 0, 1, 1], [], []>} : vector<512x8xbf16>, vector<8x128xbf16>, vector<512x128xf32> -> vector<512x128xf32>
      %26 = arith.addf %22, %25 : vector<512x128xf32>
      %c0_14 = arith.constant 0 : index
      %c0_15 = arith.constant 0 : index
      %27 = vector.load %arg10[%c0_14, %c0_15] : memref<1x128xf32, #tpu.memory_space<vmem>>, vector<1x128xf32>
      %28 = vector.broadcast %27 : vector<1x128xf32> to vector<512x128xf32>
      %29 = arith.addf %26, %28 : vector<512x128xf32>
      %cst_16 = arith.constant 0.000000e+00 : f32
      %30 = vector.shape_cast %10 : vector<512x1xi1> to vector<512x1xi1>
      %31 = vector.broadcast %30 : vector<512x1xi1> to vector<512x128xi1>
      %32 = vector.broadcast %cst_16 : f32 to vector<512x128xf32>
      %33 = arith.select %31, %29, %32 : vector<512x128xi1>, vector<512x128xf32>
      %c0_17 = arith.constant 0 : index
      %c0_18 = arith.constant 0 : index
      %34 = vector.load %arg19[%c0_17, %c0_18] : memref<4x128xf32, #tpu.memory_space<vmem>>, vector<1x128xf32>
      %cst_19 = arith.constant dense<0.000000e+00> : vector<128xf32>
      %35 = vector.multi_reduction <add>, %33, %cst_19 [0] : vector<512x128xf32> to vector<128xf32>
      %36 = vector.shape_cast %35 : vector<128xf32> to vector<1x128xf32>
      %37 = arith.addf %34, %36 : vector<1x128xf32>
      %c0_20 = arith.constant 0 : index
      %c0_21 = arith.constant 0 : index
      %38 = vector.load %arg19[%c0_20, %c0_21] : memref<4x128xf32, #tpu.memory_space<vmem>>, vector<1x128xf32>
      tpu.vector_store %arg19[%c0_20, %c0_21], %37 {strides = array<i32>} : memref<4x128xf32, #tpu.memory_space<vmem>>, vector<1x128xf32>,
      %c1 = arith.constant 1 : index
      %c0_22 = arith.constant 0 : index
      %39 = vector.load %arg19[%c1, %c0_22] : memref<4x128xf32, #tpu.memory_space<vmem>>, vector<1x128xf32>
      %40 = arith.mulf %33, %33 : vector<512x128xf32>
      %cst_23 = arith.constant dense<0.000000e+00> : vector<128xf32>
      %41 = vector.multi_reduction <add>, %40, %cst_23 [0] : vector<512x128xf32> to vector<128xf32>
      %42 = vector.shape_cast %41 : vector<128xf32> to vector<1x128xf32>
      %43 = arith.addf %39, %42 : vector<1x128xf32>
      %c1_24 = arith.constant 1 : index
      %c0_25 = arith.constant 0 : index
      %44 = vector.load %arg19[%c1_24, %c0_25] : memref<4x128xf32, #tpu.memory_space<vmem>>, vector<1x128xf32>
      tpu.vector_store %arg19[%c1_24, %c0_25], %43 {strides = array<i32>} : memref<4x128xf32, #tpu.memory_space<vmem>>, vector<1x128xf32>,
      %45 = arith.truncf %29 : vector<512x128xf32> to vector<512x128xbf16>
      %46 = arith.index_cast %arg1 : i32 to index
      %c0_26 = arith.constant 0 : index
      %c0_27 = arith.constant 0 : index
      %47 = vector.load %arg22[%46, %c0_26, %c0_27] : memref<1x512x128xbf16, #tpu.memory_space<vmem>>, vector<1x512x128xbf16>
      %48 = vector.shape_cast %47 : vector<1x512x128xbf16> to vector<512x128xbf16>
      %49 = vector.shape_cast %45 : vector<512x128xbf16> to vector<1x512x128xbf16>
      tpu.vector_store %arg22[%46, %c0_26, %c0_27], %49 {strides = array<i32>} : memref<1x512x128xbf16, #tpu.memory_space<vmem>>, vector<1x512x128xbf16>,
      %c0_i32_28 = arith.constant 0 : i32
      %50 = arith.cmpi eq, %arg1, %c0_i32_28 : i32
      %51 = arith.extui %50 : i1 to i32
      %c0_i32_29 = arith.constant 0 : i32
      %52 = arith.cmpi ne, %51, %c0_i32_29 : i32
      scf.if %52 {
        %c0_30 = arith.constant 0 : index
        %c0_31 = arith.constant 0 : index
        %53 = vector.load %arg11[%c0_30, %c0_31] : memref<1x128xf32, #tpu.memory_space<vmem>>, vector<1x128xf32>
        %c0_32 = arith.constant 0 : index
        %c0_33 = arith.constant 0 : index
        %54 = vector.load %arg12[%c0_32, %c0_33] : memref<1x128xf32, #tpu.memory_space<vmem>>, vector<1x128xf32>
        %c0_34 = arith.constant 0 : index
        %c0_35 = arith.constant 0 : index
        %55 = vector.load %arg19[%c0_34, %c0_35] : memref<4x128xf32, #tpu.memory_space<vmem>>, vector<1x128xf32>
        %cst_36 = arith.constant 0.00333333341 : f32
        %56 = vector.broadcast %cst_36 : f32 to vector<1x128xf32>
        %57 = arith.mulf %55, %56 : vector<1x128xf32>
        %c1_37 = arith.constant 1 : index
        %c0_38 = arith.constant 0 : index
        %58 = vector.load %arg19[%c1_37, %c0_38] : memref<4x128xf32, #tpu.memory_space<vmem>>, vector<1x128xf32>
        %cst_39 = arith.constant 0.00333333341 : f32
        %59 = vector.broadcast %cst_39 : f32 to vector<1x128xf32>
        %60 = arith.mulf %58, %59 : vector<1x128xf32>
        %61 = arith.mulf %57, %57 : vector<1x128xf32>
        %62 = arith.subf %60, %61 : vector<1x128xf32>
        %cst_40 = arith.constant 0.000000e+00 : f32
        %63 = vector.broadcast %cst_40 : f32 to vector<1x128xf32>
        %64 = arith.maximumf %62, %63 : vector<1x128xf32>
        %cst_41 = arith.constant 9.99999974E-6 : f32
        %65 = vector.broadcast %cst_41 : f32 to vector<1x128xf32>
        %66 = arith.addf %64, %65 : vector<1x128xf32>
        %67 = math.rsqrt %66 : vector<1x128xf32>
        %68 = arith.mulf %53, %67 : vector<1x128xf32>
        %c0_42 = arith.constant 0 : index
        %c0_43 = arith.constant 0 : index
        %69 = vector.load %arg20[%c0_42, %c0_43] : memref<4x128xf32, #tpu.memory_space<vmem>>, vector<1x128xf32>
        tpu.vector_store %arg20[%c0_42, %c0_43], %68 {strides = array<i32>} : memref<4x128xf32, #tpu.memory_space<vmem>>, vector<1x128xf32>,
        %70 = arith.mulf %57, %68 : vector<1x128xf32>
        %71 = arith.subf %54, %70 : vector<1x128xf32>
        %c1_44 = arith.constant 1 : index
        %c0_45 = arith.constant 0 : index
        %72 = vector.load %arg20[%c1_44, %c0_45] : memref<4x128xf32, #tpu.memory_space<vmem>>, vector<1x128xf32>
        tpu.vector_store %arg20[%c1_44, %c0_45], %71 {strides = array<i32>} : memref<4x128xf32, #tpu.memory_space<vmem>>, vector<1x128xf32>,
      } else {
      }
    } else {
    }
    %c1_i32 = arith.constant 1 : i32
    %14 = arith.cmpi eq, %arg0, %c1_i32 : i32
    %15 = arith.extui %14 : i1 to i32
    %c0_i32_4 = arith.constant 0 : i32
    %16 = arith.cmpi ne, %15, %c0_i32_4 : i32
    scf.if %16 {
      %20 = arith.index_cast %arg1 : i32 to index
      %c0 = arith.constant 0 : index
      %c0_6 = arith.constant 0 : index
      %21 = vector.load %arg22[%20, %c0, %c0_6] : memref<1x512x128xbf16, #tpu.memory_space<vmem>>, vector<1x512x128xbf16>
      %22 = vector.shape_cast %21 : vector<1x512x128xbf16> to vector<512x128xbf16>
      %23 = arith.extf %22 : vector<512x128xbf16> to vector<512x128xf32>
      %c0_7 = arith.constant 0 : index
      %c0_8 = arith.constant 0 : index
      %24 = vector.load %arg20[%c0_7, %c0_8] : memref<4x128xf32, #tpu.memory_space<vmem>>, vector<1x128xf32>
      %25 = vector.broadcast %24 : vector<1x128xf32> to vector<512x128xf32>
      %26 = arith.mulf %23, %25 : vector<512x128xf32>
      %c1 = arith.constant 1 : index
      %c0_9 = arith.constant 0 : index
      %27 = vector.load %arg20[%c1, %c0_9] : memref<4x128xf32, #tpu.memory_space<vmem>>, vector<1x128xf32>
      %28 = vector.broadcast %27 : vector<1x128xf32> to vector<512x128xf32>
      %29 = arith.addf %26, %28 : vector<512x128xf32>
      %30 = arith.truncf %29 : vector<512x128xf32> to vector<512x128xbf16>
      %c0_10 = arith.constant 0 : index
      %c0_11 = arith.constant 0 : index
      %31 = vector.load %arg13[%c0_10, %c0_11] : memref<128x128xbf16, #tpu.memory_space<vmem>>, vector<128x128xbf16>
      %cst = arith.constant dense<0.000000e+00> : vector<512x128xf32>
      %32 = tpu.matmul %30, %31, %cst {dimension_numbers = #tpu.dot_dimension_numbers<[1], [0], [0], [1], [0, 0, 1, 1], [], []>} : vector<512x128xbf16>, vector<128x128xbf16>, vector<512x128xf32> -> vector<512x128xf32>
      %c0_12 = arith.constant 0 : index
      %c0_13 = arith.constant 0 : index
      %33 = vector.load %arg14[%c0_12, %c0_13] : memref<1x128xf32, #tpu.memory_space<vmem>>, vector<1x128xf32>
      %34 = vector.broadcast %33 : vector<1x128xf32> to vector<512x128xf32>
      %35 = arith.addf %32, %34 : vector<512x128xf32>
      %cst_14 = arith.constant 0.000000e+00 : f32
      %36 = vector.shape_cast %10 : vector<512x1xi1> to vector<512x1xi1>
      %37 = vector.broadcast %36 : vector<512x1xi1> to vector<512x128xi1>
      %38 = vector.broadcast %cst_14 : f32 to vector<512x128xf32>
      %39 = arith.select %37, %35, %38 : vector<512x128xi1>, vector<512x128xf32>
      %c2 = arith.constant 2 : index
      %c0_15 = arith.constant 0 : index
      %40 = vector.load %arg19[%c2, %c0_15] : memref<4x128xf32, #tpu.memory_space<vmem>>, vector<1x128xf32>
      %cst_16 = arith.constant dense<0.000000e+00> : vector<128xf32>
      %41 = vector.multi_reduction <add>, %39, %cst_16 [0] : vector<512x128xf32> to vector<128xf32>
      %42 = vector.shape_cast %41 : vector<128xf32> to vector<1x128xf32>
      %43 = arith.addf %40, %42 : vector<1x128xf32>
      %c2_17 = arith.constant 2 : index
      %c0_18 = arith.constant 0 : index
      %44 = vector.load %arg19[%c2_17, %c0_18] : memref<4x128xf32, #tpu.memory_space<vmem>>, vector<1x128xf32>
      tpu.vector_store %arg19[%c2_17, %c0_18], %43 {strides = array<i32>} : memref<4x128xf32, #tpu.memory_space<vmem>>, vector<1x128xf32>,
      %c3 = arith.constant 3 : index
      %c0_19 = arith.constant 0 : index
      %45 = vector.load %arg19[%c3, %c0_19] : memref<4x128xf32, #tpu.memory_space<vmem>>, vector<1x128xf32>
      %46 = arith.mulf %39, %39 : vector<512x128xf32>
      %cst_20 = arith.constant dense<0.000000e+00> : vector<128xf32>
      %47 = vector.multi_reduction <add>, %46, %cst_20 [0] : vector<512x128xf32> to vector<128xf32>
      %48 = vector.shape_cast %47 : vector<128xf32> to vector<1x128xf32>
      %49 = arith.addf %45, %48 : vector<1x128xf32>
      %c3_21 = arith.constant 3 : index
      %c0_22 = arith.constant 0 : index
      %50 = vector.load %arg19[%c3_21, %c0_22] : memref<4x128xf32, #tpu.memory_space<vmem>>, vector<1x128xf32>
      tpu.vector_store %arg19[%c3_21, %c0_22], %49 {strides = array<i32>} : memref<4x128xf32, #tpu.memory_space<vmem>>, vector<1x128xf32>,
      %51 = arith.truncf %35 : vector<512x128xf32> to vector<512x128xbf16>
      %52 = arith.index_cast %arg1 : i32 to index
      %c0_23 = arith.constant 0 : index
      %c0_24 = arith.constant 0 : index
      %53 = vector.load %arg22[%52, %c0_23, %c0_24] : memref<1x512x128xbf16, #tpu.memory_space<vmem>>, vector<1x512x128xbf16>
      %54 = vector.shape_cast %53 : vector<1x512x128xbf16> to vector<512x128xbf16>
      %55 = vector.shape_cast %51 : vector<512x128xbf16> to vector<1x512x128xbf16>
      tpu.vector_store %arg22[%52, %c0_23, %c0_24], %55 {strides = array<i32>} : memref<1x512x128xbf16, #tpu.memory_space<vmem>>, vector<1x512x128xbf16>,
      %c0_i32_25 = arith.constant 0 : i32
      %56 = arith.cmpi eq, %arg1, %c0_i32_25 : i32
      %57 = arith.extui %56 : i1 to i32
      %c0_i32_26 = arith.constant 0 : i32
      %58 = arith.cmpi ne, %57, %c0_i32_26 : i32
      scf.if %58 {
        %c0_27 = arith.constant 0 : index
        %c0_28 = arith.constant 0 : index
        %59 = vector.load %arg15[%c0_27, %c0_28] : memref<1x128xf32, #tpu.memory_space<vmem>>, vector<1x128xf32>
        %c0_29 = arith.constant 0 : index
        %c0_30 = arith.constant 0 : index
        %60 = vector.load %arg16[%c0_29, %c0_30] : memref<1x128xf32, #tpu.memory_space<vmem>>, vector<1x128xf32>
        %c2_31 = arith.constant 2 : index
        %c0_32 = arith.constant 0 : index
        %61 = vector.load %arg19[%c2_31, %c0_32] : memref<4x128xf32, #tpu.memory_space<vmem>>, vector<1x128xf32>
        %cst_33 = arith.constant 0.00333333341 : f32
        %62 = vector.broadcast %cst_33 : f32 to vector<1x128xf32>
        %63 = arith.mulf %61, %62 : vector<1x128xf32>
        %c3_34 = arith.constant 3 : index
        %c0_35 = arith.constant 0 : index
        %64 = vector.load %arg19[%c3_34, %c0_35] : memref<4x128xf32, #tpu.memory_space<vmem>>, vector<1x128xf32>
        %cst_36 = arith.constant 0.00333333341 : f32
        %65 = vector.broadcast %cst_36 : f32 to vector<1x128xf32>
        %66 = arith.mulf %64, %65 : vector<1x128xf32>
        %67 = arith.mulf %63, %63 : vector<1x128xf32>
        %68 = arith.subf %66, %67 : vector<1x128xf32>
        %cst_37 = arith.constant 0.000000e+00 : f32
        %69 = vector.broadcast %cst_37 : f32 to vector<1x128xf32>
        %70 = arith.maximumf %68, %69 : vector<1x128xf32>
        %cst_38 = arith.constant 9.99999974E-6 : f32
        %71 = vector.broadcast %cst_38 : f32 to vector<1x128xf32>
        %72 = arith.addf %70, %71 : vector<1x128xf32>
        %73 = math.rsqrt %72 : vector<1x128xf32>
        %74 = arith.mulf %59, %73 : vector<1x128xf32>
        %c2_39 = arith.constant 2 : index
        %c0_40 = arith.constant 0 : index
        %75 = vector.load %arg20[%c2_39, %c0_40] : memref<4x128xf32, #tpu.memory_space<vmem>>, vector<1x128xf32>
        tpu.vector_store %arg20[%c2_39, %c0_40], %74 {strides = array<i32>} : memref<4x128xf32, #tpu.memory_space<vmem>>, vector<1x128xf32>,
        %76 = arith.mulf %63, %74 : vector<1x128xf32>
        %77 = arith.subf %60, %76 : vector<1x128xf32>
        %c3_41 = arith.constant 3 : index
        %c0_42 = arith.constant 0 : index
        %78 = vector.load %arg20[%c3_41, %c0_42] : memref<4x128xf32, #tpu.memory_space<vmem>>, vector<1x128xf32>
        tpu.vector_store %arg20[%c3_41, %c0_42], %77 {strides = array<i32>} : memref<4x128xf32, #tpu.memory_space<vmem>>, vector<1x128xf32>,
      } else {
      }
    } else {
    }
    %c2_i32 = arith.constant 2 : i32
    %17 = arith.cmpi eq, %arg0, %c2_i32 : i32
    %18 = arith.extui %17 : i1 to i32
    %c0_i32_5 = arith.constant 0 : i32
    %19 = arith.cmpi ne, %18, %c0_i32_5 : i32
    scf.if %19 {
      %20 = arith.index_cast %arg1 : i32 to index
      %c0 = arith.constant 0 : index
      %c0_6 = arith.constant 0 : index
      %21 = vector.load %arg22[%20, %c0, %c0_6] : memref<1x512x128xbf16, #tpu.memory_space<vmem>>, vector<1x512x128xbf16>
      %22 = vector.shape_cast %21 : vector<1x512x128xbf16> to vector<512x128xbf16>
      %23 = arith.extf %22 : vector<512x128xbf16> to vector<512x128xf32>
      %c2 = arith.constant 2 : index
      %c0_7 = arith.constant 0 : index
      %24 = vector.load %arg20[%c2, %c0_7] : memref<4x128xf32, #tpu.memory_space<vmem>>, vector<1x128xf32>
      %25 = vector.broadcast %24 : vector<1x128xf32> to vector<512x128xf32>
      %26 = arith.mulf %23, %25 : vector<512x128xf32>
      %c3 = arith.constant 3 : index
      %c0_8 = arith.constant 0 : index
      %27 = vector.load %arg20[%c3, %c0_8] : memref<4x128xf32, #tpu.memory_space<vmem>>, vector<1x128xf32>
      %28 = vector.broadcast %27 : vector<1x128xf32> to vector<512x128xf32>
      %29 = arith.addf %26, %28 : vector<512x128xf32>
      %c0_9 = arith.constant 0 : index
      %c0_10 = arith.constant 0 : index
      %30 = vector.load %arg17[%c0_9, %c0_10] : memref<128x1xf32, #tpu.memory_space<vmem>>, vector<128x1xf32>
      %cst = arith.constant dense<0.000000e+00> : vector<512x1xf32>
      %31 = tpu.matmul %29, %30, %cst {dimension_numbers = #tpu.dot_dimension_numbers<[1], [0], [0], [1], [0, 0, 1, 1], [], []>} : vector<512x128xf32>, vector<128x1xf32>, vector<512x1xf32> -> vector<512x1xf32>
      %c0_11 = arith.constant 0 : index
      %c0_12 = arith.constant 0 : index
      %32 = vector.load %arg5[%c0_11, %c0_12] : memref<512x3xf32, #tpu.memory_space<vmem>>, vector<512x3xf32>
      %33 = vector.broadcast %31 : vector<512x1xf32> to vector<512x3xf32>
      %34 = arith.mulf %32, %33 : vector<512x3xf32>
      %35 = tpu.iota {dimensions = array<i32: 0>} : vector<32x512xi32>
      %c0_13 = arith.constant 0 : index
      %c0_14 = arith.constant 0 : index
      %36 = vector.load %arg2[%c0_13, %c0_14] : memref<1x512xi32, #tpu.memory_space<vmem>>, vector<1x512xi32>
      %37 = vector.broadcast %36 : vector<1x512xi32> to vector<32x512xi32>
      %38 = arith.cmpi eq, %35, %37 : vector<32x512xi32>
      %39 = arith.extui %38 : vector<32x512xi1> to vector<32x512xi32>
      %40 = arith.sitofp %39 : vector<32x512xi32> to vector<32x512xf32>
      %c0_15 = arith.constant 0 : index
      %c0_16 = arith.constant 0 : index
      %41 = vector.load %arg21[%c0_15, %c0_16] : memref<32x3xf32, #tpu.memory_space<vmem>>, vector<32x3xf32>
      %cst_17 = arith.constant dense<0.000000e+00> : vector<32x3xf32>
      %42 = tpu.matmul %40, %34, %cst_17 {dimension_numbers = #tpu.dot_dimension_numbers<[1], [0], [0], [1], [0, 0, 1, 1], [], []>} : vector<32x512xf32>, vector<512x3xf32>, vector<32x3xf32> -> vector<32x3xf32>
      %43 = arith.addf %41, %42 : vector<32x3xf32>
      %c0_18 = arith.constant 0 : index
      %c0_19 = arith.constant 0 : index
      %44 = vector.load %arg21[%c0_18, %c0_19] : memref<32x3xf32, #tpu.memory_space<vmem>>, vector<32x3xf32>
      tpu.vector_store %arg21[%c0_18, %c0_19], %43 {strides = array<i32>} : memref<32x3xf32, #tpu.memory_space<vmem>>, vector<32x3xf32>,
      %c0_i32_20 = arith.constant 0 : i32
      %45 = arith.cmpi eq, %arg1, %c0_i32_20 : i32
      %46 = arith.extui %45 : i1 to i32
      %c0_i32_21 = arith.constant 0 : i32
      %47 = arith.cmpi ne, %46, %c0_i32_21 : i32
      scf.if %47 {
        %c0_22 = arith.constant 0 : index
        %c0_23 = arith.constant 0 : index
        %48 = vector.load %arg21[%c0_22, %c0_23] : memref<32x3xf32, #tpu.memory_space<vmem>>, vector<32x3xf32>
        %cst_24 = arith.constant 0.00999999977 : f32
        %49 = vector.broadcast %cst_24 : f32 to vector<32x3xf32>
        %50 = arith.mulf %48, %49 : vector<32x3xf32>
        %c0_25 = arith.constant 0 : index
        %c0_26 = arith.constant 0 : index
        %51 = vector.load %arg6[%c0_25, %c0_26] : memref<32x3xf32, #tpu.memory_space<vmem>>, vector<32x3xf32>
        %c0_27 = arith.constant 0 : index
        %c0_28 = arith.constant 0 : index
        %52 = vector.load %arg7[%c0_27, %c0_28] : memref<32x3xf32, #tpu.memory_space<vmem>>, vector<32x3xf32>
        %53 = arith.mulf %50, %52 : vector<32x3xf32>
        %54 = arith.addf %51, %53 : vector<32x3xf32>
        %c0_29 = arith.constant 0 : index
        %c0_30 = arith.constant 0 : index
        %55 = vector.load %arg18[%c0_29, %c0_30] : memref<32x3xf32, #tpu.memory_space<vmem>>, vector<32x3xf32>
        tpu.vector_store %arg18[%c0_29, %c0_30], %54 {strides = array<i32>} : memref<32x3xf32, #tpu.memory_space<vmem>>, vector<32x3xf32>,
      } else {
      }
    } else {
    }
    return
  }
  func.func @transform_0(%arg0: i32, %arg1: i32) -> (i32, i32) {
    %c2_i32 = arith.constant 2 : i32
    %0 = arith.cmpi eq, %arg0, %c2_i32 : i32
    %c0_i32 = arith.constant 0 : i32
    %1 = arith.select %0, %arg1, %c0_i32 : i32
    %c0_i32_0 = arith.constant 0 : i32
    %c0_i32_1 = arith.constant 0 : i32
    return %c0_i32_0, %1 : i32, i32
  }
  func.func @transform_1(%arg0: i32, %arg1: i32) -> (i32, i32) {
    %c0_i32 = arith.constant 0 : i32
    %0 = arith.cmpi eq, %arg0, %c0_i32 : i32
    %c0_i32_0 = arith.constant 0 : i32
    %1 = arith.select %0, %arg1, %c0_i32_0 : i32
    %c0_i32_1 = arith.constant 0 : i32
    %c0_i32_2 = arith.constant 0 : i32
    return %1, %c0_i32_1 : i32, i32
  }
  func.func @transform_2(%arg0: i32, %arg1: i32) -> (i32, i32) {
    %c0_i32 = arith.constant 0 : i32
    %0 = arith.cmpi eq, %arg0, %c0_i32 : i32
    %c0_i32_0 = arith.constant 0 : i32
    %1 = arith.select %0, %arg1, %c0_i32_0 : i32
    %c0_i32_1 = arith.constant 0 : i32
    %c0_i32_2 = arith.constant 0 : i32
    return %1, %c0_i32_1 : i32, i32
  }
  func.func @transform_3(%arg0: i32, %arg1: i32) -> (i32, i32) {
    %c2_i32 = arith.constant 2 : i32
    %0 = arith.cmpi eq, %arg0, %c2_i32 : i32
    %c0_i32 = arith.constant 0 : i32
    %1 = arith.select %0, %arg1, %c0_i32 : i32
    %c0_i32_0 = arith.constant 0 : i32
    %c0_i32_1 = arith.constant 0 : i32
    return %1, %c0_i32_0 : i32, i32
  }
  func.func @transform_4(%arg0: i32, %arg1: i32) -> (i32, i32) {
    %c0_i32 = arith.constant 0 : i32
    %c0_i32_0 = arith.constant 0 : i32
    %c0_i32_1 = arith.constant 0 : i32
    return %c0_i32, %c0_i32_0 : i32, i32
  }
  func.func @transform_5(%arg0: i32, %arg1: i32) -> (i32, i32) {
    %c0_i32 = arith.constant 0 : i32
    %c0_i32_0 = arith.constant 0 : i32
    %c0_i32_1 = arith.constant 0 : i32
    return %c0_i32, %c0_i32_0 : i32, i32
  }
  func.func @transform_6(%arg0: i32, %arg1: i32) -> (i32, i32) {
    %c0_i32 = arith.constant 0 : i32
    %c0_i32_0 = arith.constant 0 : i32
    %c0_i32_1 = arith.constant 0 : i32
    return %c0_i32, %c0_i32_0 : i32, i32
  }
  func.func @transform_7(%arg0: i32, %arg1: i32) -> (i32, i32) {
    %c0_i32 = arith.constant 0 : i32
    %c0_i32_0 = arith.constant 0 : i32
    %c0_i32_1 = arith.constant 0 : i32
    return %c0_i32, %c0_i32_0 : i32, i32
  }
  func.func @transform_8(%arg0: i32, %arg1: i32) -> (i32, i32) {
    %c0_i32 = arith.constant 0 : i32
    %c0_i32_0 = arith.constant 0 : i32
    %c0_i32_1 = arith.constant 0 : i32
    return %c0_i32, %c0_i32_0 : i32, i32
  }
  func.func @transform_9(%arg0: i32, %arg1: i32) -> (i32, i32) {
    %c0_i32 = arith.constant 0 : i32
    %c0_i32_0 = arith.constant 0 : i32
    %c0_i32_1 = arith.constant 0 : i32
    return %c0_i32, %c0_i32_0 : i32, i32
  }
  func.func @transform_10(%arg0: i32, %arg1: i32) -> (i32, i32) {
    %c0_i32 = arith.constant 0 : i32
    %c0_i32_0 = arith.constant 0 : i32
    %c0_i32_1 = arith.constant 0 : i32
    return %c0_i32, %c0_i32_0 : i32, i32
  }
  func.func @transform_11(%arg0: i32, %arg1: i32) -> (i32, i32) {
    %c0_i32 = arith.constant 0 : i32
    %c0_i32_0 = arith.constant 0 : i32
    %c0_i32_1 = arith.constant 0 : i32
    return %c0_i32, %c0_i32_0 : i32, i32
  }
  func.func @transform_12(%arg0: i32, %arg1: i32) -> (i32, i32) {
    %c0_i32 = arith.constant 0 : i32
    %c0_i32_0 = arith.constant 0 : i32
    %c0_i32_1 = arith.constant 0 : i32
    return %c0_i32, %c0_i32_0 : i32, i32
  }
  func.func @transform_13(%arg0: i32, %arg1: i32) -> (i32, i32) {
    %c0_i32 = arith.constant 0 : i32
    %c0_i32_0 = arith.constant 0 : i32
    %c0_i32_1 = arith.constant 0 : i32
    return %c0_i32, %c0_i32_0 : i32, i32
  }
  func.func @transform_14(%arg0: i32, %arg1: i32) -> (i32, i32) {
    %c0_i32 = arith.constant 0 : i32
    %c0_i32_0 = arith.constant 0 : i32
    %c0_i32_1 = arith.constant 0 : i32
    return %c0_i32, %c0_i32_0 : i32, i32
  }
  func.func @transform_15(%arg0: i32, %arg1: i32) -> (i32, i32) {
    %c0_i32 = arith.constant 0 : i32
    %c0_i32_0 = arith.constant 0 : i32
    %c0_i32_1 = arith.constant 0 : i32
    return %c0_i32, %c0_i32_0 : i32, i32
  }
  func.func @transform_16(%arg0: i32, %arg1: i32) -> (i32, i32) {
    %c0_i32 = arith.constant 0 : i32
    %c0_i32_0 = arith.constant 0 : i32
    %c0_i32_1 = arith.constant 0 : i32
    return %c0_i32, %c0_i32_0 : i32, i32
  }
}

</mosaic_0001>

<bundles_post_ra>
// kernel: tpu_custom_call.1
= control target key start
LH: loop header
LB: loop body
LE: loop exit
PB: predicated region body
PF: predicated region fallthrough
CT: control target
= control target key end

     0   :  { %s6767_s21 = smov 0   ;;  %s6769_s22 = smov 0   ;;  %s8745_s0 = inlined_call_operand.vmem [shape: s32[1,512], index: 0, kind: input, shape index: {}]   ;;  %s8746_s1 = inlined_call_operand.vmem [shape: bf16[512,256], index: 1, kind: input, shape index: {}]   ;;  %s8747_s2 = inlined_call_operand.vmem [shape: bf16[512,8], index: 2, kind: input, shape index: {}]   ;;  %s8748_s3 = inlined_call_operand.vmem [shape: f32[512,3], index: 3, kind: input, shape index: {}]   ;;  %s8749_s4 = inlined_call_operand.vmem [shape: f32[32,3], index: 4, kind: input, shape index: {}]   ;;  %s8750_s5 = inlined_call_operand.vmem [shape: f32[32,3], index: 5, kind: input, shape index: {}]   ;;  %s8751_s6 = inlined_call_operand.vmem [shape: bf16[256,128], index: 6, kind: input, shape index: {}]   ;;  %s8752_s7 = inlined_call_operand.vmem [shape: bf16[8,128], index: 7, kind: input, shape index: {}]   ;;  %s8753_s8 = inlined_call_operand.vmem [shape: f32[1,128], index: 8, kind: input, shape index: {}]   ;;  %s8754_s9 = inlined_call_operand.vmem [shape: f32[1,128], index: 9, kind: input, shape index: {}]   ;;  %s8755_s10 = inlined_call_operand.vmem [shape: f32[1,128], index: 10, kind: input, shape index: {}]   ;;  %s8756_s11 = inlined_call_operand.vmem [shape: bf16[128,128], index: 11, kind: input, shape index: {}]   ;;  %s8757_s12 = inlined_call_operand.vmem [shape: f32[1,128], index: 12, kind: input, shape index: {}]   ;;  %s8758_s13 = inlined_call_operand.vmem [shape: f32[1,128], index: 13, kind: input, shape index: {}]   ;;  %s8759_s14 = inlined_call_operand.vmem [shape: f32[1,128], index: 14, kind: input, shape index: {}]   ;;  %s8760_s15 = inlined_call_operand.vmem [shape: f32[128,1], index: 15, kind: input, shape index: {}]   ;;  %s8761_s16 = inlined_call_operand.vmem [shape: f32[32,3], index: 16, kind: output, shape index: {}]  }
   0x1   :  { %8765 = sst [smem:[#allocation9_spill]] %s8745_s0  ;;  %s6771_s23 = smov 0  }
   0x2 LB: > { %s38_s24 = sadd.s32 1, %s6673_s22  ;;  %p5153_p0 = scmp.ge.s32.totalorder %s6677_s23, 1  ;;  %s6677_s23 = sphi %s6771_s23, %s26_s23   ;;  %s6673_s22 = sphi %s6769_s22, %s8774_s22   ;;  %s6669_s21 = sphi %s6767_s21, %s8773_s21  }
   0x3   : > { %p40_p1 = scmp.ge.s32.totalorder %s38_s24, 3  ;;  %p535_p2 = scmp.lt.s32.totalorder %s6677_s23, 4 }
   0x5   : > { %s8776_s24 = smov (%p40_p1, %s38_s24), 0  ;;  %p536_p3 = pnand %p5153_p0, %p535_p2 }
   0x7   : > { %539 = sbr.rel (%p536_p3) target bundleno = 1638 (0x666), region = 84 }
   0xc   : > { %p644_p4 = scmp.eq.s32.totalorder %s6669_s21, 0 }
   0xd   : > { %vm651_vm0 = vcmask (%p644_p4), 23552   ;;  %v6679_v0 = vmov (%p644_p4), 0.0  }
   0xe   : > { %649 = sbr.rel (!%p644_p4) target bundleno = 19 (0x13), region = 88  ;;  %650 = vst [vmem:[#allocation2] sm:$0xf] (%p644_p4), %v6679_v0 }
   0xf   : > { %652 = vst.msk [vmem:[#allocation4] sm:$0xff] (%p644_p4), %vm651_vm0, %v6679_v0 }
  0x10   : > { %653 = vst.msk [vmem:[#allocation4 + $0x8] sm:$0xff] (%p644_p4), %vm651_vm0, %v6679_v0 }
  0x11   : > { %654 = vst.msk [vmem:[#allocation4 + $0x10] sm:$0xff] (%p644_p4), %vm651_vm0, %v6679_v0 }
  0x12   : > { %655 = vst.msk [vmem:[#allocation4 + $0x18] sm:$0xff] (%p644_p4), %vm651_vm0, %v6679_v0 }
  0x13 PF: > { %v656_v1 = vlaneseq  ;;  %p5155_p5 = scmp.ne.s32.totalorder %s6669_s21, 0 }
  0x15   : > { %v6788_v2 = vshrl.u32 %v656_v1, 7 }
  0x17   : > { %v6791_v3 = vadd.s32 8, %v6788_v2  ;;  %v6794_v4 = vadd.s32 16, %v6788_v2  ;;  %v6797_v5 = vadd.s32 24, %v6788_v2  ;;  %v6800_v6 = vadd.s32 296, %v6788_v2  ;;  %853 = sbr.rel (%p5155_p5) target bundleno = 577 (0x241), region = 92 }
  0x19   : > { %8766 = vst [vmem:[#allocation6_spill] sm:$0xff] %v6791_v3  ;;  %vm824_vm1 = vcmp.lt.s32.totalorder %v6800_v6, 300 }
  0x1a   : > { %8767 = vst [vmem:[#allocation7_spill] sm:$0xff] %v6794_v4 }
  0x1b   : > { %8768 = vst [vmem:[#allocation8_spill] sm:$0xff] %v6797_v5 }
  0x1c   : > { %v1014_v7 = vld [vmem:[%s8752_s7] sm:$0xf]  ;;  %vm1272_vm2 = vcmask 1043456   ;;  %v5776_v8 = vld [vmem:[%s8751_s6 + $0x38] sm:$0xff]  ;;  %v5810_v12 = vld [vmem:[%s8747_s2 + $0xc8] sm:$0xff]  ;;  %vm1175_vm3 = vcmask 64512  }
  0x1d   : > { %v5784_v9 = vld [vmem:[%s8751_s6 + $0x78] sm:$0xff]  ;;  %v1274_v10 = vsel %vm1272_vm2, %v1014_v7, 0  ;;  %v5785_v11 = vld [vmem:[%s8747_s2] sm:$0xff]  ;;  %1861 = vmatpush.bf16.msra.mxu1 %v5776_v8  ;;  %v5775_v13 = vld [vmem:[%s8751_s6 + $0x30] sm:$0xff] }
  0x1e   : > { %1283 = vmatpush.bf16.msra.mxu0 %v1274_v10  ;;  %6525 = vmatpush.bf16.msra.mxu3 %v1274_v10  ;;  %v5783_v14 = vld [vmem:[%s8751_s6 + $0x70] sm:$0xff]  ;;  %v5774_v15 = vld [vmem:[%s8751_s6 + $0x28] sm:$0xff]  ;;  %v5773_v17 = vld [vmem:[%s8751_s6 + $0x20] sm:$0xff] }
  0x1f   : > { %2030 = vmatpush.bf16.msra.mxu2 %v5784_v9  ;;  %v5782_v16 = vld [vmem:[%s8751_s6 + $0x68] sm:$0xff]  ;;  %v5781_v18 = vld [vmem:[%s8751_s6 + $0x60] sm:$0xff]  ;;  %v5772_v19 = vld [vmem:[%s8751_s6 + $0x18] sm:$0xff] }
  0x20   : > { %v5780_v20 = vld [vmem:[%s8751_s6 + $0x58] sm:$0xff]  ;;  %v5786_v21 = vld [vmem:[%s8747_s2 + $0x8] sm:$0xff]  ;;  %v5811_v22 = vld [vmem:[%s8747_s2 + $0xd0] sm:$0xff] }
  0x21   : > { %5284 = vmatmul.msk.bf16.vlgmr.msra.gmra.mxu0 %vm1175_vm3, %v5785_v11  ;;  %5309 = vmatmul.msk.bf16.vlgmr.msra.gmra.mxu3 %vm1175_vm3, %v5810_v12  ;;  %v5771_v23 = vld [vmem:[%s8751_s6 + $0x10] sm:$0xff]  ;;  %v5770_v25 = vld [vmem:[%s8751_s6 + $0x8] sm:$0xff]  ;;  %v5769_v27 = vld [vmem:[%s8751_s6] sm:$0xff] }
  0x22   : > { %6526 = vmatpush.bf16.msrb.mxu3 %v5776_v8  ;;  %1862 = vmatpush.bf16.msra.mxu1 %v5775_v13  ;;  %v5779_v24 = vld [vmem:[%s8751_s6 + $0x50] sm:$0xff]  ;;  %v5778_v26 = vld [vmem:[%s8751_s6 + $0x48] sm:$0xff]  ;;  %v5777_v28 = vld [vmem:[%s8751_s6 + $0x40] sm:$0xff] }
  0x23   : > { %2031 = vmatpush.bf16.msra.mxu2 %v5783_v14  ;;  %v5318_v29 = vld [vmem:[%s8746_s1] sm:$0xf]  ;;  %v5706_v30 = vld [vmem:[%s8746_s1 + $0x4] sm:$0xf0]  ;;  %v5705_v31 = vld [vmem:[%s8746_s1 + $0x4] sm:$0xf] }
  0x24   : > { %v5320_v32 = vld [vmem:[%s8746_s1 + $0x8] sm:$0xf0]  ;;  %v5319_v33 = vor.u32 %v5706_v30, %v5318_v29  ;;  %v5787_v35 = vld [vmem:[%s8747_s2 + $0x10] sm:$0xff]  ;;  %v5812_v36 = vld [vmem:[%s8747_s2 + $0xd8] sm:$0xff] }
  0x25   : > { %v5323_v34 = vor.u32 %v5705_v31, %v5320_v32  ;;  %v5326_v37 = vld [vmem:[%s8746_s1 + $0x10] sm:$0xf]  ;;  %v5708_v38 = vld [vmem:[%s8746_s1 + $0x14] sm:$0xf0]  ;;  %v5707_v39 = vld [vmem:[%s8746_s1 + $0x14] sm:$0xf] }
  0x26   : > { %6527 = vmatpush.bf16.msrb.mxu3 %v5775_v13  ;;  %1863 = vmatpush.bf16.msra.mxu1 %v5774_v15  ;;  %v5328_v40 = vld [vmem:[%s8746_s1 + $0x18] sm:$0xf0]  ;;  %v5327_v41 = vor.u32 %v5708_v38, %v5326_v37  ;;  %v5813_v44 = vld [vmem:[%s8747_s2 + $0xe0] sm:$0xff]  ;;  %v5710_v46 = vld [vmem:[%s8746_s1 + $0x24] sm:$0xf0] }
  0x27   : > { %2032 = vmatpush.bf16.msra.mxu2 %v5782_v16  ;;  %v5331_v42 = vor.u32 %v5707_v39, %v5328_v40  ;;  %v5788_v43 = vld [vmem:[%s8747_s2 + $0x18] sm:$0xff]  ;;  %v5334_v45 = vld [vmem:[%s8746_s1 + $0x20] sm:$0xf]  ;;  %v5709_v47 = vld [vmem:[%s8746_s1 + $0x24] sm:$0xf] }
  0x28   : > { %v5336_v48 = vld [vmem:[%s8746_s1 + $0x28] sm:$0xf0]  ;;  %v5335_v49 = vor.u32 %v5710_v46, %v5334_v45  ;;  %v5789_v51 = vld [vmem:[%s8747_s2 + $0x20] sm:$0xff]  ;;  %v5342_v53 = vld [vmem:[%s8746_s1 + $0x30] sm:$0xf] }
  0x29   : > { %v5339_v50 = vor.u32 %v5709_v47, %v5336_v48  ;;  %v5814_v52 = vld [vmem:[%s8747_s2 + $0xe8] sm:$0xff]  ;;  %v5712_v54 = vld [vmem:[%s8746_s1 + $0x34] sm:$0xf0]  ;;  %v5711_v55 = vld [vmem:[%s8746_s1 + $0x34] sm:$0xf] }
  0x2a   : > { %6528 = vmatpush.bf16.msrb.mxu3 %v5774_v15  ;;  %1864 = vmatpush.bf16.msra.mxu1 %v5773_v17  ;;  %v5344_v56 = vld [vmem:[%s8746_s1 + $0x38] sm:$0xf0]  ;;  %v5343_v57 = vor.u32 %v5712_v54, %v5342_v53  ;;  %v5790_v59 = vld [vmem:[%s8747_s2 + $0x28] sm:$0xff]  ;;  %v5815_v60 = vld [vmem:[%s8747_s2 + $0xf0] sm:$0xff] }
  0x2b   : > { %2033 = vmatpush.bf16.msra.mxu2 %v5781_v18  ;;  %v5347_v58 = vor.u32 %v5711_v55, %v5344_v56  ;;  %v5350_v61 = vld [vmem:[%s8746_s1 + $0x40] sm:$0xf]  ;;  %v5714_v62 = vld [vmem:[%s8746_s1 + $0x44] sm:$0xf0]  ;;  %v5713_v63 = vld [vmem:[%s8746_s1 + $0x44] sm:$0xf] }
  0x2c   : > { %v5352_v0 = vld [vmem:[%s8746_s1 + $0x48] sm:$0xf0]  ;;  %v5351_v1 = vor.u32 %v5714_v62, %v5350_v61  ;;  %v5791_v8 = vld [vmem:[%s8747_s2 + $0x30] sm:$0xff]  ;;  %v5716_v11 = vld [vmem:[%s8746_s1 + $0x54] sm:$0xf0] }
  0x2d   : > { %v5355_v7 = vor.u32 %v5713_v63, %v5352_v0  ;;  %v5358_v10 = vld [vmem:[%s8746_s1 + $0x50] sm:$0xf]  ;;  %v5715_v12 = vld [vmem:[%s8746_s1 + $0x54] sm:$0xf]  ;;  %v5360_v13 = vld [vmem:[%s8746_s1 + $0x58] sm:$0xf0] }
  0x2e   : > { %6529 = vmatpush.bf16.msrb.mxu3 %v5773_v17  ;;  %1865 = vmatpush.bf16.msra.mxu1 %v5772_v19  ;;  %v5363_v15 = vor.u32 %v5715_v12, %v5360_v13  ;;  %v5754_v17 = vld [vmem:[%s8746_s1 + $0x184] sm:$0xf0]  ;;  %v5526_v39 = vld [vmem:[%s8746_s1 + $0x1a0] sm:$0xf]  ;;  %v5534_v53 = vld [vmem:[%s8746_s1 + $0x1b0] sm:$0xf] }
  0x2f   : > { %2034 = vmatpush.bf16.msra.mxu2 %v5780_v20  ;;  %v5758_v40 = vld [vmem:[%s8746_s1 + $0x1a4] sm:$0xf0]  ;;  %v5382_v47 = vld [vmem:[%s8746_s1 + $0x80] sm:$0xf]  ;;  %v5760_v54 = vld [vmem:[%s8746_s1 + $0x1b4] sm:$0xf0] }
  0x30   : > { %v5722_v48 = vld [vmem:[%s8746_s1 + $0x84] sm:$0xf0] }
  0x31   : > { %5285 = vmatmul.msk.bf16.gmra.mxu0 %vm1175_vm3, %v5786_v21  ;;  %5310 = vmatmul.msk.bf16.gmra.mxu3 %vm1175_vm3, %v5811_v22  ;;  %v5718_v21 = vld [vmem:[%s8746_s1 + $0x64] sm:$0xf0]  ;;  %v5717_v22 = vld [vmem:[%s8746_s1 + $0x64] sm:$0xf] }
  0x32   : > { %6530 = vmatpush.bf16.msrb.mxu3 %v5772_v19  ;;  %1866 = vmatpush.bf16.msra.mxu1 %v5771_v23 }
  0x33   : > { %2035 = vmatpush.bf16.msra.mxu2 %v5779_v24 }
  0x36   : > { %6531 = vmatpush.bf16.msrb.mxu3 %v5771_v23  ;;  %1867 = vmatpush.bf16.msra.mxu1 %v5770_v25  ;;  %v5368_v23 = vld [vmem:[%s8746_s1 + $0x68] sm:$0xf0] }
  0x37   : > { %2036 = vmatpush.bf16.msra.mxu2 %v5778_v26 }
  0x3a   : > { %6532 = vmatpush.bf16.msrb.mxu3 %v5770_v25  ;;  %1868 = vmatpush.bf16.msra.mxu1 %v5769_v27  ;;  %v5371_v25 = vor.u32 %v5717_v22, %v5368_v23 }
  0x3b   : > { %2037 = vmatpush.bf16.msra.mxu2 %v5777_v28 }
  0x3d   : > { %1869 = vmatmul.bf16.vlgmr.msra.gmra.mxu1 %v5319_v33  ;;  %v5374_v33 = vld [vmem:[%s8746_s1 + $0x70] sm:$0xf] }
  0x3e   : > { %6533 = vmatpush.bf16.msrb.mxu3 %v5769_v27  ;;  %2038 = vmatmul.bf16.vlgmr.msra.gmra.mxu2 %v5323_v34  ;;  %v5756_v27 = vld [vmem:[%s8746_s1 + $0x194] sm:$0xf0] }
  0x3f   : > { %v5720_v34 = vld [vmem:[%s8746_s1 + $0x74] sm:$0xf0] }
  0x40   : > { %v5375_v37 = vor.u32 %v5720_v34, %v5374_v33 }
  0x41   : > { %5286 = vmatmul.msk.bf16.gmra.mxu0 %vm1175_vm3, %v5787_v35  ;;  %5311 = vmatmul.msk.bf16.gmra.mxu3 %vm1175_vm3, %v5812_v36  ;;  %v5719_v35 = vld [vmem:[%s8746_s1 + $0x74] sm:$0xf]  ;;  %v5376_v36 = vld [vmem:[%s8746_s1 + $0x78] sm:$0xf0] }
  0x42   : > { %6534 = vmatpush.bf16.msra.mxu3 %v5784_v9  ;;  %v5816_v9 = vld [vmem:[%s8747_s2 + $0xf8] sm:$0xff]  ;;  %v5379_v38 = vor.u32 %v5719_v35, %v5376_v36 }
  0x46   : > { %6535 = vmatpush.bf16.msra.mxu3 %v5783_v14  ;;  %v5359_v14 = vor.u32 %v5716_v11, %v5358_v10  ;;  %v5723_v10 = vld [vmem:[%s8746_s1 + $0x94] sm:$0xf]  ;;  %v5392_v11 = vld [vmem:[%s8746_s1 + $0x98] sm:$0xf0] }
  0x4a   : > { %6536 = vmatpush.bf16.msra.mxu3 %v5782_v16  ;;  %v5510_v16 = vld [vmem:[%s8746_s1 + $0x180] sm:$0xf] }
  0x4b   : > { %v5511_v19 = vor.u32 %v5754_v17, %v5510_v16  ;;  %v5395_v17 = vor.u32 %v5723_v10, %v5392_v11 }
  0x4d   : > { %1874 = vmatmul.bf16.gmra.mxu1 %v5327_v41 }
  0x4e   : > { %6537 = vmatpush.bf16.msra.mxu3 %v5781_v18  ;;  %2043 = vmatmul.bf16.gmra.mxu2 %v5331_v42  ;;  %v5792_v18 = vld [vmem:[%s8747_s2 + $0x38] sm:$0xff]  ;;  %v5794_v42 = vld [vmem:[%s8747_s2 + $0x48] sm:$0xff] }
  0x51   : > { %5287 = vmatmul.msk.bf16.gmra.mxu0 %vm1175_vm3, %v5788_v43  ;;  %5312 = vmatmul.msk.bf16.gmra.mxu3 %vm1175_vm3, %v5813_v44  ;;  %v5527_v43 = vor.u32 %v5758_v40, %v5526_v39 }
  0x52   : > { %6538 = vmatpush.bf16.msra.mxu3 %v5780_v20  ;;  %v5366_v20 = vld [vmem:[%s8746_s1 + $0x60] sm:$0xf] }
  0x56   : > { %6539 = vmatpush.bf16.msra.mxu3 %v5779_v24  ;;  %v5367_v24 = vor.u32 %v5718_v21, %v5366_v20 }
  0x5a   : > { %6540 = vmatpush.bf16.msra.mxu3 %v5778_v26  ;;  %v5518_v26 = vld [vmem:[%s8746_s1 + $0x190] sm:$0xf] }
  0x5b   : > { %v5519_v29 = vor.u32 %v5756_v27, %v5518_v26 }
  0x5d   : > { %1879 = vmatmul.bf16.gmra.mxu1 %v5335_v49  ;;  %v5721_v49 = vld [vmem:[%s8746_s1 + $0x84] sm:$0xf] }
  0x5e   : > { %6541 = vmatpush.bf16.msra.mxu3 %v5777_v28  ;;  %2048 = vmatmul.bf16.gmra.mxu2 %v5339_v50  ;;  %v5793_v28 = vld [vmem:[%s8747_s2 + $0x40] sm:$0xff]  ;;  %v5384_v50 = vld [vmem:[%s8746_s1 + $0x88] sm:$0xf0] }
  0x61   : > { %5288 = vmatmul.msk.bf16.gmra.mxu0 %vm1175_vm3, %v5789_v51  ;;  %5313 = vmatmul.msk.bf16.gmra.mxu3 %vm1175_vm3, %v5814_v52  ;;  %v5383_v51 = vor.u32 %v5722_v48, %v5382_v47  ;;  %v5387_v52 = vor.u32 %v5721_v49, %v5384_v50  ;;  %v5400_v47 = vld [vmem:[%s8746_s1 + $0xa8] sm:$0xf0] }
  0x6d   : > { %1884 = vmatmul.bf16.gmra.mxu1 %v5343_v57  ;;  %v5795_v57 = vld [vmem:[%s8747_s2 + $0x50] sm:$0xff] }
  0x6e   : > { %2053 = vmatmul.bf16.gmra.mxu2 %v5347_v58  ;;  %v5535_v58 = vor.u32 %v5760_v54, %v5534_v53  ;;  %v5550_v54 = vld [vmem:[%s8746_s1 + $0x1d0] sm:$0xf] }
  0x71   : > { %5289 = vmatmul.msk.bf16.gmra.mxu0 %vm1175_vm3, %v5790_v59  ;;  %5314 = vmatmul.msk.bf16.gmra.mxu3 %vm1175_vm3, %v5815_v60 }
  0x7d   : > { %1889 = vmatmul.bf16.gmra.mxu1 %v5351_v1  ;;  %v7076_v1 = vld [vmem:[%s8753_s8] ss:$0 sm:$0xff] }
  0x7e   : > { %2058 = vmatmul.bf16.gmra.mxu2 %v5355_v7 }
  0x81   : > { %5290 = vmatmul.msk.bf16.gmra.mxu0 %vm1175_vm3, %v5791_v8  ;;  %5315 = vmatmul.msk.bf16.gmra.mxu3 %vm1175_vm3, %v5816_v9  ;;  %v5390_v8 = vld [vmem:[%s8746_s1 + $0x90] sm:$0xf]  ;;  %v5724_v9 = vld [vmem:[%s8746_s1 + $0x94] sm:$0xf0] }
  0x82   : > { %v5391_v16 = vor.u32 %v5724_v9, %v5390_v8 }
  0x8d   : > { %1894 = vmatmul.bf16.gmra.mxu1 %v5359_v14 }
  0x8e   : > { %2063 = vmatmul.bf16.gmra.mxu2 %v5363_v15 }
  0x91   : > { %5291 = vmatmul.msk.bf16.gmra.mxu0 %vm1175_vm3, %v5792_v18  ;;  %1989 = vmatmul.bf16.vlgmr.msrb.gmra.mxu3 %v5511_v19  ;;  %v5542_v18 = vld [vmem:[%s8746_s1 + $0x1c0] sm:$0xf]  ;;  %v5762_v19 = vld [vmem:[%s8746_s1 + $0x1c4] sm:$0xf0] }
  0x9d   : > { %1899 = vmatmul.bf16.gmra.mxu1 %v5367_v24  ;;  %v5796_v24 = vld [vmem:[%s8747_s2 + $0x58] sm:$0xff] }
  0x9e   : > { %v1285_v30 = vpop.f32.mrf.mxu0  ;;  %2068 = vmatmul.bf16.gmra.mxu2 %v5371_v25  ;;  %v5543_v25 = vor.u32 %v5762_v19, %v5542_v18 }
  0xa1   : > { %5292 = vmatmul.msk.bf16.gmra.mxu0 %vm1175_vm3, %v5793_v28  ;;  %1994 = vmatmul.bf16.gmra.mxu3 %v5519_v29 }
  0xa4   : > { %v7015_v31 = vpop.f32.mrf.mxu3 }
  0xa6   : > { %v1287_v32 = vpop.f32.mrf.mxu0 }
  0xac   : > { %v7035_v41 = vpop.f32.mrf.mxu3 }
  0xad   : > { %1904 = vmatmul.bf16.gmra.mxu1 %v5375_v37 }
  0xae   : > { %v1290_v44 = vpop.f32.mrf.mxu0  ;;  %2073 = vmatmul.bf16.gmra.mxu2 %v5379_v38 }
  0xb1   : > { %5293 = vmatmul.msk.bf16.gmra.mxu0 %vm1175_vm3, %v5794_v42  ;;  %1999 = vmatmul.bf16.gmra.mxu3 %v5527_v43  ;;  %v5398_v42 = vld [vmem:[%s8746_s1 + $0xa0] sm:$0xf]  ;;  %v5726_v43 = vld [vmem:[%s8746_s1 + $0xa4] sm:$0xf0] }
  0xb4   : > { %v7041_v45 = vpop.f32.mrf.mxu3 }
  0xb6   : > { %v7043_v46 = vpop.f32.mrf.mxu0 }
  0xba   : > { %v1870_v55 = vpop.f32.mrf.mxu1 }
  0xbb   : > { %v1871_v61 = vadd.f32 %v1870_v55, %v1285_v30  ;;  %v5764_v55 = vld [vmem:[%s8746_s1 + $0x1d4] sm:$0xf0] }
  0xbc   : > { %v7063_v56 = vpop.f32.mrf.mxu3 }
  0xbd   : > { %1909 = vmatmul.bf16.gmra.mxu1 %v5383_v51 }
  0xbe   : > { %v7068_v59 = vpop.f32.mrf.mxu0  ;;  %2078 = vmatmul.bf16.gmra.mxu2 %v5387_v52  ;;  %v5399_v52 = vor.u32 %v5726_v43, %v5398_v42 }
  0xc1   : > { %5294 = vmatmul.msk.bf16.gmra.mxu0 %vm1175_vm3, %v5795_v57  ;;  %2004 = vmatmul.bf16.gmra.mxu3 %v5535_v58  ;;  %v2039_v60 = vpop.f32.mrf.mxu2 }
  0xc2   : > { %v1872_v62 = vpop.f32.mrf.mxu1  ;;  %v2040_v0 = vadd.f32 %v2039_v60, %v1871_v61  ;;  %v5551_v61 = vor.u32 %v5764_v55, %v5550_v54 }
  0xc3   : > { %v1873_v12 = vadd.f32 %v1872_v62, %v1287_v32 }
  0xc4   : > { %v7071_v63 = vpop.f32.mrf.mxu3  ;;  %v2203_v13 = vadd.f32 %v7076_v1, %v2040_v0 }
  0xc6   : > { %v7078_v7 = vpop.f32.mrf.mxu0  ;;  %v2532_v23 = vmul.f32 %v2203_v13, %v2203_v13 }
  0xc9   : > { %v2041_v14 = vpop.f32.mrf.mxu2 }
  0xca   : > { %v2042_v15 = vadd.f32 %v2041_v14, %v1873_v12  ;;  %v1875_v20 = vpop.f32.mrf.mxu1 }
  0xcb   : > { %v1876_v32 = vadd.f32 %v1875_v20, %v1290_v44  ;;  %v5725_v44 = vld [vmem:[%s8746_s1 + $0xa4] sm:$0xf]  ;;  %v5406_v20 = vld [vmem:[%s8746_s1 + $0xb0] sm:$0xf] }
  0xcc   : > { %v2204_v21 = vadd.f32 %v7076_v1, %v2042_v15  ;;  %v7100_v22 = vpop.f32.mrf.mxu3  ;;  %v5403_v53 = vor.u32 %v5725_v44, %v5400_v47 }
  0xcd   : > { %1914 = vmatmul.bf16.gmra.mxu1 %v5391_v16 }
  0xce   : > { %v2460_v26 = vadd.f32 %v2204_v21, %v2203_v13  ;;  %v2533_v27 = vmul.f32 %v2204_v21, %v2204_v21  ;;  %v5828_v28 = vpack.c.bf16 %v2204_v21, %v2203_v13  ;;  %v7105_v29 = vpop.f32.mrf.mxu0  ;;  %2083 = vmatmul.bf16.gmra.mxu2 %v5395_v17  ;;  %v5727_v21 = vld [vmem:[%s8746_s1 + $0xb4] sm:$0xf] }
  0xd0   : > { %v2596_v30 = vadd.f32 %v2533_v27, %v2532_v23  ;;  %5829 = vst [vmem:[#allocation5 + $0xb0] sm:$0xff] %v5828_v28   ;;  %v5408_v23 = vld [vmem:[%s8746_s1 + $0xb8] sm:$0xf0] }
  0xd1   : > { %5295 = vmatmul.msk.bf16.gmra.mxu0 %vm1175_vm3, %v5796_v24  ;;  %2009 = vmatmul.bf16.gmra.mxu3 %v5543_v25  ;;  %v2044_v33 = vpop.f32.mrf.mxu2 }
  0xd2   : > { %v2045_v34 = vadd.f32 %v2044_v33, %v1876_v32  ;;  %v1877_v35 = vpop.f32.mrf.mxu1  ;;  %v5558_v32 = vld [vmem:[%s8746_s1 + $0x1e0] sm:$0xf]  ;;  %v5766_v33 = vld [vmem:[%s8746_s1 + $0x1e4] sm:$0xf0] }
  0xd3   : > { %v1878_v49 = vadd.f32 %v1877_v35, %v7043_v46  ;;  %v5797_v46 = vld [vmem:[%s8747_s2 + $0x60] sm:$0xff] }
  0xd4   : > { %v2205_v36 = vadd.f32 %v7076_v1, %v2045_v34  ;;  %v7109_v37 = vpop.f32.mrf.mxu3 }
  0xd6   : > { %v2461_v38 = vadd.f32 %v2460_v26, %v2205_v36  ;;  %v2534_v39 = vmul.f32 %v2205_v36, %v2205_v36  ;;  %v7111_v40 = vpop.f32.mrf.mxu0 }
  0xd8   : > { %v2597_v48 = vadd.f32 %v2596_v30, %v2534_v39  ;;  %v5411_v30 = vor.u32 %v5727_v21, %v5408_v23 }
  0xd9   : > { %v2046_v50 = vpop.f32.mrf.mxu2 }
  0xda   : > { %v2047_v51 = vadd.f32 %v2046_v50, %v1878_v49  ;;  %v1880_v57 = vpop.f32.mrf.mxu1 }
  0xdb   : > { %v1881_v11 = vadd.f32 %v1880_v57, %v7068_v59  ;;  %v5728_v59 = vld [vmem:[%s8746_s1 + $0xb4] sm:$0xf0] }
  0xdc   : > { %v2206_v58 = vadd.f32 %v7076_v1, %v2047_v51  ;;  %v7133_v60 = vpop.f32.mrf.mxu3  ;;  %v5407_v28 = vor.u32 %v5728_v59, %v5406_v20 }
  0xdd   : > { %1919 = vmatmul.bf16.gmra.mxu1 %v5399_v52 }
  0xde   : > { %v2462_v62 = vadd.f32 %v2461_v38, %v2206_v58  ;;  %v2535_v0 = vmul.f32 %v2206_v58, %v2206_v58  ;;  %v5833_v8 = vpack.c.bf16 %v2206_v58, %v2205_v36  ;;  %v7138_v9 = vpop.f32.mrf.mxu0  ;;  %2088 = vmatmul.bf16.gmra.mxu2 %v5403_v53  ;;  %v5559_v38 = vor.u32 %v5766_v33, %v5558_v32  ;;  %v5414_v58 = vld [vmem:[%s8746_s1 + $0xc0] sm:$0xf] }
  0xe0   : > { %v2598_v10 = vadd.f32 %v2597_v48, %v2535_v0  ;;  %6401 = vst [vmem:[#allocation5] sm:$0xff] %v5833_v8  }
  0xe1   : > { %5296 = vmatmul.msk.bf16.gmra.mxu0 %vm1175_vm3, %v5797_v46  ;;  %2014 = vmatmul.bf16.gmra.mxu3 %v5551_v61  ;;  %v2049_v12 = vpop.f32.mrf.mxu2  ;;  %v5729_v46 = vld [vmem:[%s8746_s1 + $0xc4] sm:$0xf]  ;;  %v5416_v61 = vld [vmem:[%s8746_s1 + $0xc8] sm:$0xf0] }
  0xe2   : > { %v2050_v13 = vadd.f32 %v2049_v12, %v1881_v11  ;;  %v1882_v14 = vpop.f32.mrf.mxu1  ;;  %v5419_v12 = vor.u32 %v5729_v46, %v5416_v61 }
  0xe3   : > { %v1883_v25 = vadd.f32 %v1882_v14, %v7078_v7  ;;  %v5798_v7 = vld [vmem:[%s8747_s2 + $0x68] sm:$0xff]  ;;  %v5768_v14 = vld [vmem:[%s8746_s1 + $0x1f4] sm:$0xf0] }
  0xe4   : > { %v2207_v15 = vadd.f32 %v7076_v1, %v2050_v13  ;;  %v7143_v16 = vpop.f32.mrf.mxu3  ;;  %v5566_v13 = vld [vmem:[%s8746_s1 + $0x1f0] sm:$0xf] }
  0xe5   : > { %v5567_v20 = vor.u32 %v5768_v14, %v5566_v13 }
  0xe6   : > { %v2463_v17 = vadd.f32 %v2462_v62, %v2207_v15  ;;  %v2536_v18 = vmul.f32 %v2207_v15, %v2207_v15  ;;  %v7145_v19 = vpop.f32.mrf.mxu0 }
  0xe8   : > { %v2599_v24 = vadd.f32 %v2598_v10, %v2536_v18 }
  0xe9   : > { %v2051_v26 = vpop.f32.mrf.mxu2 }
  0xea   : > { %v2052_v27 = vadd.f32 %v2051_v26, %v1883_v25  ;;  %v1885_v34 = vpop.f32.mrf.mxu1 }
  0xeb   : > { %v1886_v48 = vadd.f32 %v1885_v34, %v7105_v29  ;;  %v5730_v29 = vld [vmem:[%s8746_s1 + $0xc4] sm:$0xf0] }
  0xec   : > { %v2208_v35 = vadd.f32 %v7076_v1, %v2052_v27  ;;  %v7167_v36 = vpop.f32.mrf.mxu3  ;;  %v5415_v11 = vor.u32 %v5730_v29, %v5414_v58 }
  0xed   : > { %1924 = vmatmul.bf16.gmra.mxu1 %v5407_v28 }
  0xee   : > { %v2464_v39 = vadd.f32 %v2463_v17, %v2208_v35  ;;  %v2537_v42 = vmul.f32 %v2208_v35, %v2208_v35  ;;  %v5838_v43 = vpack.c.bf16 %v2208_v35, %v2207_v15  ;;  %v7172_v44 = vpop.f32.mrf.mxu0  ;;  %2093 = vmatmul.bf16.gmra.mxu2 %v5411_v30 }
  0xf0   : > { %v2600_v47 = vadd.f32 %v2599_v24, %v2537_v42  ;;  %6402 = vst [vmem:[#allocation5 + $0xd8] sm:$0xff] %v5838_v43   ;;  %v5424_v42 = vld [vmem:[%s8746_s1 + $0xd8] sm:$0xf0] }
  0xf1   : > { %5297 = vmatmul.msk.bf16.gmra.mxu0 %vm1175_vm3, %v5798_v7  ;;  %2019 = vmatmul.bf16.gmra.mxu3 %v5559_v38  ;;  %v2054_v49 = vpop.f32.mrf.mxu2  ;;  %v5422_v38 = vld [vmem:[%s8746_s1 + $0xd0] sm:$0xf] }
  0xf2   : > { %v2055_v50 = vadd.f32 %v2054_v49, %v1886_v48  ;;  %v1887_v51 = vpop.f32.mrf.mxu1 }
  0xf3   : > { %v1888_v0 = vadd.f32 %v1887_v51, %v7111_v40  ;;  %v5799_v40 = vld [vmem:[%s8747_s2 + $0x70] sm:$0xff] }
  0xf4   : > { %v2209_v52 = vadd.f32 %v7076_v1, %v2055_v50  ;;  %v7177_v53 = vpop.f32.mrf.mxu3 }
  0xf6   : > { %v2465_v54 = vadd.f32 %v2464_v39, %v2209_v52  ;;  %v2538_v55 = vmul.f32 %v2209_v52, %v2209_v52  ;;  %v7179_v57 = vpop.f32.mrf.mxu0  ;;  %v5731_v39 = vld [vmem:[%s8746_s1 + $0xd4] sm:$0xf] }
  0xf7   : > { %v5427_v51 = vor.u32 %v5731_v39, %v5424_v42 }
  0xf8   : > { %v2601_v62 = vadd.f32 %v2600_v47, %v2538_v55 }
  0xf9   : > { %v2056_v8 = vpop.f32.mrf.mxu2 }
  0xfa   : > { %v2057_v10 = vadd.f32 %v2056_v8, %v1888_v0  ;;  %v1890_v15 = vpop.f32.mrf.mxu1 }
  0xfb   : > { %v1891_v26 = vadd.f32 %v1890_v15, %v7138_v9  ;;  %v5732_v9 = vld [vmem:[%s8746_s1 + $0xd4] sm:$0xf0] }
  0xfc   : > { %v2210_v17 = vadd.f32 %v7076_v1, %v2057_v10  ;;  %v7201_v18 = vpop.f32.mrf.mxu3  ;;  %v5423_v50 = vor.u32 %v5732_v9, %v5422_v38  ;;  %v5520_v38 = vld [vmem:[%s8746_s1 + $0x198] sm:$0xf0] }
  0xfd   : > { %1929 = vmatmul.bf16.gmra.mxu1 %v5415_v11 }
  0xfe   : > { %v2466_v59 = vadd.f32 %v2465_v54, %v2210_v17  ;;  %v2539_v21 = vmul.f32 %v2210_v17, %v2210_v17  ;;  %v5843_v23 = vpack.c.bf16 %v2210_v17, %v2209_v52  ;;  %v7206_v24 = vpop.f32.mrf.mxu0  ;;  %2098 = vmatmul.bf16.gmra.mxu2 %v5419_v12  ;;  %v5753_v52 = vld [vmem:[%s8746_s1 + $0x184] sm:$0xf]  ;;  %v5512_v54 = vld [vmem:[%s8746_s1 + $0x188] sm:$0xf0] }
  0xff   : > { %v5515_v46 = vor.u32 %v5753_v52, %v5512_v54 }
 0x100   : > { %v2602_v25 = vadd.f32 %v2601_v62, %v2539_v21  ;;  %6403 = vst [vmem:[#allocation5 + $0x18] sm:$0xff] %v5843_v23   ;;  %v5430_v21 = vld [vmem:[%s8746_s1 + $0xe0] sm:$0xf]  ;;  %v5733_v23 = vld [vmem:[%s8746_s1 + $0xe4] sm:$0xf] }
 0x101   : > { %5298 = vmatmul.msk.bf16.gmra.mxu0 %vm1175_vm3, %v5799_v40  ;;  %2024 = vmatmul.bf16.gmra.mxu3 %v5567_v20  ;;  %v2059_v27 = vpop.f32.mrf.mxu2 }
 0x102   : > { %v2060_v28 = vadd.f32 %v2059_v27, %v1891_v26  ;;  %v1892_v30 = vpop.f32.mrf.mxu1 }
 0x103   : > { %v1893_v47 = vadd.f32 %v1892_v30, %v7145_v19  ;;  %v5800_v19 = vld [vmem:[%s8747_s2 + $0x78] sm:$0xff] }
 0x104   : > { %v2211_v32 = vadd.f32 %v7076_v1, %v2060_v28  ;;  %v7211_v33 = vpop.f32.mrf.mxu3 }
 0x106   : > { %v2467_v34 = vadd.f32 %v2466_v59, %v2211_v32  ;;  %v2540_v35 = vmul.f32 %v2211_v32, %v2211_v32  ;;  %v7213_v7 = vpop.f32.mrf.mxu0 }
 0x108   : > { %v2603_v43 = vadd.f32 %v2602_v25, %v2540_v35  ;;  %v5432_v25 = vld [vmem:[%s8746_s1 + $0xe8] sm:$0xf0]  ;;  %v5755_v35 = vld [vmem:[%s8746_s1 + $0x194] sm:$0xf] }
 0x109   : > { %v2061_v48 = vpop.f32.mrf.mxu2 }
 0x10a   : > { %v2062_v49 = vadd.f32 %v2061_v48, %v1893_v47  ;;  %v1895_v55 = vpop.f32.mrf.mxu1 }
 0x10b   : > { %v1896_v11 = vadd.f32 %v1895_v55, %v7172_v44  ;;  %v5734_v44 = vld [vmem:[%s8746_s1 + $0xe4] sm:$0xf0] }
 0x10c   : > { %v2212_v58 = vadd.f32 %v7076_v1, %v2062_v49  ;;  %v7235_v29 = vpop.f32.mrf.mxu3 }
 0x10d   : > { %1934 = vmatmul.bf16.gmra.mxu1 %v5423_v50 }
 0x10e   : > { %v2468_v61 = vadd.f32 %v2467_v34, %v2212_v58  ;;  %v2541_v62 = vmul.f32 %v2212_v58, %v2212_v58  ;;  %v5848_v0 = vpack.c.bf16 %v2212_v58, %v2211_v32  ;;  %v7240_v8 = vpop.f32.mrf.mxu0  ;;  %2103 = vmatmul.bf16.gmra.mxu2 %v5427_v51  ;;  %v5431_v32 = vor.u32 %v5734_v44, %v5430_v21  ;;  %v5757_v44 = vld [vmem:[%s8746_s1 + $0x1a4] sm:$0xf] }
 0x10f   : > { %v5435_v34 = vor.u32 %v5733_v23, %v5432_v25  ;;  %v5528_v23 = vld [vmem:[%s8746_s1 + $0x1a8] sm:$0xf0] }
 0x110   : > { %v2604_v10 = vadd.f32 %v2603_v43, %v2541_v62  ;;  %6404 = vst [vmem:[#allocation5 + $0x50] sm:$0xff] %v5848_v0   ;;  %v5523_v43 = vor.u32 %v5755_v35, %v5520_v38 }
 0x111   : > { %5299 = vmatmul.msk.bf16.gmra.mxu0 %vm1175_vm3, %v5800_v19  ;;  %v2064_v12 = vpop.f32.mrf.mxu2  ;;  %2158 = vmatmul.bf16.vlgmr.msra.gmra.mxu3 %v5515_v46 }
 0x112   : > { %v2065_v13 = vadd.f32 %v2064_v12, %v1896_v11  ;;  %v1897_v14 = vpop.f32.mrf.mxu1  ;;  %v5735_v11 = vld [vmem:[%s8746_s1 + $0xf4] sm:$0xf]  ;;  %v5440_v12 = vld [vmem:[%s8746_s1 + $0xf8] sm:$0xf0] }
 0x113   : > { %v1898_v27 = vadd.f32 %v1897_v14, %v7179_v57  ;;  %v5801_v57 = vld [vmem:[%s8747_s2 + $0x80] sm:$0xff]  ;;  %v5443_v21 = vor.u32 %v5735_v11, %v5440_v12  ;;  %v5759_v12 = vld [vmem:[%s8746_s1 + $0x1b4] sm:$0xf] }
 0x114   : > { %v2213_v15 = vadd.f32 %v7076_v1, %v2065_v13  ;;  %v7245_v17 = vpop.f32.mrf.mxu3 }
 0x116   : > { %v2469_v40 = vadd.f32 %v2468_v61, %v2213_v15  ;;  %v2542_v20 = vmul.f32 %v2213_v15, %v2213_v15  ;;  %v7247_v59 = vpop.f32.mrf.mxu0 }
 0x118   : > { %v2605_v26 = vadd.f32 %v2604_v10, %v2542_v20  ;;  %v5438_v10 = vld [vmem:[%s8746_s1 + $0xf0] sm:$0xf] }
 0x119   : > { %v2066_v28 = vpop.f32.mrf.mxu2 }
 0x11a   : > { %v2067_v30 = vadd.f32 %v2066_v28, %v1898_v27  ;;  %v1900_v9 = vpop.f32.mrf.mxu1  ;;  %v5531_v28 = vor.u32 %v5757_v44, %v5528_v23 }
 0x11b   : > { %v1901_v52 = vadd.f32 %v1900_v9, %v7206_v24  ;;  %v5736_v24 = vld [vmem:[%s8746_s1 + $0xf4] sm:$0xf0] }
 0x11c   : > { %v2214_v39 = vadd.f32 %v7076_v1, %v2067_v30  ;;  %v7269_v42 = vpop.f32.mrf.mxu3  ;;  %v5439_v20 = vor.u32 %v5736_v24, %v5438_v10 }
 0x11d   : > { %1939 = vmatmul.bf16.gmra.mxu1 %v5431_v32 }
 0x11e   : > { %v2470_v47 = vadd.f32 %v2469_v40, %v2214_v39  ;;  %v2543_v48 = vmul.f32 %v2214_v39, %v2214_v39  ;;  %v5853_v49 = vpack.c.bf16 %v2214_v39, %v2213_v15  ;;  %v7274_v50 = vpop.f32.mrf.mxu0  ;;  %2108 = vmatmul.bf16.gmra.mxu2 %v5435_v34 }
 0x120   : > { %v2606_v51 = vadd.f32 %v2605_v26, %v2543_v48  ;;  %6405 = vst [vmem:[#allocation5 + $0x68] sm:$0xff] %v5853_v49  }
 0x121   : > { %5300 = vmatmul.msk.bf16.gmra.mxu0 %vm1175_vm3, %v5801_v57  ;;  %v2069_v54 = vpop.f32.mrf.mxu2  ;;  %2163 = vmatmul.bf16.gmra.mxu3 %v5523_v43 }
 0x122   : > { %v2070_v55 = vadd.f32 %v2069_v54, %v1901_v52  ;;  %v1902_v58 = vpop.f32.mrf.mxu1  ;;  %v5446_v54 = vld [vmem:[%s8746_s1 + $0x100] sm:$0xf] }
 0x123   : > { %v1903_v14 = vadd.f32 %v1902_v58, %v7213_v7  ;;  %v5802_v7 = vld [vmem:[%s8747_s2 + $0x88] sm:$0xff] }
 0x124   : > { %v2215_v19 = vadd.f32 %v7076_v1, %v2070_v55  ;;  %v7279_v46 = vpop.f32.mrf.mxu3  ;;  %v5737_v55 = vld [vmem:[%s8746_s1 + $0x104] sm:$0xf]  ;;  %v5448_v58 = vld [vmem:[%s8746_s1 + $0x108] sm:$0xf0] }
 0x125   : > { %v5451_v11 = vor.u32 %v5737_v55, %v5448_v58 }
 0x126   : > { %v2471_v61 = vadd.f32 %v2470_v47, %v2215_v19  ;;  %v2544_v62 = vmul.f32 %v2215_v19, %v2215_v19  ;;  %v7281_v0 = vpop.f32.mrf.mxu0 }
 0x128   : > { %v2607_v13 = vadd.f32 %v2606_v51, %v2544_v62 }
 0x129   : > { %v2071_v15 = vpop.f32.mrf.mxu2 }
 0x12a   : > { %v2072_v40 = vadd.f32 %v2071_v15, %v1903_v14  ;;  %v1905_v25 = vpop.f32.mrf.mxu1 }
 0x12b   : > { %v1906_v9 = vadd.f32 %v1905_v25, %v7240_v8  ;;  %v5738_v8 = vld [vmem:[%s8746_s1 + $0x104] sm:$0xf0] }
 0x12c   : > { %v2216_v26 = vadd.f32 %v7076_v1, %v2072_v40  ;;  %v7303_v27 = vpop.f32.mrf.mxu3  ;;  %v5447_v24 = vor.u32 %v5738_v8, %v5446_v54 }
 0x12d   : > { %1944 = vmatmul.bf16.gmra.mxu1 %v5439_v20 }
 0x12e   : > { %v2472_v30 = vadd.f32 %v2471_v61, %v2216_v26  ;;  %v2545_v32 = vmul.f32 %v2216_v26, %v2216_v26  ;;  %v5858_v34 = vpack.c.bf16 %v2216_v26, %v2215_v19  ;;  %v7308_v35 = vpop.f32.mrf.mxu0  ;;  %2113 = vmatmul.bf16.gmra.mxu2 %v5443_v21 }
 0x130   : > { %v2608_v38 = vadd.f32 %v2607_v13, %v2545_v32  ;;  %6406 = vst [vmem:[#allocation5 + $0x30] sm:$0xff] %v5858_v34   ;;  %v5536_v13 = vld [vmem:[%s8746_s1 + $0x1b8] sm:$0xf0] }
 0x131   : > { %5301 = vmatmul.msk.bf16.gmra.mxu0 %vm1175_vm3, %v5802_v7  ;;  %v2074_v39 = vpop.f32.mrf.mxu2  ;;  %2168 = vmatmul.bf16.gmra.mxu3 %v5531_v28  ;;  %v5539_v20 = vor.u32 %v5759_v12, %v5536_v13 }
 0x132   : > { %v2075_v57 = vadd.f32 %v2074_v39, %v1906_v9  ;;  %v1907_v43 = vpop.f32.mrf.mxu1 }
 0x133   : > { %v1908_v61 = vadd.f32 %v1907_v43, %v7247_v59  ;;  %v5803_v59 = vld [vmem:[%s8747_s2 + $0x90] sm:$0xff] }
 0x134   : > { %v2217_v47 = vadd.f32 %v7076_v1, %v2075_v57  ;;  %v7313_v48 = vpop.f32.mrf.mxu3  ;;  %v5454_v43 = vld [vmem:[%s8746_s1 + $0x110] sm:$0xf] }
 0x136   : > { %v2473_v49 = vadd.f32 %v2472_v30, %v2217_v47  ;;  %v2546_v51 = vmul.f32 %v2217_v47, %v2217_v47  ;;  %v7315_v52 = vpop.f32.mrf.mxu0 }
 0x138   : > { %v2609_v19 = vadd.f32 %v2608_v38, %v2546_v51 }
 0x139   : > { %v2076_v62 = vpop.f32.mrf.mxu2 }
 0x13a   : > { %v2077_v10 = vadd.f32 %v2076_v62, %v1908_v61  ;;  %v1910_v14 = vpop.f32.mrf.mxu1  ;;  %v5761_v61 = vld [vmem:[%s8746_s1 + $0x1c4] sm:$0xf]  ;;  %v5544_v62 = vld [vmem:[%s8746_s1 + $0x1c8] sm:$0xf0] }
 0x13b   : > { %v1911_v7 = vadd.f32 %v1910_v14, %v7274_v50  ;;  %v5740_v50 = vld [vmem:[%s8746_s1 + $0x114] sm:$0xf0]  ;;  %v5547_v12 = vor.u32 %v5761_v61, %v5544_v62 }
 0x13c   : > { %v2218_v15 = vadd.f32 %v7076_v1, %v2077_v10  ;;  %v7337_v40 = vpop.f32.mrf.mxu3  ;;  %v5455_v58 = vor.u32 %v5740_v50, %v5454_v43  ;;  %v5464_v43 = vld [vmem:[%s8746_s1 + $0x128] sm:$0xf0] }
 0x13d   : > { %1949 = vmatmul.bf16.gmra.mxu1 %v5447_v24 }
 0x13e   : > { %v2474_v21 = vadd.f32 %v2473_v49, %v2218_v15  ;;  %v2547_v44 = vmul.f32 %v2218_v15, %v2218_v15  ;;  %v5863_v23 = vpack.c.bf16 %v2218_v15, %v2217_v47  ;;  %v7342_v25 = vpop.f32.mrf.mxu0  ;;  %2118 = vmatmul.bf16.gmra.mxu2 %v5451_v11  ;;  %v5739_v47 = vld [vmem:[%s8746_s1 + $0x114] sm:$0xf]  ;;  %v5456_v49 = vld [vmem:[%s8746_s1 + $0x118] sm:$0xf0] }
 0x140   : > { %v2610_v26 = vadd.f32 %v2609_v19, %v2547_v44  ;;  %6407 = vst [vmem:[#allocation5 + $0x48] sm:$0xff] %v5863_v23   ;;  %v5459_v19 = vor.u32 %v5739_v47, %v5456_v49 }
 0x141   : > { %5302 = vmatmul.msk.bf16.gmra.mxu0 %vm1175_vm3, %v5803_v59  ;;  %v2079_v28 = vpop.f32.mrf.mxu2  ;;  %2173 = vmatmul.bf16.gmra.mxu3 %v5539_v20 }
 0x142   : > { %v2080_v30 = vadd.f32 %v2079_v28, %v1911_v7  ;;  %v1912_v32 = vpop.f32.mrf.mxu1 }
 0x143   : > { %v1913_v54 = vadd.f32 %v1912_v32, %v7281_v0  ;;  %v5804_v0 = vld [vmem:[%s8747_s2 + $0x98] sm:$0xff] }
 0x144   : > { %v2219_v34 = vadd.f32 %v7076_v1, %v2080_v30  ;;  %v7347_v38 = vpop.f32.mrf.mxu3 }
 0x146   : > { %v2475_v9 = vadd.f32 %v2474_v21, %v2219_v34  ;;  %v2548_v39 = vmul.f32 %v2219_v34, %v2219_v34  ;;  %v7349_v57 = vpop.f32.mrf.mxu0 }
 0x148   : > { %v2611_v51 = vadd.f32 %v2610_v26, %v2548_v39  ;;  %v5741_v39 = vld [vmem:[%s8746_s1 + $0x124] sm:$0xf] }
 0x149   : > { %v2081_v8 = vpop.f32.mrf.mxu2 }
 0x14a   : > { %v2082_v55 = vadd.f32 %v2081_v8, %v1913_v54  ;;  %v1915_v10 = vpop.f32.mrf.mxu1  ;;  %v5467_v8 = vor.u32 %v5741_v39, %v5464_v43  ;;  %v5472_v39 = vld [vmem:[%s8746_s1 + $0x138] sm:$0xf0] }
 0x14b   : > { %v1916_v21 = vadd.f32 %v1915_v10, %v7308_v35  ;;  %v5742_v35 = vld [vmem:[%s8746_s1 + $0x124] sm:$0xf0] }
 0x14c   : > { %v2220_v24 = vadd.f32 %v7076_v1, %v2082_v55  ;;  %v7371_v11 = vpop.f32.mrf.mxu3  ;;  %v5763_v55 = vld [vmem:[%s8746_s1 + $0x1d4] sm:$0xf] }
 0x14d   : > { %1954 = vmatmul.bf16.gmra.mxu1 %v5455_v58  ;;  %v5552_v58 = vld [vmem:[%s8746_s1 + $0x1d8] sm:$0xf0] }
 0x14e   : > { %v2476_v13 = vadd.f32 %v2475_v9, %v2220_v24  ;;  %v2549_v14 = vmul.f32 %v2220_v24, %v2220_v24  ;;  %v5868_v15 = vpack.c.bf16 %v2220_v24, %v2219_v34  ;;  %v7376_v59 = vpop.f32.mrf.mxu0  ;;  %2123 = vmatmul.bf16.gmra.mxu2 %v5459_v19  ;;  %v5462_v9 = vld [vmem:[%s8746_s1 + $0x120] sm:$0xf]  ;;  %v5555_v10 = vor.u32 %v5763_v55, %v5552_v58  ;;  %v5560_v55 = vld [vmem:[%s8746_s1 + $0x1e8] sm:$0xf0] }
 0x14f   : > { %v5463_v54 = vor.u32 %v5742_v35, %v5462_v9  ;;  %v5470_v9 = vld [vmem:[%s8746_s1 + $0x130] sm:$0xf]  ;;  %v5743_v35 = vld [vmem:[%s8746_s1 + $0x134] sm:$0xf] }
 0x150   : > { %v2612_v20 = vadd.f32 %v2611_v51, %v2549_v14  ;;  %6408 = vst [vmem:[#allocation5 + $0x80] sm:$0xff] %v5868_v15  }
 0x151   : > { %5303 = vmatmul.msk.bf16.gmra.mxu0 %vm1175_vm3, %v5804_v0  ;;  %v2084_v44 = vpop.f32.mrf.mxu2  ;;  %2178 = vmatmul.bf16.gmra.mxu3 %v5547_v12 }
 0x152   : > { %v2085_v23 = vadd.f32 %v2084_v44, %v1916_v21  ;;  %v1917_v26 = vpop.f32.mrf.mxu1 }
 0x153   : > { %v1918_v47 = vadd.f32 %v1917_v26, %v7315_v52  ;;  %v5805_v52 = vld [vmem:[%s8747_s2 + $0xa0] sm:$0xff] }
 0x154   : > { %v2221_v7 = vadd.f32 %v7076_v1, %v2085_v23  ;;  %v7381_v28 = vpop.f32.mrf.mxu3 }
 0x156   : > { %v2477_v30 = vadd.f32 %v2476_v13, %v2221_v7  ;;  %v2550_v32 = vmul.f32 %v2221_v7, %v2221_v7  ;;  %v7383_v34 = vpop.f32.mrf.mxu0 }
 0x158   : > { %v2613_v50 = vadd.f32 %v2612_v20, %v2550_v32 }
 0x159   : > { %v2086_v49 = vpop.f32.mrf.mxu2 }
 0x15a   : > { %v2087_v51 = vadd.f32 %v2086_v49, %v1918_v47  ;;  %v1920_v19 = vpop.f32.mrf.mxu1 }
 0x15b   : > { %v1921_v15 = vadd.f32 %v1920_v19, %v7342_v25  ;;  %v5744_v25 = vld [vmem:[%s8746_s1 + $0x134] sm:$0xf0] }
 0x15c   : > { %v2222_v61 = vadd.f32 %v7076_v1, %v2087_v51  ;;  %v7405_v62 = vpop.f32.mrf.mxu3  ;;  %v5471_v51 = vor.u32 %v5744_v25, %v5470_v9 }
 0x15d   : > { %1959 = vmatmul.bf16.gmra.mxu1 %v5463_v54  ;;  %v5475_v54 = vor.u32 %v5743_v35, %v5472_v39  ;;  %v5478_v35 = vld [vmem:[%s8746_s1 + $0x140] sm:$0xf]  ;;  %v5745_v39 = vld [vmem:[%s8746_s1 + $0x144] sm:$0xf] }
 0x15e   : > { %v2478_v24 = vadd.f32 %v2477_v30, %v2222_v61  ;;  %v2551_v0 = vmul.f32 %v2222_v61, %v2222_v61  ;;  %v5873_v12 = vpack.c.bf16 %v2222_v61, %v2221_v7  ;;  %v7410_v13 = vpop.f32.mrf.mxu0  ;;  %2128 = vmatmul.bf16.gmra.mxu2 %v5467_v8  ;;  %v5765_v8 = vld [vmem:[%s8746_s1 + $0x1e4] sm:$0xf] }
 0x160   : > { %v2614_v14 = vadd.f32 %v2613_v50, %v2551_v0  ;;  %6409 = vst [vmem:[#allocation5 + $0x88] sm:$0xff] %v5873_v12  }
 0x161   : > { %5304 = vmatmul.msk.bf16.gmra.mxu0 %vm1175_vm3, %v5805_v52  ;;  %v2089_v20 = vpop.f32.mrf.mxu2  ;;  %2183 = vmatmul.bf16.gmra.mxu3 %v5555_v10  ;;  %v5563_v52 = vor.u32 %v5765_v8, %v5560_v55  ;;  %v5767_v55 = vld [vmem:[%s8746_s1 + $0x1f4] sm:$0xf] }
 0x162   : > { %v2090_v21 = vadd.f32 %v2089_v20, %v1921_v15  ;;  %v1922_v44 = vpop.f32.mrf.mxu1 }
 0x163   : > { %v1923_v50 = vadd.f32 %v1922_v44, %v7349_v57  ;;  %v5806_v57 = vld [vmem:[%s8747_s2 + $0xa8] sm:$0xff] }
 0x164   : > { %v2223_v23 = vadd.f32 %v7076_v1, %v2090_v21  ;;  %v7415_v26 = vpop.f32.mrf.mxu3 }
 0x166   : > { %v2479_v30 = vadd.f32 %v2478_v24, %v2223_v23  ;;  %v2552_v7 = vmul.f32 %v2223_v23, %v2223_v23  ;;  %v7417_v32 = vpop.f32.mrf.mxu0 }
 0x168   : > { %v2615_v43 = vadd.f32 %v2614_v14, %v2552_v7 }
 0x169   : > { %v2091_v47 = vpop.f32.mrf.mxu2 }
 0x16a   : > { %v2092_v49 = vadd.f32 %v2091_v47, %v1923_v50  ;;  %v1925_v58 = vpop.f32.mrf.mxu1 }
 0x16b   : > { %v1926_v15 = vadd.f32 %v1925_v58, %v7376_v59  ;;  %v5746_v59 = vld [vmem:[%s8746_s1 + $0x144] sm:$0xf0]  ;;  %v5568_v58 = vld [vmem:[%s8746_s1 + $0x1f8] sm:$0xf0] }
 0x16c   : > { %v2224_v19 = vadd.f32 %v7076_v1, %v2092_v49  ;;  %v7439_v61 = vpop.f32.mrf.mxu3 }
 0x16d   : > { %1964 = vmatmul.bf16.gmra.mxu1 %v5471_v51 }
 0x16e   : > { %v2480_v10 = vadd.f32 %v2479_v30, %v2224_v19  ;;  %v2553_v24 = vmul.f32 %v2224_v19, %v2224_v19  ;;  %v5878_v0 = vpack.c.bf16 %v2224_v19, %v2223_v23  ;;  %v7444_v12 = vpop.f32.mrf.mxu0  ;;  %2133 = vmatmul.bf16.gmra.mxu2 %v5475_v54  ;;  %v5479_v54 = vor.u32 %v5746_v59, %v5478_v35 }
 0x170   : > { %v2616_v14 = vadd.f32 %v2615_v43, %v2553_v24  ;;  %6410 = vst [vmem:[#allocation5 + $0xe8] sm:$0xff] %v5878_v0   ;;  %v5480_v43 = vld [vmem:[%s8746_s1 + $0x148] sm:$0xf0] }
 0x171   : > { %5305 = vmatmul.msk.bf16.gmra.mxu0 %vm1175_vm3, %v5806_v57  ;;  %v2094_v20 = vpop.f32.mrf.mxu2  ;;  %2188 = vmatmul.bf16.gmra.mxu3 %v5563_v52  ;;  %v5483_v8 = vor.u32 %v5745_v39, %v5480_v43 }
 0x172   : > { %v2095_v21 = vadd.f32 %v2094_v20, %v1926_v15  ;;  %v1927_v44 = vpop.f32.mrf.mxu1 }
 0x173   : > { %v1928_v47 = vadd.f32 %v1927_v44, %v7383_v34  ;;  %v5807_v34 = vld [vmem:[%s8747_s2 + $0xb0] sm:$0xff] }
 0x174   : > { %v2225_v7 = vadd.f32 %v7076_v1, %v2095_v21  ;;  %v7449_v9 = vpop.f32.mrf.mxu3 }
 0x176   : > { %v2481_v30 = vadd.f32 %v2480_v10, %v2225_v7  ;;  %v2554_v23 = vmul.f32 %v2225_v7, %v2225_v7  ;;  %v7451_v25 = vpop.f32.mrf.mxu0  ;;  %v5571_v10 = vor.u32 %v5767_v55, %v5568_v58 }
 0x178   : > { %v2617_v50 = vadd.f32 %v2616_v14, %v2554_v23 }
 0x179   : > { %v2096_v49 = vpop.f32.mrf.mxu2 }
 0x17a   : > { %v2097_v51 = vadd.f32 %v2096_v49, %v1928_v47  ;;  %v1930_v19 = vpop.f32.mrf.mxu1  ;;  %v5747_v47 = vld [vmem:[%s8746_s1 + $0x154] sm:$0xf]  ;;  %v5488_v49 = vld [vmem:[%s8746_s1 + $0x158] sm:$0xf0] }
 0x17b   : > { %v1931_v21 = vadd.f32 %v1930_v19, %v7410_v13  ;;  %v5748_v13 = vld [vmem:[%s8746_s1 + $0x154] sm:$0xf0]  ;;  %v5491_v19 = vor.u32 %v5747_v47, %v5488_v49  ;;  %v5496_v47 = vld [vmem:[%s8746_s1 + $0x168] sm:$0xf0] }
 0x17c   : > { %v2226_v57 = vadd.f32 %v7076_v1, %v2097_v51  ;;  %v7473_v52 = vpop.f32.mrf.mxu3 }
 0x17d   : > { %1969 = vmatmul.bf16.gmra.mxu1 %v5479_v54 }
 0x17e   : > { %v2482_v24 = vadd.f32 %v2481_v30, %v2226_v57  ;;  %v2555_v0 = vmul.f32 %v2226_v57, %v2226_v57  ;;  %v5883_v14 = vpack.c.bf16 %v2226_v57, %v2225_v7  ;;  %v7478_v15 = vpop.f32.mrf.mxu0  ;;  %2138 = vmatmul.bf16.gmra.mxu2 %v5483_v8 }
 0x180   : > { %v2618_v20 = vadd.f32 %v2617_v50, %v2555_v0  ;;  %6411 = vst [vmem:[#allocation5 + $0xb8] sm:$0xff] %v5883_v14   ;;  %v5486_v50 = vld [vmem:[%s8746_s1 + $0x150] sm:$0xf] }
 0x181   : > { %5306 = vmatmul.msk.bf16.gmra.mxu0 %vm1175_vm3, %v5807_v34  ;;  %v2099_v44 = vpop.f32.mrf.mxu2  ;;  %2193 = vmatmul.bf16.gmra.mxu3 %v5571_v10  ;;  %v5487_v58 = vor.u32 %v5748_v13, %v5486_v50  ;;  %v5749_v13 = vld [vmem:[%s8746_s1 + $0x164] sm:$0xf] }
 0x182   : > { %v2100_v23 = vadd.f32 %v2099_v44, %v1931_v21  ;;  %v1932_v35 = vpop.f32.mrf.mxu1 }
 0x183   : > { %v1933_v54 = vadd.f32 %v1932_v35, %v7417_v32 }
 0x184   : > { %v2227_v59 = vadd.f32 %v7076_v1, %v2100_v23  ;;  %v7483_v39 = vpop.f32.mrf.mxu3 }
 0x186   : > { %v2483_v30 = vadd.f32 %v2482_v24, %v2227_v59  ;;  %v2556_v7 = vmul.f32 %v2227_v59, %v2227_v59  ;;  %v1357_v43 = vpop.f32.mrf.mxu0  ;;  %v5808_v24 = vld [vmem:[%s8747_s2 + $0xb8] sm:$0xff] }
 0x188   : > { %v2619_v51 = vadd.f32 %v2618_v20, %v2556_v7 }
 0x189   : > { %v2101_v8 = vpop.f32.mrf.mxu2 }
 0x18a   : > { %v2102_v55 = vadd.f32 %v2101_v8, %v1933_v54  ;;  %v1935_v57 = vpop.f32.mrf.mxu1 }
 0x18b   : > { %v1936_v7 = vadd.f32 %v1935_v57, %v7444_v12 }
 0x18c   : > { %v2228_v34 = vadd.f32 %v7076_v1, %v2102_v55  ;;  %v7499_v10 = vpop.f32.mrf.mxu3  ;;  %v5499_v55 = vor.u32 %v5749_v13, %v5496_v47  ;;  %v5752_v13 = vld [vmem:[%s8746_s1 + $0x174] sm:$0xf0]  ;;  %v5751_v47 = vld [vmem:[%s8746_s1 + $0x174] sm:$0xf] }
 0x18d   : > { %1974 = vmatmul.bf16.gmra.mxu1 %v5487_v58 }
 0x18e   : > { %v7504_v0 = vadd.f32 %v2483_v30, %v2228_v34  ;;  %v2557_v14 = vmul.f32 %v2228_v34, %v2228_v34  ;;  %v5888_v21 = vpack.c.bf16 %v2228_v34, %v2227_v59  ;;  %v7506_v20 = vpop.f32.mrf.mxu0  ;;  %2143 = vmatmul.bf16.gmra.mxu2 %v5491_v19  ;;  %v5494_v59 = vld [vmem:[%s8746_s1 + $0x160] sm:$0xf]  ;;  %v5750_v30 = vld [vmem:[%s8746_s1 + $0x164] sm:$0xf0] }
 0x18f   : > { %v5495_v8 = vor.u32 %v5750_v30, %v5494_v59  ;;  %v5502_v30 = vld [vmem:[%s8746_s1 + $0x170] sm:$0xf] }
 0x190   : > { %v7508_v32 = vadd.f32 %v2619_v51, %v2557_v14  ;;  %6412 = vst [vmem:[#allocation5 + $0x60] sm:$0xff] %v5888_v21  }
 0x191   : > { %5307 = vmatmul.msk.bf16.gmra.mxu0 %vm1175_vm3, %v5808_v24  ;;  %v2104_v44 = vpop.f32.mrf.mxu2  ;;  %v5809_v24 = vld [vmem:[%s8747_s2 + $0xc0] sm:$0xff] }
 0x192   : > { %v1937_v23 = vpop.f32.mrf.mxu1  ;;  %v2105_v49 = vadd.f32 %v2104_v44, %v1936_v7 }
 0x193   : > { %v1938_v12 = vadd.f32 %v1937_v23, %v7451_v25 }
 0x194   : > { %v7511_v35 = vpop.f32.mrf.mxu3  ;;  %v7528_v19 = vadd.f32 %v7076_v1, %v2105_v49  ;;  %v5504_v49 = vld [vmem:[%s8746_s1 + $0x178] sm:$0xf0] }
 0x196   : > { %v1362_v50 = vpop.f32.mrf.mxu0 }
 0x199   : > { %v2106_v51 = vpop.f32.mrf.mxu2 }
 0x19a   : > { %v2107_v54 = vadd.f32 %v2106_v51, %v1938_v12  ;;  %v1940_v58 = vpop.f32.mrf.mxu1 }
 0x19b   : > { %v1941_v7 = vadd.f32 %v1940_v58, %v7478_v15  ;;  %v1996_v15 = vadd.f32 %v7279_v46, %v7015_v31  ;;  %v5507_v58 = vor.u32 %v5751_v47, %v5504_v49 }
 0x19c   : > { %v7531_v57 = vadd.f32 %v7076_v1, %v2107_v54  ;;  %v7533_v34 = vpop.f32.mrf.mxu3 }
 0x19d   : > { %1979 = vmatmul.bf16.gmra.mxu1 %v5495_v8 }
 0x19e   : > { %v5893_v25 = vpack.c.bf16 %v7531_v57, %v7528_v19  ;;  %v7540_v14 = vpop.f32.mrf.mxu0  ;;  %2148 = vmatmul.bf16.gmra.mxu2 %v5499_v55  ;;  %v5503_v55 = vor.u32 %v5752_v13, %v5502_v30 }
 0x1a0   : > { %6413 = vst [vmem:[#allocation5 + $0xf0] sm:$0xff] %v5893_v25  }
 0x1a1   : > { %5308 = vmatmul.msk.bf16.gmra.mxu0 %vm1175_vm3, %v5809_v24  ;;  %v2109_v21 = vpop.f32.mrf.mxu2  ;;  %v1998_v24 = vadd.f32 %v7303_v27, %v7035_v41  ;;  %v7572_v41 = vld [vmem:[%s8753_s8] ss:$0 sm:$0xff] }
 0x1a2   : > { %v1942_v44 = vpop.f32.mrf.mxu1  ;;  %v2110_v12 = vadd.f32 %v2109_v21, %v1941_v7 }
 0x1a3   : > { %v1943_v51 = vadd.f32 %v1942_v44, %v1357_v43 }
 0x1a4   : > { %v2164_v23 = vpop.f32.mrf.mxu3  ;;  %v7561_v4 = vadd.f32 %v7076_v1, %v2110_v12 }
 0x1a5   : > { %v2165_v25 = vadd.f32 %v2164_v23, %v1996_v15 }
 0x1a6   : > { %v1367_v59 = vpop.f32.mrf.mxu0 }
 0x1a7   : > { %v2253_v44 = vadd.f32 %v7076_v1, %v2165_v25 }
 0x1a9   : > { %v2111_v54 = vpop.f32.mrf.mxu2 }
 0x1aa   : > { %v2112_v8 = vadd.f32 %v2111_v54, %v1943_v51  ;;  %v1945_v5 = vpop.f32.mrf.mxu1 }
 0x1ab   : > { %v1946_v47 = vadd.f32 %v1945_v5, %v7506_v20 }
 0x1ac   : > { %v7564_v3 = vadd.f32 %v7076_v1, %v2112_v8  ;;  %v2166_v21 = vpop.f32.mrf.mxu3  ;;  %v2001_v1 = vadd.f32 %v7313_v48, %v7041_v45  ;;  %v2003_v8 = vadd.f32 %v7337_v40, %v7063_v56 }
 0x1ad   : > { %v2167_v43 = vadd.f32 %v2166_v21, %v1998_v24  ;;  %1984 = vmatmul.bf16.gmra.mxu1 %v5503_v55 }
 0x1ae   : > { %v5898_v31 = vpack.c.bf16 %v7564_v3, %v7561_v4  ;;  %v1370_v46 = vpop.f32.mrf.mxu0  ;;  %2153 = vmatmul.bf16.gmra.mxu2 %v5507_v58 }
 0x1af   : > { %v2254_v27 = vadd.f32 %v7572_v41, %v2167_v43 }
 0x1b0   : > { %6414 = vst [vmem:[#allocation5 + $0x8] sm:$0xff] %v5898_v31  }
 0x1b1   : > { %v5953_v23 = vpack.c.bf16 %v2254_v27, %v2253_v44  ;;  %v2114_v7 = vpop.f32.mrf.mxu2 }
 0x1b2   : > { %v1947_v30 = vpop.f32.mrf.mxu1  ;;  %v2115_v12 = vadd.f32 %v2114_v7, %v1946_v47 }
 0x1b3   : > { %6425 = vst [vmem:[#allocation5 + $0xd0] sm:$0xff] %v5953_v23   ;;  %v1948_v51 = vadd.f32 %v1947_v30, %v1362_v50  ;;  %v2006_v30 = vadd.f32 %v7347_v38, %v7071_v63 }
 0x1b4   : > { %v2169_v13 = vpop.f32.mrf.mxu3  ;;  %v7581_v24 = vadd.f32 %v7572_v41, %v2115_v12  ;;  %v2008_v12 = vadd.f32 %v7371_v11, %v7100_v22 }
 0x1b5   : > { %v2170_v55 = vadd.f32 %v2169_v13, %v2001_v1 }
 0x1b6   : > { %v1372_v49 = vpop.f32.mrf.mxu0 }
 0x1b7   : > { %v2255_v45 = vadd.f32 %v7572_v41, %v2170_v55 }
 0x1b9   : > { %v2116_v15 = vpop.f32.mrf.mxu2 }
 0x1ba   : > { %v2117_v54 = vadd.f32 %v2116_v15, %v1948_v51  ;;  %v1950_v58 = vpop.f32.mrf.mxu1 }
 0x1bb   : > { %v1951_v44 = vadd.f32 %v1950_v58, %v7540_v14 }
 0x1bc   : > { %v7584_v25 = vadd.f32 %v7572_v41, %v2117_v54  ;;  %v2171_v5 = vpop.f32.mrf.mxu3 }
 0x1bd   : > { %v2172_v20 = vadd.f32 %v2171_v5, %v2003_v8 }
 0x1be   : > { %v5903_v50 = vpack.c.bf16 %v7584_v25, %v7581_v24  ;;  %v7588_v21 = vpop.f32.mrf.mxu0 }
 0x1bf   : > { %v2256_v48 = vadd.f32 %v7572_v41, %v2172_v20  ;;  %v2558_v20 = vmul.f32 %v7528_v19, %v7528_v19 }
 0x1c0   : > { %6415 = vst [vmem:[#allocation5 + $0x78] sm:$0xff] %v5903_v50  }
 0x1c1   : > { %v5958_v56 = vpack.c.bf16 %v2256_v48, %v2255_v45  ;;  %v2119_v40 = vpop.f32.mrf.mxu2  ;;  %v2559_v48 = vmul.f32 %v7531_v57, %v7531_v57 }
 0x1c2   : > { %v1952_v43 = vpop.f32.mrf.mxu1  ;;  %v2120_v23 = vadd.f32 %v2119_v40, %v1951_v44 }
 0x1c3   : > { %6426 = vst [vmem:[#allocation5 + $0x10] sm:$0xff] %v5958_v56   ;;  %v1953_v7 = vadd.f32 %v1952_v43, %v1367_v59  ;;  %v2011_v43 = vadd.f32 %v7381_v28, %v7109_v37  ;;  %v2561_v37 = vmul.f32 %v7564_v3, %v7564_v3 }
 0x1c4   : > { %v2174_v31 = vpop.f32.mrf.mxu3  ;;  %v2235_v15 = vadd.f32 %v7572_v41, %v2120_v23  ;;  %v2621_v23 = vadd.f32 %v7508_v32, %v2558_v20 }
 0x1c5   : > { %v2175_v51 = vadd.f32 %v2174_v31, %v2006_v30  ;;  %v2485_v31 = vadd.f32 %v7504_v0, %v7528_v19  ;;  %v2013_v30 = vadd.f32 %v7405_v62, %v7133_v60  ;;  %v2562_v62 = vmul.f32 %v7581_v24, %v7581_v24 }
 0x1c6   : > { %v7593_v27 = vpop.f32.mrf.mxu0  ;;  %v2564_v20 = vmul.f32 %v2235_v15, %v2235_v15 }
 0x1c7   : > { %v2257_v59 = vadd.f32 %v7572_v41, %v2175_v51 }
 0x1c9   : > { %v2121_v13 = vpop.f32.mrf.mxu2 }
 0x1ca   : > { %v2122_v47 = vadd.f32 %v2121_v13, %v1953_v7  ;;  %v1955_v1 = vpop.f32.mrf.mxu1  ;;  %v2560_v7 = vmul.f32 %v7561_v4, %v7561_v4  ;;  %v2486_v13 = vadd.f32 %v2485_v31, %v7531_v57 }
 0x1cb   : > { %v1956_v50 = vadd.f32 %v1955_v1, %v1370_v46 }
 0x1cc   : > { %v2236_v54 = vadd.f32 %v7572_v41, %v2122_v47  ;;  %v2176_v8 = vpop.f32.mrf.mxu3  ;;  %v2487_v19 = vadd.f32 %v2486_v13, %v7561_v4  ;;  %v2563_v4 = vmul.f32 %v7584_v25, %v7584_v25 }
 0x1cd   : > { %v2177_v14 = vadd.f32 %v2176_v8, %v2008_v12  ;;  %v2622_v12 = vadd.f32 %v2621_v23, %v2559_v48 }
 0x1ce   : > { %v5908_v55 = vpack.c.bf16 %v2236_v54, %v2235_v15  ;;  %v7601_v58 = vpop.f32.mrf.mxu0  ;;  %v2488_v60 = vadd.f32 %v2487_v19, %v7564_v3  ;;  %v2565_v31 = vmul.f32 %v2236_v54, %v2236_v54 }
 0x1cf   : > { %v2258_v63 = vadd.f32 %v7572_v41, %v2177_v14  ;;  %v2623_v1 = vadd.f32 %v2622_v12, %v2560_v7 }
 0x1d0   : > { %6416 = vst [vmem:[#allocation5 + $0x38] sm:$0xff] %v5908_v55  }
 0x1d1   : > { %v5963_v38 = vpack.c.bf16 %v2258_v63, %v2257_v59  ;;  %v2124_v5 = vpop.f32.mrf.mxu2  ;;  %v2624_v59 = vadd.f32 %v2623_v1, %v2561_v37  ;;  %v2489_v63 = vadd.f32 %v2488_v60, %v7581_v24 }
 0x1d2   : > { %v1957_v22 = vpop.f32.mrf.mxu1  ;;  %v2125_v56 = vadd.f32 %v2124_v5, %v1956_v50 }
 0x1d3   : > { %6427 = vst [vmem:[#allocation5 + $0x28] sm:$0xff] %v5963_v38   ;;  %v1958_v40 = vadd.f32 %v1957_v22, %v1372_v49  ;;  %v2490_v3 = vadd.f32 %v2489_v63, %v7584_v25 }
 0x1d4   : > { %v2179_v11 = vpop.f32.mrf.mxu3  ;;  %v2237_v28 = vadd.f32 %v7572_v41, %v2125_v56 }
 0x1d5   : > { %v2180_v47 = vadd.f32 %v2179_v11, %v2011_v43  ;;  %v2625_v11 = vadd.f32 %v2624_v59, %v2562_v62  ;;  %v2491_v43 = vadd.f32 %v2490_v3, %v2235_v15  ;;  %v2018_v15 = vadd.f32 %v7439_v61, %v7167_v36 }
 0x1d6   : > { %v7607_v45 = vpop.f32.mrf.mxu0  ;;  %v2566_v7 = vmul.f32 %v2237_v28, %v2237_v28 }
 0x1d7   : > { %v2259_v57 = vadd.f32 %v7572_v41, %v2180_v47  ;;  %v2492_v23 = vadd.f32 %v2491_v43, %v2236_v54 }
 0x1d9   : > { %v2126_v44 = vpop.f32.mrf.mxu2  ;;  %v2493_v13 = vadd.f32 %v2492_v23, %v2237_v28  ;;  %v2021_v23 = vadd.f32 %v7449_v9, %v7177_v53 }
 0x1da   : > { %v2127_v46 = vadd.f32 %v2126_v44, %v1958_v40  ;;  %v1960_v49 = vpop.f32.mrf.mxu1  ;;  %v2626_v40 = vadd.f32 %v2625_v11, %v2563_v4 }
 0x1db   : > { %v1961_v38 = vadd.f32 %v1960_v49, %v7588_v21 }
 0x1dc   : > { %v2238_v0 = vadd.f32 %v7572_v41, %v2127_v46  ;;  %v2181_v32 = vpop.f32.mrf.mxu3  ;;  %v2627_v24 = vadd.f32 %v2626_v40, %v2564_v20  ;;  %v2016_v46 = vadd.f32 %v7415_v26, %v7143_v16 }
 0x1dd   : > { %v2182_v51 = vadd.f32 %v2181_v32, %v2013_v30 }
 0x1de   : > { %v5913_v8 = vpack.c.bf16 %v2238_v0, %v2237_v28  ;;  %v7626_v14 = vpop.f32.mrf.mxu0  ;;  %v2628_v30 = vadd.f32 %v2627_v24, %v2565_v31  ;;  %v2567_v47 = vmul.f32 %v2238_v0, %v2238_v0  ;;  %v2494_v19 = vadd.f32 %v2493_v13, %v2238_v0 }
 0x1df   : > { %v2260_v55 = vadd.f32 %v7572_v41, %v2182_v51  ;;  %v2023_v13 = vadd.f32 %v7473_v52, %v7201_v18 }
 0x1e0   : > { %6417 = vst [vmem:[#allocation5 + $0x58] sm:$0xff] %v5913_v8   ;;  %v2629_v32 = vadd.f32 %v2628_v30, %v2566_v7 }
 0x1e1   : > { %v5968_v5 = vpack.c.bf16 %v2260_v55, %v2259_v57  ;;  %v2129_v22 = vpop.f32.mrf.mxu2 }
 0x1e2   : > { %v2130_v50 = vadd.f32 %v2129_v22, %v1961_v38  ;;  %v1962_v48 = vpop.f32.mrf.mxu1  ;;  %v2630_v60 = vadd.f32 %v2629_v32, %v2567_v47 }
 0x1e3   : > { %6428 = vst [vmem:[#allocation5 + $0xa0] sm:$0xff] %v5968_v5   ;;  %v1963_v25 = vadd.f32 %v1962_v48, %v7593_v27 }
 0x1e4   : > { %v2184_v56 = vpop.f32.mrf.mxu3  ;;  %v2239_v21 = vadd.f32 %v7572_v41, %v2130_v50 }
 0x1e5   : > { %v2185_v12 = vadd.f32 %v2184_v56, %v2016_v46 }
 0x1e6   : > { %v7638_v44 = vpop.f32.mrf.mxu0  ;;  %v2568_v54 = vmul.f32 %v2239_v21, %v2239_v21  ;;  %v2495_v16 = vadd.f32 %v2494_v19, %v2239_v21 }
 0x1e7   : > { %v2261_v27 = vadd.f32 %v7572_v41, %v2185_v12 }
 0x1e8   : > { %v2631_v55 = vadd.f32 %v2630_v60, %v2568_v54 }
 0x1e9   : > { %v2131_v49 = vpop.f32.mrf.mxu2 }
 0x1ea   : > { %v2132_v37 = vadd.f32 %v2131_v49, %v1963_v25  ;;  %v1965_v51 = vpop.f32.mrf.mxu1  ;;  %v2459_v25 = vld [vmem:[#allocation2] sm:$0x1] }
 0x1eb   : > { %v1966_v48 = vadd.f32 %v1965_v51, %v7601_v58 }
 0x1ec   : > { %v2240_v1 = vadd.f32 %v7572_v41, %v2132_v37  ;;  %v2186_v8 = vpop.f32.mrf.mxu3  ;;  %v2531_v37 = vld [vmem:[#allocation2 + $0x1] sm:$0x1] }
 0x1ed   : > { %v2187_v26 = vadd.f32 %v2186_v8, %v2018_v15 }
 0x1ee   : > { %v2432_v28 = vsel %vm824_vm1, %v2240_v1, 0.0  ;;  %v5918_v62 = vpack.c.bf16 %v2240_v1, %v2239_v21  ;;  %v7650_v57 = vpop.f32.mrf.mxu0 }
 0x1ef   : > { %v2496_v36 = vadd.f32 %v2495_v16, %v2432_v28  ;;  %v2569_v61 = vmul.f32 %v2432_v28, %v2432_v28  ;;  %v2262_v0 = vadd.f32 %v7572_v41, %v2187_v26 }
 0x1f0   : > { %6418 = vst [vmem:[#allocation5 + $0x40] sm:$0xff] %v5918_v62  }
 0x1f1   : > { %v2523_v59 = vrot.slane %v2496_v36, 4  ;;  %v2632_v63 = vadd.f32 %v2631_v55, %v2569_v61  ;;  %v5973_v4 = vpack.c.bf16 %v2262_v0, %v2261_v27  ;;  %v2134_v38 = vpop.f32.mrf.mxu2 }
 0x1f2   : > { %v1967_v11 = vpop.f32.mrf.mxu1  ;;  %v2135_v31 = vadd.f32 %v2134_v38, %v1966_v48 }
 0x1f3   : > { %v2524_v5 = vadd.f32 %v2523_v59, %v2496_v36  ;;  %v2659_v22 = vrot.slane %v2632_v63, 4  ;;  %6429 = vst [vmem:[#allocation5 + $0xf8] sm:$0xff] %v5973_v4   ;;  %v1968_v24 = vadd.f32 %v1967_v11, %v7607_v45  ;;  %v2026_v59 = vadd.f32 %v7483_v39, %v7211_v33 }
 0x1f4   : > { %v2189_v3 = vpop.f32.mrf.mxu3  ;;  %v2241_v15 = vadd.f32 %v7572_v41, %v2135_v31 }
 0x1f5   : > { %v2525_v20 = vrot.slane %v2524_v5, 2  ;;  %v2660_v50 = vadd.f32 %v2659_v22, %v2632_v63  ;;  %v2190_v49 = vadd.f32 %v2189_v3, %v2021_v23  ;;  %v2028_v22 = vadd.f32 %v7499_v10, %v7235_v29 }
 0x1f6   : > { %v7654_v56 = vpop.f32.mrf.mxu0 }
 0x1f7   : > { %v2526_v40 = vadd.f32 %v2525_v20, %v2524_v5  ;;  %v2661_v43 = vrot.slane %v2660_v50, 2  ;;  %v2263_v18 = vadd.f32 %v7572_v41, %v2190_v49 }
 0x1f9   : > { %v2527_v7 = vrot.slane %v2526_v40, 1  ;;  %v2662_v21 = vadd.f32 %v2661_v43, %v2660_v50  ;;  %v2136_v46 = vpop.f32.mrf.mxu2 }
 0x1fa   : > { %v2137_v30 = vadd.f32 %v2136_v46, %v1968_v24  ;;  %v1970_v12 = vpop.f32.mrf.mxu1 }
 0x1fb   : > { %v2528_v47 = vadd.f32 %v2527_v7, %v2526_v40  ;;  %v2663_v58 = vrot.slane %v2662_v21, 1  ;;  %v1971_v28 = vadd.f32 %v1970_v12, %v7626_v14 }
 0x1fc   : > { %v2242_v45 = vadd.f32 %v7572_v41, %v2137_v30  ;;  %v2191_v32 = vpop.f32.mrf.mxu3 }
 0x1fd   : > { %v2529_v19 = vadd.f32 %v2528_v47, %v2459_v25  ;;  %v2664_v53 = vadd.f32 %v2663_v58, %v2662_v21  ;;  %v2192_v9 = vadd.f32 %v2191_v32, %v2023_v13 }
 0x1fe   : > { %v5923_v54 = vpack.c.bf16 %v2242_v45, %v2241_v15  ;;  %v7663_v51 = vpop.f32.mrf.mxu0 }
 0x1ff   : > { %2530 = vst [vmem:[#allocation2] sm:$0x1] %v2529_v19  ;;  %v2665_v1 = vadd.f32 %v2664_v53, %v2531_v37  ;;  %v2264_v52 = vadd.f32 %v7572_v41, %v2192_v9 }
 0x200   : > { %6419 = vst [vmem:[#allocation5 + $0xc8] sm:$0xff] %v5923_v54  }
 0x201   : > { %2666 = vst [vmem:[#allocation2 + $0x1] sm:$0x1] %v2665_v1  ;;  %v5978_v8 = vpack.c.bf16 %v2264_v52, %v2263_v18  ;;  %v2139_v60 = vpop.f32.mrf.mxu2 }
 0x202   : > { %v1972_v16 = vpop.f32.mrf.mxu1  ;;  %v2140_v61 = vadd.f32 %v2139_v60, %v1971_v28 }
 0x203   : > { %6430 = vst [vmem:[#allocation5 + $0x20] sm:$0xff] %v5978_v8   ;;  %v1973_v0 = vadd.f32 %v1972_v16, %v7638_v44  ;;  %v2802_v8 = vld [vmem:[%s8755_s10] sm:$0x1] }
 0x204   : > { %v2194_v26 = vpop.f32.mrf.mxu3  ;;  %v2243_v20 = vadd.f32 %v7572_v41, %v2140_v61 }
 0x205   : > { %v2195_v3 = vadd.f32 %v2194_v26, %v2026_v59 }
 0x206   : > { %v2803_v27 = vld [vmem:[#allocation2] sm:$0x1]  ;;  %v7668_v62 = vpop.f32.mrf.mxu0 }
 0x207   : > { %v2804_v55 = vmul.f32 0.0033333334, %v2803_v27  ;;  %v2265_v39 = vadd.f32 %v7572_v41, %v2195_v3 }
 0x208   : > { %v2805_v36 = vld [vmem:[#allocation2 + $0x1] sm:$0x1] }
 0x209   : > { %v2806_v63 = vmul.f32 0.0033333334, %v2805_v36  ;;  %v2807_v4 = vmul.f32 %v2804_v55, %v2804_v55  ;;  %v2141_v38 = vpop.f32.mrf.mxu2 }
 0x20a   : > { %v2142_v5 = vadd.f32 %v2141_v38, %v1973_v0  ;;  %v1975_v14 = vpop.f32.mrf.mxu1 }
 0x20b   : > { %v2808_v11 = vsub.f32 %v2806_v63, %v2807_v4  ;;  %v1976_v7 = vadd.f32 %v1975_v14, %v7650_v57  ;;  %v2801_v57 = vld [vmem:[%s8754_s9] sm:$0x1] }
 0x20c   : > { %v2244_v50 = vadd.f32 %v7572_v41, %v2142_v5  ;;  %v2196_v48 = vpop.f32.mrf.mxu3 }
 0x20d   : > { %v2809_v40 = vmax.f32 %v2808_v11, 0.0  ;;  %v2197_v44 = vadd.f32 %v2196_v48, %v2028_v22 }
 0x20e   : > { %v5928_v43 = vpack.c.bf16 %v2244_v50, %v2243_v20  ;;  %v1400_v31 = vpop.f32.mrf.mxu0 }
 0x20f   : > { %v2810_v33 = vadd.f32 1e-05, %v2809_v40  ;;  %v2266_v24 = vadd.f32 %v7572_v41, %v2197_v44 }
 0x210   : > { %6420 = vst [vmem:[#allocation5 + $0xe0] sm:$0xff] %v5928_v43  }
 0x211   : > { %6642 = vrsqrt.f32 %v2810_v33  ;;  %v5983_v29 = vpack.c.bf16 %v2266_v24, %v2265_v39  ;;  %v2144_v10 = vpop.f32.mrf.mxu2  ;;  %vm2817_vm5 = vweird.f32 %v2810_v33 }
 0x212   : > { %v1977_v23 = vpop.f32.mrf.mxu1  ;;  %v2145_v30 = vadd.f32 %v2144_v10, %v1976_v7 }
 0x213   : > { %6431 = vst [vmem:[#allocation5 + $0x98] sm:$0xff] %v5983_v29   ;;  %v1978_v13 = vadd.f32 %v1977_v23, %v7654_v56 }
 0x214   : > { %v2245_v15 = vadd.f32 %v7572_v41, %v2145_v30 }
 0x216   : > { %v1402_v21 = vpop.f32.mrf.mxu0 }
 0x217   : > { %v6643_v46 = vpop.eup %6642 }
 0x218   : > { %v2812_v25 = vmul.f32 %v6643_v46, %v2810_v33  ;;  %vm2818_vm4 = vweird.f32 %v6643_v46 }
 0x219   : > { %v2146_v47 = vpop.f32.mrf.mxu2  ;;  %vm2819_vm6 = vmor %vm2817_vm5, %vm2818_vm4 }
 0x21a   : > { %v2813_v58 = vmul.f32 %v6643_v46, %v2812_v25  ;;  %v2147_v49 = vadd.f32 %v2146_v47, %v1978_v13  ;;  %v1980_v12 = vpop.f32.mrf.mxu1 }
 0x21b   : > { %v1981_v16 = vadd.f32 %v1980_v12, %v7663_v51 }
 0x21c   : > { %v2814_v37 = vmul.f32 0.5, %v2813_v58  ;;  %v2246_v45 = vadd.f32 %v7572_v41, %v2147_v49 }
 0x21e   : > { %v2815_v32 = vsub.f32 1.5, %v2814_v37  ;;  %v5933_v19 = vpack.c.bf16 %v2246_v45, %v2245_v15  ;;  %v1405_v53 = vpop.f32.mrf.mxu0 }
 0x21f   : > { %v1991_v18 = vadd.f32 %v7245_v17, %v1405_v53 }
 0x220   : > { %v2816_v9 = vmul.f32 %v6643_v46, %v2815_v32  ;;  %6421 = vst [vmem:[#allocation5 + $0x90] sm:$0xff] %v5933_v19  }
 0x221   : > { %v2149_v56 = vpop.f32.mrf.mxu2  ;;  %v2160_v28 = vadd.f32 %v7511_v35, %v1991_v18 }
 0x222   : > { %v2820_v54 = vsel %vm2819_vm6, %v6643_v46, %v2816_v9  ;;  %v1982_v52 = vpop.f32.mrf.mxu1  ;;  %v2150_v61 = vadd.f32 %v2149_v56, %v1981_v16 }
 0x223   : > { %v2821_v1 = vmul.f32 %v2820_v54, %v2801_v57  ;;  %v1983_v0 = vadd.f32 %v1982_v52, %v7668_v62  ;;  %v2251_v4 = vadd.f32 %v7572_v41, %v2160_v28 }
 0x224   : > { %v2247_v51 = vadd.f32 %v7572_v41, %v2150_v61 }
 0x225   : > { %2822 = vst [vmem:[#allocation3] sm:$0x1] %v2821_v1  ;;  %v2823_v60 = vmul.f32 %v2821_v1, %v2804_v55 }
 0x226   : > { %v1407_v26 = vpop.f32.mrf.mxu0 }
 0x227   : > { %v2824_v27 = vsub.f32 %v2802_v8, %v2823_v60  ;;  %v1993_v36 = vadd.f32 %v7269_v42, %v1407_v26 }
 0x229   : > { %2825 = vst [vmem:[#allocation3 + $0x1] sm:$0x1] %v2824_v27  ;;  %v2162_v17 = vadd.f32 %v7533_v34, %v1993_v36  ;;  %v2151_v59 = vpop.f32.mrf.mxu2 }
 0x22a   : > { %v2152_v63 = vadd.f32 %v2151_v59, %v1983_v0  ;;  %v1985_v38 = vpop.f32.mrf.mxu1 }
 0x22b   : > { %v2252_v55 = vadd.f32 %v7572_v41, %v2162_v17  ;;  %v1986_v11 = vadd.f32 %v1985_v38, %v1400_v31 }
 0x22c   : > { %v2248_v5 = vadd.f32 %v7572_v41, %v2152_v63 }
 0x22d   : > { %v5948_v35 = vpack.c.bf16 %v2252_v55, %v2251_v4 }
 0x22e   : > { %v5938_v22 = vpack.c.bf16 %v2248_v5, %v2247_v51 }
 0x22f   : > { %6424 = vst [vmem:[#allocation5 + $0xa8] sm:$0xff] %v5948_v35  }
 0x230   : > { %6422 = vst [vmem:[#allocation5 + $0x70] sm:$0xff] %v5938_v22  }
 0x231   : > { %v2154_v42 = vpop.f32.mrf.mxu2 }
 0x232   : > { %v1987_v62 = vpop.f32.mrf.mxu1  ;;  %v2155_v3 = vadd.f32 %v2154_v42, %v1986_v11 }
 0x233   : > { %v1988_v34 = vadd.f32 %v1987_v62, %v1402_v21 }
 0x234   : > { %v2249_v50 = vadd.f32 %v7572_v41, %v2155_v3 }
 0x239   : > { %v2156_v14 = vpop.f32.mrf.mxu2 }
 0x23a   : > { %v2157_v20 = vadd.f32 %v2156_v14, %v1988_v34 }
 0x23c   : > { %v2250_v48 = vadd.f32 %v7572_v41, %v2157_v20 }
 0x23e   : > { %v5943_v40 = vpack.c.bf16 %v2250_v48, %v2249_v50 }
 0x240   : > { %6423 = vst [vmem:[#allocation5 + $0xc0] sm:$0xff] %v5943_v40  }
 0x241 PF: > { %p5636_p6 = scmp.ne.s32.totalorder %s6669_s21, 1 }
 0x243   : > { %2829 = sbr.rel (%p5636_p6) target bundleno = 967 (0x3c7), region = 100 }
 0x248   : > { %v5824_v44 = vld [vmem:[%s8756_s11 + $0x38] sm:$0xff]  ;;  %v5823_v43 = vld [vmem:[%s8756_s11 + $0x30] sm:$0xff]  ;;  %v5822_v41 = vld [vmem:[%s8756_s11 + $0x28] sm:$0xff] }
 0x249   : > { %3193 = vmatpush.bf16.msra.mxu0 %v5824_v44  ;;  %6542 = vmatpush.bf16.msra.mxu1 %v5824_v44  ;;  %v5821_v31 = vld [vmem:[%s8756_s11 + $0x20] sm:$0xff]  ;;  %v5820_v33 = vld [vmem:[%s8756_s11 + $0x18] sm:$0xff]  ;;  %v6439_v24 = vld [vmem:[#allocation5 + $0x80] sm:$0xff]  }
 0x24a   : > { %6543 = vmatpush.bf16.msra.mxu2 %v5824_v44  ;;  %6544 = vmatpush.bf16.msra.mxu3 %v5824_v44  ;;  %v5986_v39 = vld [vmem:[#allocation5 + $0xb0] sm:$0xff]   ;;  %v7717_v23 = vld [vmem:[#allocation3] ss:$0 sm:$0xff]  ;;  %v6019_v7 = vunpack.c.l.bf16 %v6439_v24  ;;  %v6020_v21 = vunpack.c.h.bf16 %v6439_v24  ;;  %v5819_v46 = vld [vmem:[%s8756_s11 + $0x10] sm:$0xff] }
 0x24b   : > { %v5987_v29 = vunpack.c.l.bf16 %v5986_v39  ;;  %v5988_v10 = vunpack.c.h.bf16 %v5986_v39  ;;  %v7724_v13 = vld [vmem:[#allocation3 + $0x1] ss:$0 sm:$0xff]  ;;  %v5818_v49 = vld [vmem:[%s8756_s11 + $0x8] sm:$0xff]  ;;  %v6440_v9 = vld [vmem:[#allocation5 + $0x88] sm:$0xff]  }
 0x24c   : > { %v2979_v47 = vmul.f32 %v7717_v23, %v6019_v7  ;;  %v2980_v58 = vmul.f32 %v7717_v23, %v6020_v21  ;;  %v5817_v32 = vld [vmem:[%s8756_s11] sm:$0xff]  ;;  %v6432_v57 = vld [vmem:[#allocation5] sm:$0xff]   ;;  %v6023_v1 = vunpack.c.l.bf16 %v6440_v9  ;;  %v6024_v18 = vunpack.c.h.bf16 %v6440_v9  ;;  %v6441_v59 = vld [vmem:[#allocation5 + $0xe8] sm:$0xff]  }
 0x24d   : > { %3194 = vmatpush.bf16.msra.mxu0 %v5823_v43  ;;  %6545 = vmatpush.bf16.msra.mxu1 %v5823_v43  ;;  %v2963_v25 = vmul.f32 %v7717_v23, %v5987_v29  ;;  %v2964_v30 = vmul.f32 %v7717_v23, %v5988_v10  ;;  %v5991_v56 = vunpack.c.l.bf16 %v6432_v57  ;;  %v5992_v54 = vunpack.c.h.bf16 %v6432_v57  ;;  %v6433_v17 = vld [vmem:[#allocation5 + $0xd8] sm:$0xff]  }
 0x24e   : > { %6546 = vmatpush.bf16.msra.mxu2 %v5823_v43  ;;  %6547 = vmatpush.bf16.msra.mxu3 %v5823_v43  ;;  %v3045_v15 = vadd.f32 %v7724_v13, %v2979_v47  ;;  %v3046_v45 = vadd.f32 %v7724_v13, %v2980_v58  ;;  %v2981_v60 = vmul.f32 %v7717_v23, %v6023_v1  ;;  %v5995_v63 = vunpack.c.l.bf16 %v6433_v17  ;;  %v6434_v20 = vld [vmem:[#allocation5 + $0x18] sm:$0xff]   ;;  %v6455_v47 = vld [vmem:[#allocation5 + $0xa8] sm:$0xff]  }
 0x24f   : > { %v3029_v12 = vadd.f32 %v7724_v13, %v2963_v25  ;;  %v3030_v37 = vadd.f32 %v7724_v13, %v2964_v30  ;;  %v2965_v52 = vmul.f32 %v7717_v23, %v5991_v56  ;;  %v2966_v8 = vmul.f32 %v7717_v23, %v5992_v54  ;;  %v6442_v50 = vld [vmem:[#allocation5 + $0xb8] sm:$0xff]  }
 0x250   : > { %v3101_v53 = vpack.c.bf16 %v3046_v45, %v3045_v15  ;;  %v2982_v16 = vmul.f32 %v7717_v23, %v6024_v18  ;;  %v3047_v28 = vadd.f32 %v7724_v13, %v2981_v60  ;;  %v5996_v4 = vunpack.c.h.bf16 %v6433_v17  ;;  %v6447_v30 = vld [vmem:[#allocation5 + $0x38] sm:$0xff]  }
 0x251   : > { %3195 = vmatpush.bf16.msra.mxu0 %v5822_v41  ;;  %6548 = vmatpush.bf16.msra.mxu1 %v5822_v41  ;;  %v3093_v19 = vpack.c.bf16 %v3030_v37, %v3029_v12  ;;  %v3031_v26 = vadd.f32 %v7724_v13, %v2965_v52  ;;  %v3032_v27 = vadd.f32 %v7724_v13, %v2966_v8  ;;  %v6027_v55 = vunpack.c.l.bf16 %v6441_v59 }
 0x252   : > { %6549 = vmatpush.bf16.msra.mxu2 %v5822_v41  ;;  %6550 = vmatpush.bf16.msra.mxu3 %v5822_v41  ;;  %v3048_v36 = vadd.f32 %v7724_v13, %v2982_v16  ;;  %v6028_v38 = vunpack.c.h.bf16 %v6441_v59  ;;  %v2967_v51 = vmul.f32 %v7717_v23, %v5995_v63  ;;  %v2968_v5 = vmul.f32 %v7717_v23, %v5996_v4  ;;  %v6436_v4 = vld [vmem:[#allocation5 + $0x68] sm:$0xff]  }
 0x253   : > { %v3094_v61 = vpack.c.bf16 %v3032_v27, %v3031_v26  ;;  %v2983_v35 = vmul.f32 %v7717_v23, %v6027_v55  ;;  %v5999_v48 = vunpack.c.l.bf16 %v6434_v20  ;;  %v6000_v40 = vunpack.c.h.bf16 %v6434_v20 }
 0x254   : > { %v3102_v0 = vpack.c.bf16 %v3048_v36, %v3047_v28  ;;  %v2984_v22 = vmul.f32 %v7717_v23, %v6028_v38  ;;  %v3033_v42 = vadd.f32 %v7724_v13, %v2967_v51  ;;  %v3034_v62 = vadd.f32 %v7724_v13, %v2968_v5  ;;  %v6448_v38 = vld [vmem:[#allocation5 + $0x58] sm:$0xff]   ;;  %v6456_v51 = vld [vmem:[#allocation5 + $0xd0] sm:$0xff]  }
 0x255   : > { %3196 = vmatpush.bf16.msra.mxu0 %v5821_v31  ;;  %6551 = vmatpush.bf16.msra.mxu1 %v5821_v31  ;;  %v3049_v11 = vadd.f32 %v7724_v13, %v2983_v35  ;;  %v6031_v44 = vunpack.c.l.bf16 %v6442_v50  ;;  %v6032_v43 = vunpack.c.h.bf16 %v6442_v50  ;;  %v2969_v41 = vmul.f32 %v7717_v23, %v5999_v48 }
 0x256   : > { %6552 = vmatpush.bf16.msra.mxu2 %v5821_v31  ;;  %6553 = vmatpush.bf16.msra.mxu3 %v5821_v31  ;;  %v3050_v3 = vadd.f32 %v7724_v13, %v2984_v22  ;;  %v3095_v34 = vpack.c.bf16 %v3034_v62, %v3033_v42  ;;  %v2970_v31 = vmul.f32 %v7717_v23, %v6000_v40  ;;  %v6051_v58 = vunpack.c.l.bf16 %v6447_v30 }
 0x257   : > { %v2986_v39 = vmul.f32 %v7717_v23, %v6032_v43  ;;  %v3035_v24 = vadd.f32 %v7724_v13, %v2969_v41  ;;  %v6083_v12 = vunpack.c.l.bf16 %v6455_v47  ;;  %v6084_v37 = vunpack.c.h.bf16 %v6455_v47 }
 0x258   : > { %v3103_v14 = vpack.c.bf16 %v3050_v3, %v3049_v11  ;;  %v3036_v29 = vadd.f32 %v7724_v13, %v2970_v31  ;;  %v6055_v5 = vunpack.c.l.bf16 %v6448_v38  ;;  %v6056_v35 = vunpack.c.h.bf16 %v6448_v38  ;;  %v6444_v3 = vld [vmem:[#allocation5 + $0xf0] sm:$0xff]  }
 0x259   : > { %3197 = vmatpush.bf16.msra.mxu0 %v5820_v33  ;;  %6554 = vmatpush.bf16.msra.mxu1 %v5820_v33  ;;  %v3052_v7 = vadd.f32 %v7724_v13, %v2986_v39  ;;  %v3011_v57 = vmul.f32 %v7717_v23, %v6083_v12  ;;  %v3012_v56 = vmul.f32 %v7717_v23, %v6084_v37  ;;  %v6087_v22 = vunpack.c.l.bf16 %v6456_v51  ;;  %v6449_v12 = vld [vmem:[#allocation5 + $0x40] sm:$0xff]   ;;  %v6457_v37 = vld [vmem:[#allocation5 + $0x10] sm:$0xff]  }
 0x25a   : > { %6555 = vmatpush.bf16.msra.mxu2 %v5820_v33  ;;  %6556 = vmatpush.bf16.msra.mxu3 %v5820_v33  ;;  %v2985_v33 = vmul.f32 %v7717_v23, %v6031_v44  ;;  %v3096_v21 = vpack.c.bf16 %v3036_v29, %v3035_v24  ;;  %v6088_v42 = vunpack.c.h.bf16 %v6456_v51  ;;  %v6007_v62 = vunpack.c.l.bf16 %v6436_v4 }
 0x25b   : > { %v3077_v52 = vadd.f32 %v7724_v13, %v3011_v57  ;;  %v3078_v60 = vadd.f32 %v7724_v13, %v3012_v56  ;;  %v6008_v11 = vunpack.c.h.bf16 %v6436_v4  ;;  %v3013_v20 = vmul.f32 %v7717_v23, %v6087_v22  ;;  %v6450_v22 = vld [vmem:[#allocation5 + $0xc8] sm:$0xff]  }
 0x25c   : > { %v3051_v10 = vadd.f32 %v7724_v13, %v2985_v33  ;;  %v6039_v50 = vunpack.c.l.bf16 %v6444_v3  ;;  %v3014_v48 = vmul.f32 %v7717_v23, %v6088_v42  ;;  %v6040_v40 = vunpack.c.h.bf16 %v6444_v3  ;;  %v6458_v42 = vld [vmem:[#allocation5 + $0x28] sm:$0xff]  }
 0x25d   : > { %3198 = vmatpush.bf16.msra.mxu0 %v5819_v46  ;;  %6557 = vmatpush.bf16.msra.mxu1 %v5819_v46  ;;  %v3117_v36 = vpack.c.bf16 %v3078_v60, %v3077_v52  ;;  %v3079_v41 = vadd.f32 %v7724_v13, %v3013_v20  ;;  %v2973_v31 = vmul.f32 %v7717_v23, %v6007_v62  ;;  %v6063_v62 = vunpack.c.l.bf16 %v6450_v22 }
 0x25e   : > { %6558 = vmatpush.bf16.msra.mxu2 %v5819_v46  ;;  %6559 = vmatpush.bf16.msra.mxu3 %v5819_v46  ;;  %v6435_v46 = vld [vmem:[#allocation5 + $0x50] sm:$0xff]   ;;  %v3104_v25 = vpack.c.bf16 %v3052_v7, %v3051_v10  ;;  %v3080_v33 = vadd.f32 %v7724_v13, %v3014_v48  ;;  %v2974_v39 = vmul.f32 %v7717_v23, %v6008_v11  ;;  %v6064_v11 = vunpack.c.h.bf16 %v6450_v22 }
 0x25f   : > { %v6003_v15 = vunpack.c.l.bf16 %v6435_v46  ;;  %v6004_v45 = vunpack.c.h.bf16 %v6435_v46  ;;  %v2989_v29 = vmul.f32 %v7717_v23, %v6039_v50  ;;  %v2990_v10 = vmul.f32 %v7717_v23, %v6040_v40  ;;  %v6446_v50 = vld [vmem:[#allocation5 + $0x78] sm:$0xff]  }
 0x260   : > { %v3118_v7 = vpack.c.bf16 %v3080_v33, %v3079_v41  ;;  %v3040_v46 = vadd.f32 %v7724_v13, %v2974_v39  ;;  %v6095_v3 = vunpack.c.l.bf16 %v6458_v42  ;;  %v3001_v48 = vmul.f32 %v7717_v23, %v6063_v62 }
 0x261   : > { %3199 = vmatpush.bf16.msra.mxu0 %v5818_v49  ;;  %6560 = vmatpush.bf16.msra.mxu1 %v5818_v49  ;;  %v2971_v8 = vmul.f32 %v7717_v23, %v6003_v15  ;;  %v2972_v16 = vmul.f32 %v7717_v23, %v6004_v45  ;;  %v6059_v15 = vunpack.c.l.bf16 %v6449_v12  ;;  %v6060_v45 = vunpack.c.h.bf16 %v6449_v12 }
 0x262   : > { %6561 = vmatpush.bf16.msra.mxu2 %v5818_v49  ;;  %6562 = vmatpush.bf16.msra.mxu3 %v5818_v49  ;;  %v6052_v49 = vunpack.c.h.bf16 %v6447_v30  ;;  %v3056_v30 = vadd.f32 %v7724_v13, %v2990_v10  ;;  %v3002_v40 = vmul.f32 %v7717_v23, %v6064_v11  ;;  %v3067_v33 = vadd.f32 %v7724_v13, %v3001_v48 }
 0x263   : > { %v2999_v56 = vmul.f32 %v7717_v23, %v6059_v15 }
 0x264   : > { %v3068_v39 = vadd.f32 %v7724_v13, %v3002_v40 }
 0x265   : > { %3200 = vmatpush.bf16.msra.mxu0 %v5817_v32  ;;  %6563 = vmatpush.bf16.msra.mxu1 %v5817_v32  ;;  %v3065_v60 = vadd.f32 %v7724_v13, %v2999_v56 }
 0x266   : > { %6564 = vmatpush.bf16.msra.mxu2 %v5817_v32  ;;  %6565 = vmatpush.bf16.msra.mxu3 %v5817_v32  ;;  %v6443_v32 = vld [vmem:[#allocation5 + $0x60] sm:$0xff]  }
 0x267   : > { %v6035_v9 = vunpack.c.l.bf16 %v6443_v32  ;;  %v6036_v54 = vunpack.c.h.bf16 %v6443_v32  ;;  %v6091_v32 = vunpack.c.l.bf16 %v6457_v37 }
 0x268   : > { %3201 = vmatmul.bf16.vlgmr.msra.gmra.mxu0 %v3093_v19  ;;  %3241 = vmatmul.bf16.vlgmr.msra.gmra.mxu1 %v3101_v53  ;;  %v2995_v19 = vmul.f32 %v7717_v23, %v6051_v58  ;;  %v2996_v53 = vmul.f32 %v7717_v23, %v6052_v49  ;;  %v6437_v58 = vld [vmem:[#allocation5 + $0x30] sm:$0xff]  }
 0x269   : > { %v2987_v27 = vmul.f32 %v7717_v23, %v6035_v9  ;;  %v2988_v28 = vmul.f32 %v7717_v23, %v6036_v54  ;;  %3321 = vmatmul.bf16.vlgmr.msra.gmra.mxu3 %v3117_v36  ;;  %v6012_v57 = vunpack.c.h.bf16 %v6437_v58  ;;  %v6445_v9 = vld [vmem:[#allocation5 + $0x8] sm:$0xff]   ;;  %v3000_v54 = vmul.f32 %v7717_v23, %v6060_v45  ;;  %v6451_v45 = vld [vmem:[#allocation5 + $0xe0] sm:$0xff]  }
 0x26a   : > { %v3061_v1 = vadd.f32 %v7724_v13, %v2995_v19  ;;  %v3062_v18 = vadd.f32 %v7724_v13, %v2996_v53  ;;  %v6092_v19 = vunpack.c.h.bf16 %v6457_v37  ;;  %v6011_v53 = vunpack.c.l.bf16 %v6437_v58 }
 0x26b   : > { %v3053_v17 = vadd.f32 %v7724_v13, %v2987_v27  ;;  %v3054_v59 = vadd.f32 %v7724_v13, %v2988_v28  ;;  %v2976_v36 = vmul.f32 %v7717_v23, %v6012_v57 }
 0x26c   : > { %v3109_v26 = vpack.c.bf16 %v3062_v18, %v3061_v1  ;;  %v3015_v1 = vmul.f32 %v7717_v23, %v6091_v32  ;;  %v6043_v18 = vunpack.c.l.bf16 %v6445_v9  ;;  %v3016_v52 = vmul.f32 %v7717_v23, %v6092_v19  ;;  %v6459_v32 = vld [vmem:[#allocation5 + $0xa0] sm:$0xff]  }
 0x26d   : > { %v3105_v55 = vpack.c.bf16 %v3054_v59, %v3053_v17  ;;  %v2975_v27 = vmul.f32 %v7717_v23, %v6011_v53  ;;  %v3042_v4 = vadd.f32 %v7724_v13, %v2976_v36  ;;  %v6067_v19 = vunpack.c.l.bf16 %v6451_v45 }
 0x26e   : > { %3281 = vmatmul.bf16.vlgmr.msra.gmra.mxu2 %v3109_v26  ;;  %v3081_v26 = vadd.f32 %v7724_v13, %v3015_v1  ;;  %v3082_v28 = vadd.f32 %v7724_v13, %v3016_v52  ;;  %v6068_v53 = vunpack.c.h.bf16 %v6451_v45  ;;  %v6099_v57 = vunpack.c.l.bf16 %v6459_v32 }
 0x26f   : > { %v3003_v56 = vmul.f32 %v7717_v23, %v6067_v19 }
 0x270   : > { %v3119_v59 = vpack.c.bf16 %v3082_v28, %v3081_v26  ;;  %v3019_v1 = vmul.f32 %v7717_v23, %v6099_v57 }
 0x271   : > { %v3069_v52 = vadd.f32 %v7724_v13, %v3003_v56 }
 0x278   : > { %3206 = vmatmul.bf16.gmra.mxu0 %v3094_v61  ;;  %3246 = vmatmul.bf16.gmra.mxu1 %v3102_v0  ;;  %v3037_v61 = vadd.f32 %v7724_v13, %v2971_v8  ;;  %v3038_v0 = vadd.f32 %v7724_v13, %v2972_v16  ;;  %v6044_v8 = vunpack.c.h.bf16 %v6445_v9  ;;  %v3066_v16 = vadd.f32 %v7724_v13, %v3000_v54 }
 0x279   : > { %3326 = vmatmul.bf16.gmra.mxu3 %v3118_v7  ;;  %v6100_v9 = vunpack.c.h.bf16 %v6459_v32  ;;  %v3004_v54 = vmul.f32 %v7717_v23, %v6068_v53 }
 0x27a   : > { %v3097_v63 = vpack.c.bf16 %v3038_v0, %v3037_v61  ;;  %v3111_v61 = vpack.c.bf16 %v3066_v16, %v3065_v60  ;;  %v2991_v0 = vmul.f32 %v7717_v23, %v6043_v18  ;;  %v2992_v17 = vmul.f32 %v7717_v23, %v6044_v8 }
 0x27b   : > { %v3020_v18 = vmul.f32 %v7717_v23, %v6100_v9  ;;  %v3070_v8 = vadd.f32 %v7724_v13, %v3004_v54  ;;  %v3085_v60 = vadd.f32 %v7724_v13, %v3019_v1 }
 0x27c   : > { %v3058_v38 = vadd.f32 %v7724_v13, %v2992_v17 }
 0x27d   : > { %v3086_v16 = vadd.f32 %v7724_v13, %v3020_v18  ;;  %v3113_v26 = vpack.c.bf16 %v3070_v8, %v3069_v52 }
 0x288   : > { %3211 = vmatmul.bf16.gmra.mxu0 %v3095_v34  ;;  %3251 = vmatmul.bf16.gmra.mxu1 %v3103_v14  ;;  %v2997_v34 = vmul.f32 %v7717_v23, %v6055_v5  ;;  %v2998_v14 = vmul.f32 %v7717_v23, %v6056_v35  ;;  %v6438_v5 = vld [vmem:[#allocation5 + $0x48] sm:$0xff]  }
 0x289   : > { %3331 = vmatmul.bf16.gmra.mxu3 %v3119_v59  ;;  %v6016_v20 = vunpack.c.h.bf16 %v6438_v5 }
 0x28a   : > { %v3063_v44 = vadd.f32 %v7724_v13, %v2997_v34  ;;  %v3064_v43 = vadd.f32 %v7724_v13, %v2998_v14  ;;  %v6096_v34 = vunpack.c.h.bf16 %v6458_v42  ;;  %v6015_v14 = vunpack.c.l.bf16 %v6438_v5 }
 0x28b   : > { %v2978_v7 = vmul.f32 %v7717_v23, %v6016_v20 }
 0x28c   : > { %v3110_v24 = vpack.c.bf16 %v3064_v43, %v3063_v44  ;;  %v3017_v44 = vmul.f32 %v7717_v23, %v6095_v3  ;;  %v6047_v43 = vunpack.c.l.bf16 %v6446_v50  ;;  %v3018_v41 = vmul.f32 %v7717_v23, %v6096_v34 }
 0x28d   : > { %v3044_v58 = vadd.f32 %v7724_v13, %v2978_v7  ;;  %v6453_v7 = vld [vmem:[#allocation5 + $0x70] sm:$0xff]  }
 0x28e   : > { %3286 = vmatmul.bf16.gmra.mxu2 %v3110_v24  ;;  %v3083_v24 = vadd.f32 %v7724_v13, %v3017_v44  ;;  %v3084_v10 = vadd.f32 %v7724_v13, %v3018_v41 }
 0x298   : > { %3216 = vmatmul.bf16.gmra.mxu0 %v3096_v21  ;;  %3256 = vmatmul.bf16.gmra.mxu1 %v3104_v25  ;;  %v3039_v21 = vadd.f32 %v7724_v13, %v2973_v31  ;;  %v3055_v25 = vadd.f32 %v7724_v13, %v2989_v29  ;;  %v6048_v31 = vunpack.c.h.bf16 %v6446_v50  ;;  %v2977_v29 = vmul.f32 %v7717_v23, %v6015_v14 }
 0x29a   : > { %v3098_v47 = vpack.c.bf16 %v3040_v46, %v3039_v21  ;;  %v3106_v49 = vpack.c.bf16 %v3056_v30, %v3055_v25  ;;  %v3112_v21 = vpack.c.bf16 %v3068_v39, %v3067_v33  ;;  %v2993_v46 = vmul.f32 %v7717_v23, %v6047_v43 }
 0x29b   : > { %v2994_v25 = vmul.f32 %v7717_v23, %v6048_v31  ;;  %v3120_v30 = vpack.c.bf16 %v3084_v10, %v3083_v24 }
 0x29d   : > { %3336 = vmatmul.bf16.gmra.mxu3 %v3120_v30  ;;  %v3060_v12 = vadd.f32 %v7724_v13, %v2994_v25  ;;  %v6075_v25 = vunpack.c.l.bf16 %v6453_v7  ;;  %v6076_v30 = vunpack.c.h.bf16 %v6453_v7 }
 0x29e   : > { %3291 = vmatmul.bf16.gmra.mxu2 %v3111_v61  ;;  %v6452_v61 = vld [vmem:[#allocation5 + $0x90] sm:$0xff]  }
 0x29f   : > { %v6071_v17 = vunpack.c.l.bf16 %v6452_v61  ;;  %v6072_v59 = vunpack.c.h.bf16 %v6452_v61 }
 0x2a8   : > { %3221 = vmatmul.bf16.gmra.mxu0 %v3097_v63  ;;  %3261 = vmatmul.bf16.gmra.mxu1 %v3105_v55  ;;  %v3041_v63 = vadd.f32 %v7724_v13, %v2975_v27  ;;  %v3057_v55 = vadd.f32 %v7724_v13, %v2991_v0  ;;  %v3121_v27 = vpack.c.bf16 %v3086_v16, %v3085_v60  ;;  %v6460_v0 = vld [vmem:[#allocation5 + $0xf8] sm:$0xff]  }
 0x2aa   : > { %v3099_v51 = vpack.c.bf16 %v3042_v4, %v3041_v63  ;;  %v3107_v35 = vpack.c.bf16 %v3058_v38, %v3057_v55  ;;  %v6103_v63 = vunpack.c.l.bf16 %v6460_v0  ;;  %v6104_v4 = vunpack.c.h.bf16 %v6460_v0  ;;  %v7837_v55 = vld [vmem:[%s8757_s12] ss:$0 sm:$0xff] }
 0x2ab   : > { %v3005_v38 = vmul.f32 %v7717_v23, %v6071_v17 }
 0x2ac   : > { %v3021_v5 = vmul.f32 %v7717_v23, %v6103_v63  ;;  %v6462_v63 = vld [vmem:[#allocation5 + $0x98] sm:$0xff]  }
 0x2ad   : > { %3341 = vmatmul.bf16.gmra.mxu3 %v3121_v27  ;;  %v3071_v22 = vadd.f32 %v7724_v13, %v3005_v38 }
 0x2ae   : > { %3296 = vmatmul.bf16.gmra.mxu2 %v3112_v21  ;;  %v3087_v62 = vadd.f32 %v7724_v13, %v3021_v5  ;;  %v6461_v21 = vld [vmem:[#allocation5 + $0x20] sm:$0xff]   ;;  %v6112_v5 = vunpack.c.h.bf16 %v6462_v63 }
 0x2b8   : > { %3226 = vmatmul.bf16.gmra.mxu0 %v3098_v47  ;;  %3266 = vmatmul.bf16.gmra.mxu1 %v3106_v49  ;;  %v3043_v47 = vadd.f32 %v7724_v13, %v2977_v29  ;;  %v3059_v49 = vadd.f32 %v7724_v13, %v2993_v46 }
 0x2ba   : > { %v3100_v37 = vpack.c.bf16 %v3044_v58, %v3043_v47  ;;  %v3108_v15 = vpack.c.bf16 %v3060_v12, %v3059_v49  ;;  %v6107_v47 = vunpack.c.l.bf16 %v6461_v21  ;;  %v6108_v58 = vunpack.c.h.bf16 %v6461_v21 }
 0x2bc   : > { %v3023_v45 = vmul.f32 %v7717_v23, %v6107_v47  ;;  %v3024_v32 = vmul.f32 %v7717_v23, %v6108_v58 }
 0x2be   : > { %3301 = vmatmul.bf16.gmra.mxu2 %v3113_v26  ;;  %v3089_v9 = vadd.f32 %v7724_v13, %v3023_v45  ;;  %v3090_v56 = vadd.f32 %v7724_v13, %v3024_v32 }
 0x2c0   : > { %v3123_v8 = vpack.c.bf16 %v3090_v56, %v3089_v9 }
 0x2c8   : > { %3231 = vmatmul.bf16.gmra.mxu0 %v3099_v51  ;;  %3271 = vmatmul.bf16.gmra.mxu1 %v3107_v35  ;;  %v3006_v51 = vmul.f32 %v7717_v23, %v6072_v59  ;;  %v3022_v35 = vmul.f32 %v7717_v23, %v6104_v4  ;;  %v6454_v59 = vld [vmem:[#allocation5 + $0xc0] sm:$0xff]  }
 0x2c9   : > { %v6079_v4 = vunpack.c.l.bf16 %v6454_v59  ;;  %v6080_v38 = vunpack.c.h.bf16 %v6454_v59 }
 0x2ca   : > { %v3072_v42 = vadd.f32 %v7724_v13, %v3006_v51  ;;  %v3088_v11 = vadd.f32 %v7724_v13, %v3022_v35  ;;  %v6111_v51 = vunpack.c.l.bf16 %v6462_v63 }
 0x2cb   : > { %v3009_v35 = vmul.f32 %v7717_v23, %v6079_v4 }
 0x2cc   : > { %v3114_v34 = vpack.c.bf16 %v3072_v42, %v3071_v22  ;;  %v3122_v48 = vpack.c.bf16 %v3088_v11, %v3087_v62  ;;  %v3010_v22 = vmul.f32 %v7717_v23, %v6080_v38  ;;  %v3025_v42 = vmul.f32 %v7717_v23, %v6111_v51 }
 0x2cd   : > { %v3026_v62 = vmul.f32 %v7717_v23, %v6112_v5  ;;  %v3075_v11 = vadd.f32 %v7724_v13, %v3009_v35 }
 0x2ce   : > { %3306 = vmatmul.bf16.gmra.mxu2 %v3114_v34  ;;  %3346 = vmatmul.bf16.gmra.mxu3 %v3122_v48  ;;  %v3091_v34 = vadd.f32 %v7724_v13, %v3025_v42 }
 0x2d8   : > { %3236 = vmatmul.bf16.gmra.mxu0 %v3100_v37  ;;  %3276 = vmatmul.bf16.gmra.mxu1 %v3108_v15  ;;  %v3007_v37 = vmul.f32 %v7717_v23, %v6075_v25  ;;  %v3008_v15 = vmul.f32 %v7717_v23, %v6076_v30 }
 0x2da   : > { %v3073_v53 = vadd.f32 %v7724_v13, %v3007_v37  ;;  %v3074_v57 = vadd.f32 %v7724_v13, %v3008_v15 }
 0x2dc   : > { %v3115_v52 = vpack.c.bf16 %v3074_v57, %v3073_v53 }
 0x2de   : > { %3311 = vmatmul.bf16.gmra.mxu2 %v3115_v52  ;;  %3351 = vmatmul.bf16.gmra.mxu3 %v3123_v8 }
 0x2e5   : > { %v3202_v28 = vpop.f32.mrf.mxu0  ;;  %v3242_v36 = vpop.f32.mrf.mxu1 }
 0x2e6   : > { %v3203_v3 = vadd.f32 %v7837_v55, %v3202_v28  ;;  %v7849_v20 = vadd.f32 %v7837_v55, %v3242_v36 }
 0x2e8   : > { %v3627_v43 = vmul.f32 %v3203_v3, %v3203_v3 }
 0x2ed   : > { %v3204_v14 = vpop.f32.mrf.mxu0  ;;  %v3244_v50 = vpop.f32.mrf.mxu1 }
 0x2ee   : > { %v3205_v40 = vadd.f32 %v7837_v55, %v3204_v14  ;;  %v7853_v44 = vadd.f32 %v7837_v55, %v3244_v50  ;;  %v3092_v14 = vadd.f32 %v7724_v13, %v3026_v62 }
 0x2f0   : > { %v3555_v41 = vadd.f32 %v3205_v40, %v3203_v3  ;;  %v3628_v31 = vmul.f32 %v3205_v40, %v3205_v40  ;;  %v6116_v33 = vpack.c.bf16 %v3205_v40, %v3203_v3  ;;  %v6156_v39 = vpack.c.bf16 %v7853_v44, %v7849_v20 }
 0x2f1   : > { %v3076_v3 = vadd.f32 %v7724_v13, %v3010_v22 }
 0x2f2   : > { %v3691_v24 = vadd.f32 %v3628_v31, %v3627_v43  ;;  %6117 = vst [vmem:[#allocation5 + $0xb0] sm:$0xff] %v6116_v33  }
 0x2f3   : > { %6470 = vst [vmem:[#allocation5 + $0x80] sm:$0xff] %v6156_v39   ;;  %v3116_v43 = vpack.c.bf16 %v3076_v3, %v3075_v11 }
 0x2f5   : > { %v3207_v29 = vpop.f32.mrf.mxu0  ;;  %v3247_v10 = vpop.f32.mrf.mxu1  ;;  %3316 = vmatmul.bf16.gmra.mxu2 %v3116_v43 }
 0x2f6   : > { %v3208_v46 = vadd.f32 %v7837_v55, %v3207_v29  ;;  %v7867_v1 = vadd.f32 %v7837_v55, %v3247_v10 }
 0x2f8   : > { %v3556_v49 = vadd.f32 %v3555_v41, %v3208_v46  ;;  %v3629_v12 = vmul.f32 %v3208_v46, %v3208_v46  ;;  %v3124_v41 = vpack.c.bf16 %v3092_v14, %v3091_v34 }
 0x2fa   : > { %v3692_v19 = vadd.f32 %v3691_v24, %v3629_v12  ;;  %3356 = vmatmul.bf16.gmra.mxu3 %v3124_v41  ;;  %v3322_v12 = vpop.f32.mrf.mxu3 }
 0x2fb   : > { %v3323_v32 = vadd.f32 %v7837_v55, %v3322_v12 }
 0x2fd   : > { %v3209_v54 = vpop.f32.mrf.mxu0  ;;  %v3249_v18 = vpop.f32.mrf.mxu1 }
 0x2fe   : > { %v3210_v60 = vadd.f32 %v7837_v55, %v3209_v54  ;;  %v7871_v16 = vadd.f32 %v7837_v55, %v3249_v18 }
 0x300   : > { %v7873_v26 = vadd.f32 %v3556_v49, %v3210_v60  ;;  %v3630_v27 = vmul.f32 %v3210_v60, %v3210_v60  ;;  %v6121_v28 = vpack.c.bf16 %v3210_v60, %v3208_v46  ;;  %v6161_v36 = vpack.c.bf16 %v7871_v16, %v7867_v1  ;;  %v3282_v49 = vpop.f32.mrf.mxu2 }
 0x301   : > { %v7920_v45 = vadd.f32 %v7837_v55, %v3282_v49 }
 0x302   : > { %v7877_v61 = vadd.f32 %v3692_v19, %v3630_v27  ;;  %6463 = vst [vmem:[#allocation5] sm:$0xff] %v6121_v28   ;;  %v3324_v57 = vpop.f32.mrf.mxu3 }
 0x303   : > { %6471 = vst [vmem:[#allocation5 + $0x88] sm:$0xff] %v6161_v36   ;;  %v3325_v9 = vadd.f32 %v7837_v55, %v3324_v57 }
 0x305   : > { %v3212_v0 = vpop.f32.mrf.mxu0  ;;  %v3252_v17 = vpop.f32.mrf.mxu1  ;;  %v6236_v8 = vpack.c.bf16 %v3325_v9, %v3323_v32 }
 0x306   : > { %v7888_v48 = vadd.f32 %v7837_v55, %v3252_v17  ;;  %v7891_v31 = vadd.f32 %v7837_v55, %v3212_v0 }
 0x307   : > { %6486 = vst [vmem:[#allocation5 + $0xa8] sm:$0xff] %v6236_v8  }
 0x308   : > { %v3284_v19 = vpop.f32.mrf.mxu2 }
 0x309   : > { %v7924_v53 = vadd.f32 %v7837_v55, %v3284_v19 }
 0x30a   : > { %v3327_v59 = vpop.f32.mrf.mxu3 }
 0x30b   : > { %v6196_v56 = vpack.c.bf16 %v7924_v53, %v7920_v45  ;;  %v3328_v51 = vadd.f32 %v7837_v55, %v3327_v59 }
 0x30d   : > { %v3214_v50 = vpop.f32.mrf.mxu0  ;;  %v3254_v40 = vpop.f32.mrf.mxu1  ;;  %6478 = vst [vmem:[#allocation5 + $0x38] sm:$0xff] %v6196_v56  }
 0x30e   : > { %v7894_v23 = vadd.f32 %v7837_v55, %v3214_v50  ;;  %v7897_v33 = vadd.f32 %v7837_v55, %v3254_v40 }
 0x310   : > { %v6126_v13 = vpack.c.bf16 %v7894_v23, %v7891_v31  ;;  %v6166_v39 = vpack.c.bf16 %v7897_v33, %v7888_v48 }
 0x311   : > { %v3287_v17 = vpop.f32.mrf.mxu2 }
 0x312   : > { %6464 = vst [vmem:[#allocation5 + $0xd8] sm:$0xff] %v6126_v13   ;;  %v7946_v38 = vadd.f32 %v7837_v55, %v3287_v17  ;;  %v3329_v22 = vpop.f32.mrf.mxu3 }
 0x313   : > { %6472 = vst [vmem:[#allocation5 + $0xe8] sm:$0xff] %v6166_v39   ;;  %v3330_v42 = vadd.f32 %v7837_v55, %v3329_v22 }
 0x315   : > { %v3217_v24 = vpop.f32.mrf.mxu0  ;;  %v3257_v29 = vpop.f32.mrf.mxu1  ;;  %v6241_v14 = vpack.c.bf16 %v3330_v42, %v3328_v51 }
 0x316   : > { %v7904_v7 = vadd.f32 %v7837_v55, %v3257_v29  ;;  %v7907_v46 = vadd.f32 %v7837_v55, %v3217_v24 }
 0x317   : > { %6487 = vst [vmem:[#allocation5 + $0xd0] sm:$0xff] %v6241_v14  }
 0x318   : > { %v3633_v9 = vmul.f32 %v7907_v46, %v7907_v46 }
 0x319   : > { %v3289_v5 = vpop.f32.mrf.mxu2 }
 0x31a   : > { %v7950_v35 = vadd.f32 %v7837_v55, %v3289_v5  ;;  %v3332_v24 = vpop.f32.mrf.mxu3 }
 0x31c   : > { %v6201_v62 = vpack.c.bf16 %v7950_v35, %v7946_v38 }
 0x31d   : > { %v3219_v10 = vpop.f32.mrf.mxu0  ;;  %v3259_v21 = vpop.f32.mrf.mxu1 }
 0x31e   : > { %v7910_v25 = vadd.f32 %v7837_v55, %v3219_v10  ;;  %v7913_v30 = vadd.f32 %v7837_v55, %v3259_v21  ;;  %6479 = vst [vmem:[#allocation5 + $0x58] sm:$0xff] %v6201_v62   ;;  %v3631_v21 = vmul.f32 %v7891_v31, %v7891_v31 }
 0x320   : > { %v6131_v47 = vpack.c.bf16 %v7910_v25, %v7907_v46  ;;  %v6171_v58 = vpack.c.bf16 %v7913_v30, %v7904_v7  ;;  %v3694_v12 = vadd.f32 %v7877_v61, %v3631_v21 }
 0x321   : > { %v3292_v39 = vpop.f32.mrf.mxu2 }
 0x322   : > { %6465 = vst [vmem:[#allocation5 + $0x18] sm:$0xff] %v6131_v47   ;;  %v3632_v47 = vmul.f32 %v7894_v23, %v7894_v23  ;;  %v3334_v19 = vpop.f32.mrf.mxu3 }
 0x323   : > { %6473 = vst [vmem:[#allocation5 + $0xb8] sm:$0xff] %v6171_v58   ;;  %v3558_v58 = vadd.f32 %v7873_v26, %v7891_v31  ;;  %v3335_v56 = vadd.f32 %v7837_v55, %v3334_v19 }
 0x324   : > { %v3695_v26 = vadd.f32 %v3694_v12, %v3632_v47 }
 0x325   : > { %v3222_v37 = vpop.f32.mrf.mxu0  ;;  %v3262_v15 = vpop.f32.mrf.mxu1  ;;  %v3559_v57 = vadd.f32 %v3558_v58, %v7894_v23 }
 0x326   : > { %v7930_v18 = vadd.f32 %v7837_v55, %v3262_v15  ;;  %v7933_v60 = vadd.f32 %v7837_v55, %v3222_v37  ;;  %v7973_v37 = vadd.f32 %v7837_v55, %v3292_v39  ;;  %v3333_v15 = vadd.f32 %v7837_v55, %v3332_v24 }
 0x327   : > { %v3560_v31 = vadd.f32 %v3559_v57, %v7907_v46 }
 0x328   : > { %v6246_v23 = vpack.c.bf16 %v3335_v56, %v3333_v15 }
 0x329   : > { %v3294_v49 = vpop.f32.mrf.mxu2  ;;  %v3561_v46 = vadd.f32 %v3560_v31, %v7910_v25 }
 0x32a   : > { %v7977_v32 = vadd.f32 %v7837_v55, %v3294_v49  ;;  %6488 = vst [vmem:[#allocation5 + $0x10] sm:$0xff] %v6246_v23  }
 0x32b   : > { %v3562_v22 = vadd.f32 %v3561_v46, %v7933_v60 }
 0x32c   : > { %v6206_v61 = vpack.c.bf16 %v7977_v32, %v7973_v37 }
 0x32d   : > { %v3224_v54 = vpop.f32.mrf.mxu0  ;;  %v3264_v52 = vpop.f32.mrf.mxu1 }
 0x32e   : > { %v7936_v27 = vadd.f32 %v7837_v55, %v3224_v54  ;;  %v7939_v28 = vadd.f32 %v7837_v55, %v3264_v52  ;;  %v3634_v54 = vmul.f32 %v7910_v25, %v7910_v25  ;;  %6480 = vst [vmem:[#allocation5 + $0x40] sm:$0xff] %v6206_v61  }
 0x330   : > { %v6136_v36 = vpack.c.bf16 %v7936_v27, %v7933_v60  ;;  %v6176_v0 = vpack.c.bf16 %v7939_v28, %v7930_v18  ;;  %v3636_v42 = vmul.f32 %v7936_v27, %v7936_v27  ;;  %v3563_v25 = vadd.f32 %v3562_v22, %v7936_v27 }
 0x332   : > { %6466 = vst [vmem:[#allocation5 + $0x50] sm:$0xff] %v6136_v36  }
 0x333   : > { %6474 = vst [vmem:[#allocation5 + $0x60] sm:$0xff] %v6176_v0  }
 0x335   : > { %v3227_v63 = vpop.f32.mrf.mxu0  ;;  %v3267_v4 = vpop.f32.mrf.mxu1 }
 0x336   : > { %v7956_v3 = vadd.f32 %v7837_v55, %v3267_v4  ;;  %v3228_v50 = vadd.f32 %v7837_v55, %v3227_v63  ;;  %v3696_v63 = vadd.f32 %v3695_v26, %v3633_v9  ;;  %v3635_v4 = vmul.f32 %v7933_v60, %v7933_v60 }
 0x338   : > { %v3697_v5 = vadd.f32 %v3696_v63, %v3634_v54  ;;  %v3564_v39 = vadd.f32 %v3563_v25, %v3228_v50 }
 0x33a   : > { %v3698_v14 = vadd.f32 %v3697_v5, %v3635_v4 }
 0x33d   : > { %v3229_v11 = vpop.f32.mrf.mxu0  ;;  %v3269_v34 = vpop.f32.mrf.mxu1 }
 0x33e   : > { %v3230_v40 = vadd.f32 %v7837_v55, %v3229_v11  ;;  %v7961_v43 = vadd.f32 %v7837_v55, %v3269_v34  ;;  %v3297_v11 = vpop.f32.mrf.mxu2  ;;  %v3337_v34 = vpop.f32.mrf.mxu3 }
 0x33f   : > { %v3298_v57 = vadd.f32 %v7837_v55, %v3297_v11  ;;  %v3338_v27 = vadd.f32 %v7837_v55, %v3337_v34  ;;  %v3643_v11 = vmul.f32 %v7849_v20, %v7849_v20 }
 0x340   : > { %v6141_v41 = vpack.c.bf16 %v3230_v40, %v3228_v50  ;;  %v6181_v13 = vpack.c.bf16 %v7961_v43, %v7956_v3  ;;  %v3638_v24 = vmul.f32 %v3230_v40, %v3230_v40  ;;  %v3565_v21 = vadd.f32 %v3564_v39, %v3230_v40 }
 0x342   : > { %6467 = vst [vmem:[#allocation5 + $0x68] sm:$0xff] %v6141_v41   ;;  %v3637_v41 = vmul.f32 %v3228_v50, %v3228_v50 }
 0x343   : > { %6475 = vst [vmem:[#allocation5 + $0xf0] sm:$0xff] %v6181_v13   ;;  %v3699_v13 = vadd.f32 %v3698_v14, %v3636_v42 }
 0x345   : > { %v3232_v29 = vpop.f32.mrf.mxu0  ;;  %v3272_v10 = vpop.f32.mrf.mxu1  ;;  %v3700_v60 = vadd.f32 %v3699_v13, %v3637_v41  ;;  %v3644_v41 = vmul.f32 %v7853_v44, %v7853_v44 }
 0x346   : > { %v7989_v8 = vadd.f32 %v7837_v55, %v3272_v10  ;;  %v3233_v0 = vadd.f32 %v7837_v55, %v3232_v29  ;;  %v3299_v15 = vpop.f32.mrf.mxu2  ;;  %v3339_v56 = vpop.f32.mrf.mxu3 }
 0x347   : > { %v3701_v49 = vadd.f32 %v3700_v60, %v3638_v24  ;;  %v3300_v9 = vadd.f32 %v7837_v55, %v3299_v15  ;;  %v3340_v50 = vadd.f32 %v7837_v55, %v3339_v56  ;;  %v3645_v24 = vmul.f32 %v7867_v1, %v7867_v1 }
 0x348   : > { %v3639_v47 = vmul.f32 %v3233_v0, %v3233_v0  ;;  %v3566_v12 = vadd.f32 %v3565_v21, %v3233_v0  ;;  %v3646_v60 = vmul.f32 %v7871_v16, %v7871_v16 }
 0x349   : > { %v6211_v40 = vpack.c.bf16 %v3300_v9, %v3298_v57  ;;  %v6251_v23 = vpack.c.bf16 %v3340_v50, %v3338_v27 }
 0x34a   : > { %v3702_v26 = vadd.f32 %v3701_v49, %v3639_v47  ;;  %v3647_v47 = vmul.f32 %v7888_v48, %v7888_v48 }
 0x34b   : > { %6481 = vst [vmem:[#allocation5 + $0xc8] sm:$0xff] %v6211_v40  }
 0x34c   : > { %6489 = vst [vmem:[#allocation5 + $0x28] sm:$0xff] %v6251_v23  }
 0x34d   : > { %v3234_v52 = vpop.f32.mrf.mxu0  ;;  %v3274_v36 = vpop.f32.mrf.mxu1 }
 0x34e   : > { %v3235_v17 = vadd.f32 %v7837_v55, %v3234_v52  ;;  %v7994_v59 = vadd.f32 %v7837_v55, %v3274_v36  ;;  %v3342_v25 = vpop.f32.mrf.mxu3 }
 0x34f   : > { %v3343_v15 = vadd.f32 %v7837_v55, %v3342_v25 }
 0x350   : > { %v6146_v51 = vpack.c.bf16 %v3235_v17, %v3233_v0  ;;  %v6186_v62 = vpack.c.bf16 %v7994_v59, %v7989_v8  ;;  %v3640_v19 = vmul.f32 %v3235_v17, %v3235_v17  ;;  %v3567_v61 = vadd.f32 %v3566_v12, %v3235_v17 }
 0x352   : > { %6468 = vst [vmem:[#allocation5 + $0x30] sm:$0xff] %v6146_v51   ;;  %v3703_v0 = vadd.f32 %v3702_v26, %v3640_v19 }
 0x353   : > { %6476 = vst [vmem:[#allocation5 + $0x8] sm:$0xff] %v6186_v62   ;;  %v3302_v62 = vpop.f32.mrf.mxu2 }
 0x354   : > { %v3303_v12 = vadd.f32 %v7837_v55, %v3302_v62  ;;  %v3655_v62 = vmul.f32 %v7989_v8, %v7989_v8 }
 0x355   : > { %v3237_v29 = vpop.f32.mrf.mxu0  ;;  %v3277_v10 = vpop.f32.mrf.mxu1 }
 0x356   : > { %v3238_v58 = vadd.f32 %v7837_v55, %v3237_v29  ;;  %v8011_v52 = vadd.f32 %v7837_v55, %v3277_v10  ;;  %v3344_v19 = vpop.f32.mrf.mxu3 }
 0x357   : > { %v3345_v57 = vadd.f32 %v7837_v55, %v3344_v19  ;;  %v3660_v19 = vmul.f32 %v7924_v53, %v7924_v53 }
 0x358   : > { %v3641_v31 = vmul.f32 %v3238_v58, %v3238_v58  ;;  %v3568_v63 = vadd.f32 %v3567_v61, %v3238_v58 }
 0x359   : > { %v6256_v50 = vpack.c.bf16 %v3345_v57, %v3343_v15  ;;  %v3661_v57 = vmul.f32 %v7946_v38, %v7946_v38 }
 0x35a   : > { %v3704_v51 = vadd.f32 %v3703_v0, %v3641_v31  ;;  %v3650_v31 = vmul.f32 %v7913_v30, %v7913_v30 }
 0x35b   : > { %6490 = vst [vmem:[#allocation5 + $0xa0] sm:$0xff] %v6256_v50  }
 0x35d   : > { %v3239_v54 = vpop.f32.mrf.mxu0  ;;  %v3279_v36 = vpop.f32.mrf.mxu1 }
 0x35e   : > { %v3240_v46 = vadd.f32 %v7837_v55, %v3239_v54  ;;  %v8015_v4 = vadd.f32 %v7837_v55, %v3279_v36 }
 0x360   : > { %v3569_v5 = vadd.f32 %v3568_v63, %v3240_v46  ;;  %v3642_v17 = vmul.f32 %v3240_v46, %v3240_v46  ;;  %v6151_v22 = vpack.c.bf16 %v3240_v46, %v3238_v58  ;;  %v6191_v42 = vpack.c.bf16 %v8015_v4, %v8011_v52  ;;  %v3304_v58 = vpop.f32.mrf.mxu2  ;;  %v3347_v63 = vpop.f32.mrf.mxu3 }
 0x361   : > { %v3652_v46 = vmul.f32 %v7939_v28, %v7939_v28  ;;  %v3348_v25 = vadd.f32 %v7837_v55, %v3347_v63 }
 0x362   : > { %v3570_v34 = vadd.f32 %v3569_v5, %v7849_v20  ;;  %v3705_v14 = vadd.f32 %v3704_v51, %v3642_v17  ;;  %6469 = vst [vmem:[#allocation5 + $0x48] sm:$0xff] %v6151_v22   ;;  %v3653_v5 = vmul.f32 %v7956_v3, %v7956_v3  ;;  %v3654_v22 = vmul.f32 %v7961_v43, %v7961_v43 }
 0x363   : > { %6477 = vst [vmem:[#allocation5 + $0x78] sm:$0xff] %v6191_v42  }
 0x364   : > { %v3571_v13 = vadd.f32 %v3570_v34, %v7853_v44  ;;  %v3706_v39 = vadd.f32 %v3705_v14, %v3643_v11 }
 0x366   : > { %v3572_v29 = vadd.f32 %v3571_v13, %v7867_v1  ;;  %v3707_v10 = vadd.f32 %v3706_v39, %v3644_v41  ;;  %v3305_v1 = vadd.f32 %v7837_v55, %v3304_v58  ;;  %v3658_v58 = vmul.f32 %v8015_v4, %v8015_v4 }
 0x368   : > { %v3573_v20 = vadd.f32 %v3572_v29, %v7871_v16  ;;  %v3708_v21 = vadd.f32 %v3707_v10, %v3645_v24  ;;  %v3648_v16 = vmul.f32 %v7897_v33, %v7897_v33  ;;  %v6216_v56 = vpack.c.bf16 %v3305_v1, %v3303_v12  ;;  %v3307_v36 = vpop.f32.mrf.mxu2  ;;  %v3349_v41 = vpop.f32.mrf.mxu3 }
 0x369   : > { %v3308_v14 = vadd.f32 %v7837_v55, %v3307_v36  ;;  %v3350_v13 = vadd.f32 %v7837_v55, %v3349_v41  ;;  %v3656_v24 = vmul.f32 %v7994_v59, %v7994_v59 }
 0x36a   : > { %v3574_v49 = vadd.f32 %v3573_v20, %v7888_v48  ;;  %v3709_v44 = vadd.f32 %v3708_v21, %v3646_v60  ;;  %v3649_v48 = vmul.f32 %v7904_v7, %v7904_v7  ;;  %6482 = vst [vmem:[#allocation5 + $0xe0] sm:$0xff] %v6216_v56   ;;  %v3657_v20 = vmul.f32 %v8011_v52, %v8011_v52 }
 0x36b   : > { %v6261_v10 = vpack.c.bf16 %v3350_v13, %v3348_v25  ;;  %v3663_v56 = vmul.f32 %v7973_v37, %v7973_v37 }
 0x36c   : > { %v3575_v27 = vadd.f32 %v3574_v49, %v7897_v33  ;;  %v3710_v9 = vadd.f32 %v3709_v44, %v3647_v47  ;;  %v3651_v33 = vmul.f32 %v7930_v18, %v7930_v18  ;;  %v3659_v49 = vmul.f32 %v7920_v45, %v7920_v45 }
 0x36d   : > { %6491 = vst [vmem:[#allocation5 + $0xf8] sm:$0xff] %v6261_v10  }
 0x36e   : > { %v3711_v26 = vadd.f32 %v3710_v9, %v3648_v16  ;;  %v3576_v61 = vadd.f32 %v3575_v27, %v7904_v7  ;;  %v3662_v27 = vmul.f32 %v7950_v35, %v7950_v35 }
 0x370   : > { %v3577_v40 = vadd.f32 %v3576_v61, %v7913_v30  ;;  %v3712_v54 = vadd.f32 %v3711_v26, %v3649_v48  ;;  %v3309_v11 = vpop.f32.mrf.mxu2  ;;  %v3352_v15 = vpop.f32.mrf.mxu3 }
 0x372   : > { %v3578_v23 = vadd.f32 %v3577_v40, %v7930_v18  ;;  %v3713_v0 = vadd.f32 %v3712_v54, %v3650_v31 }
 0x374   : > { %v3579_v7 = vadd.f32 %v3578_v23, %v7939_v28  ;;  %v3714_v51 = vadd.f32 %v3713_v0, %v3651_v33 }
 0x376   : > { %v3580_v30 = vadd.f32 %v3579_v7, %v7956_v3  ;;  %v3715_v17 = vadd.f32 %v3714_v51, %v3652_v46  ;;  %v3310_v3 = vadd.f32 %v7837_v55, %v3309_v11 }
 0x378   : > { %v3581_v42 = vadd.f32 %v3580_v30, %v7961_v43  ;;  %v3716_v18 = vadd.f32 %v3715_v17, %v3653_v5  ;;  %v6221_v29 = vpack.c.bf16 %v3310_v3, %v3308_v14  ;;  %v3312_v12 = vpop.f32.mrf.mxu2  ;;  %v3354_v31 = vpop.f32.mrf.mxu3 }
 0x379   : > { %v3313_v26 = vadd.f32 %v7837_v55, %v3312_v12 }
 0x37a   : > { %v3582_v34 = vadd.f32 %v3581_v42, %v7989_v8  ;;  %v3717_v28 = vadd.f32 %v3716_v18, %v3654_v22  ;;  %6483 = vst [vmem:[#allocation5 + $0x90] sm:$0xff] %v6221_v29   ;;  %v3554_v18 = vld [vmem:[#allocation2 + $0x2] sm:$0x1] }
 0x37c   : > { %v3718_v39 = vadd.f32 %v3717_v28, %v3655_v62  ;;  %v3583_v43 = vadd.f32 %v3582_v34, %v7994_v59  ;;  %v3626_v34 = vld [vmem:[#allocation2 + $0x3] sm:$0x1] }
 0x37e   : > { %v3719_v60 = vadd.f32 %v3718_v39, %v3656_v24  ;;  %v3584_v8 = vadd.f32 %v3583_v43, %v8011_v52 }
 0x380   : > { %v3720_v21 = vadd.f32 %v3719_v60, %v3657_v20  ;;  %v3585_v47 = vadd.f32 %v3584_v8, %v8015_v4  ;;  %v3314_v61 = vpop.f32.mrf.mxu2  ;;  %v3357_v5 = vpop.f32.mrf.mxu3 }
 0x381   : > { %v3315_v40 = vadd.f32 %v7837_v55, %v3314_v61  ;;  %v3358_v41 = vadd.f32 %v7837_v55, %v3357_v5 }
 0x382   : > { %v3586_v59 = vadd.f32 %v3585_v47, %v7920_v45  ;;  %v3721_v44 = vadd.f32 %v3720_v21, %v3658_v58 }
 0x383   : > { %v6226_v23 = vpack.c.bf16 %v3315_v40, %v3313_v26 }
 0x384   : > { %v3587_v52 = vadd.f32 %v3586_v59, %v7924_v53  ;;  %v3722_v1 = vadd.f32 %v3721_v44, %v3659_v49  ;;  %v3527_v53 = vsel %vm824_vm1, %v7977_v32, 0.0 }
 0x385   : > { %v3664_v54 = vmul.f32 %v3527_v53, %v3527_v53  ;;  %6484 = vst [vmem:[#allocation5 + $0x70] sm:$0xff] %v6226_v23  }
 0x386   : > { %v3588_v4 = vadd.f32 %v3587_v52, %v7946_v38  ;;  %v3723_v16 = vadd.f32 %v3722_v1, %v3660_v19  ;;  %v3353_v38 = vadd.f32 %v7837_v55, %v3352_v15  ;;  %v3893_v52 = vld [vmem:[%s8758_s13] sm:$0x1] }
 0x388   : > { %v3589_v45 = vadd.f32 %v3588_v4, %v7950_v35  ;;  %v3724_v9 = vadd.f32 %v3723_v16, %v3661_v57  ;;  %v3355_v35 = vadd.f32 %v7837_v55, %v3354_v31  ;;  %v3317_v51 = vpop.f32.mrf.mxu2  ;;  %v3359_v13 = vpop.f32.mrf.mxu3  ;;  %v3894_v16 = vld [vmem:[%s8759_s14] sm:$0x1] }
 0x389   : > { %v3318_v25 = vadd.f32 %v7837_v55, %v3317_v51  ;;  %v3360_v43 = vadd.f32 %v7837_v55, %v3359_v13 }
 0x38a   : > { %v3590_v50 = vadd.f32 %v3589_v45, %v7973_v37  ;;  %v3725_v48 = vadd.f32 %v3724_v9, %v3662_v27  ;;  %v6266_v0 = vpack.c.bf16 %v3355_v35, %v3353_v38 }
 0x38b   : > { %v6271_v10 = vpack.c.bf16 %v3360_v43, %v3358_v41 }
 0x38c   : > { %v3591_v36 = vadd.f32 %v3590_v50, %v3527_v53  ;;  %v3726_v33 = vadd.f32 %v3725_v48, %v3663_v56  ;;  %6492 = vst [vmem:[#allocation5 + $0x20] sm:$0xff] %v6266_v0  }
 0x38d   : > { %6493 = vst [vmem:[#allocation5 + $0x98] sm:$0xff] %v6271_v10  }
 0x38e   : > { %v3618_v6 = vrot.slane %v3591_v36, 4  ;;  %v3727_v32 = vadd.f32 %v3726_v33, %v3664_v54 }
 0x390   : > { %v3619_v37 = vadd.f32 %v3618_v6, %v3591_v36  ;;  %v3754_v63 = vrot.slane %v3727_v32, 4  ;;  %v3319_v3 = vpop.f32.mrf.mxu2 }
 0x391   : > { %v3320_v39 = vadd.f32 %v7837_v55, %v3319_v3 }
 0x392   : > { %v3620_v46 = vrot.slane %v3619_v37, 2  ;;  %v3755_v7 = vadd.f32 %v3754_v63, %v3727_v32 }
 0x393   : > { %v6231_v29 = vpack.c.bf16 %v3320_v39, %v3318_v25 }
 0x394   : > { %v3621_v30 = vadd.f32 %v3620_v46, %v3619_v37  ;;  %v3756_v17 = vrot.slane %v3755_v7, 2 }
 0x395   : > { %6485 = vst [vmem:[#allocation5 + $0xc0] sm:$0xff] %v6231_v29  }
 0x396   : > { %v3622_v22 = vrot.slane %v3621_v30, 1  ;;  %v3757_v42 = vadd.f32 %v3756_v17, %v3755_v7 }
 0x398   : > { %v3623_v62 = vadd.f32 %v3622_v22, %v3621_v30  ;;  %v3758_v11 = vrot.slane %v3757_v42, 1 }
 0x39a   : > { %v3624_v28 = vadd.f32 %v3623_v62, %v3554_v18  ;;  %v3759_v14 = vadd.f32 %v3758_v11, %v3757_v42 }
 0x39c   : > { %3625 = vst [vmem:[#allocation2 + $0x2] sm:$0x1] %v3624_v28  ;;  %v3760_v24 = vadd.f32 %v3759_v14, %v3626_v34 }
 0x39e   : > { %3761 = vst [vmem:[#allocation2 + $0x3] sm:$0x1] %v3760_v24 }
 0x3a3   : > { %v3895_v60 = vld [vmem:[#allocation2 + $0x2] sm:$0x1] }
 0x3a4   : > { %v3896_v8 = vmul.f32 0.0033333334, %v3895_v60 }
 0x3a5   : > { %v3897_v20 = vld [vmem:[#allocation2 + $0x3] sm:$0x1] }
 0x3a6   : > { %v3898_v21 = vmul.f32 0.0033333334, %v3897_v20  ;;  %v3899_v47 = vmul.f32 %v3896_v8, %v3896_v8 }
 0x3a8   : > { %v3900_v58 = vsub.f32 %v3898_v21, %v3899_v47 }
 0x3aa   : > { %v3901_v49 = vmax.f32 %v3900_v58, 0.0 }
 0x3ac   : > { %v3902_v59 = vadd.f32 1e-05, %v3901_v49 }
 0x3ae   : > { %6648 = vrsqrt.f32 %v3902_v59  ;;  %vm3909_vm8 = vweird.f32 %v3902_v59 }
 0x3b4   : > { %v6649_v44 = vpop.eup %6648 }
 0x3b5   : > { %v3904_v12 = vmul.f32 %v6649_v44, %v3902_v59  ;;  %vm3910_vm7 = vweird.f32 %v6649_v44 }
 0x3b6   : > { %vm3911_vm9 = vmor %vm3909_vm8, %vm3910_vm7 }
 0x3b7   : > { %v3905_v15 = vmul.f32 %v6649_v44, %v3904_v12 }
 0x3b9   : > { %v3906_v55 = vmul.f32 0.5, %v3905_v15 }
 0x3bb   : > { %v3907_v19 = vsub.f32 1.5, %v3906_v55 }
 0x3bd   : > { %v3908_v1 = vmul.f32 %v6649_v44, %v3907_v19 }
 0x3bf   : > { %v3912_v57 = vsel %vm3911_vm9, %v6649_v44, %v3908_v1 }
 0x3c0   : > { %v3913_v4 = vmul.f32 %v3912_v57, %v3893_v52 }
 0x3c2   : > { %3914 = vst [vmem:[#allocation3 + $0x2] sm:$0x1] %v3913_v4  ;;  %v3915_v27 = vmul.f32 %v3913_v4, %v3896_v8 }
 0x3c4   : > { %v3916_v45 = vsub.f32 %v3894_v16, %v3915_v27 }
 0x3c6   : > { %3917 = vst [vmem:[#allocation3 + $0x3] sm:$0x1] %v3916_v45 }
 0x3c7 PF: > { %p5669_p7 = scmp.ne.s32.totalorder %s6669_s21, 2 }
 0x3c8   : > { %s8769_s26 = sld [smem:[#allocation9_spill]] (!%p5669_p7) }
 0x3c9   : > { %3921 = sbr.rel (%p5669_p7) target bundleno = 1638 (0x666), region = 108 }
 0x3ce   : > { %v4200_v9 = vld [vmem:[%s8760_s15 + $0x78] sm:$0xff]  ;;  %v4199_v56 = vld [vmem:[%s8760_s15 + $0x70] sm:$0xff]  ;;  %v4198_v53 = vld [vmem:[%s8760_s15 + $0x68] sm:$0xff] }
 0x3cf   : > { %4201 = vmatpush.msra.mxu0 %v4200_v9  ;;  %6566 = vmatpush.msra.mxu1 %v4200_v9  ;;  %v4197_v50 = vld [vmem:[%s8760_s15 + $0x60] sm:$0xff]  ;;  %v4196_v48 = vld [vmem:[%s8760_s15 + $0x58] sm:$0xff]  ;;  %v4195_v26 = vld [vmem:[%s8760_s15 + $0x50] sm:$0xff] }
 0x3d0   : > { %6567 = vmatpush.msra.mxu2 %v4200_v9  ;;  %6568 = vmatpush.msra.mxu3 %v4200_v9  ;;  %v4194_v38 = vld [vmem:[%s8760_s15 + $0x48] sm:$0xff]  ;;  %v4193_v61 = vld [vmem:[%s8760_s15 + $0x40] sm:$0xff]  ;;  %v4192_v31 = vld [vmem:[%s8760_s15 + $0x38] sm:$0xff] }
 0x3d1   : > { %4202 = vmatpush.msra.mxu0 %v4199_v56  ;;  %6569 = vmatpush.msra.mxu1 %v4199_v56  ;;  %v4191_v40 = vld [vmem:[%s8760_s15 + $0x30] sm:$0xff]  ;;  %v6274_v35 = vld [vmem:[#allocation5 + $0xb0] sm:$0xff]   ;;  %v4190_v54 = vld [vmem:[%s8760_s15 + $0x28] sm:$0xff] }
 0x3d2   : > { %6570 = vmatpush.msra.mxu2 %v4199_v56  ;;  %6571 = vmatpush.msra.mxu3 %v4199_v56  ;;  %v6503_v36 = vld [vmem:[#allocation5 + $0xe8] sm:$0xff]   ;;  %v6509_v33 = vld [vmem:[#allocation5 + $0x38] sm:$0xff]   ;;  %v6275_v0 = vunpack.c.l.bf16 %v6274_v35  ;;  %v4188_v46 = vld [vmem:[%s8760_s15 + $0x18] sm:$0xff]  ;;  %v6276_v34 = vunpack.c.h.bf16 %v6274_v35 }
 0x3d3   : > { %4203 = vmatpush.msra.mxu0 %v4198_v53  ;;  %6572 = vmatpush.msra.mxu1 %v4198_v53  ;;  %v4189_v23 = vld [vmem:[%s8760_s15 + $0x20] sm:$0xff]  ;;  %v6517_v32 = vld [vmem:[#allocation5 + $0xa8] sm:$0xff]   ;;  %v6315_v37 = vunpack.c.l.bf16 %v6503_v36  ;;  %v6339_v63 = vunpack.c.l.bf16 %v6509_v33  ;;  %v4186_v42 = vld [vmem:[%s8760_s15 + $0x8] sm:$0xff]  ;;  %v6316_v25 = vunpack.c.h.bf16 %v6503_v36  ;;  %v6340_v41 = vunpack.c.h.bf16 %v6509_v33 }
 0x3d4   : > { %6573 = vmatpush.msra.mxu2 %v4198_v53  ;;  %6574 = vmatpush.msra.mxu3 %v4198_v53  ;;  %v8144_v6 = vld [vmem:[#allocation3 + $0x2] ss:$0 sm:$0xff]  ;;  %v6371_v7 = vunpack.c.l.bf16 %v6517_v32  ;;  %v4187_v51 = vld [vmem:[%s8760_s15 + $0x10] sm:$0xff]  ;;  %v8153_v30 = vld [vmem:[#allocation3 + $0x3] ss:$0 sm:$0xff]  ;;  %v6372_v13 = vunpack.c.h.bf16 %v6517_v32 }
 0x3d5   : > { %4204 = vmatpush.msra.mxu0 %v4197_v50  ;;  %6575 = vmatpush.msra.mxu1 %v4197_v50  ;;  %v4055_v5 = vmul.f32 %v8144_v6, %v6275_v0  ;;  %v4075_v17 = vmul.f32 %v8144_v6, %v6315_v37  ;;  %v4087_v22 = vmul.f32 %v8144_v6, %v6339_v63  ;;  %v4185_v62 = vld [vmem:[%s8760_s15] sm:$0xff]  ;;  %v6494_v29 = vld [vmem:[#allocation5] sm:$0xff]   ;;  %v6518_v47 = vld [vmem:[#allocation5 + $0xd0] sm:$0xff]  }
 0x3d6   : > { %6576 = vmatpush.msra.mxu2 %v4197_v50  ;;  %6577 = vmatpush.msra.mxu3 %v4197_v50  ;;  %v4103_v18 = vmul.f32 %v8144_v6, %v6371_v7  ;;  %v4056_v39 = vmul.f32 %v8144_v6, %v6276_v34  ;;  %v4076_v43 = vmul.f32 %v8144_v6, %v6316_v25  ;;  %v6504_v10 = vld [vmem:[#allocation5 + $0xb8] sm:$0xff]   ;;  %v6279_v21 = vunpack.c.l.bf16 %v6494_v29  ;;  %v6519_v36 = vld [vmem:[#allocation5 + $0x10] sm:$0xff]  }
 0x3d7   : > { %4205 = vmatpush.msra.mxu0 %v4196_v48  ;;  %6578 = vmatpush.msra.mxu1 %v4196_v48  ;;  %v4121_v11 = vadd.f32 %v8153_v30, %v4055_v5  ;;  %v4141_v28 = vadd.f32 %v8153_v30, %v4075_v17  ;;  %v4153_v14 = vadd.f32 %v8153_v30, %v4087_v22  ;;  %v6510_v60 = vld [vmem:[#allocation5 + $0x58] sm:$0xff]   ;;  %v6319_v59 = vunpack.c.l.bf16 %v6504_v10 }
 0x3d8   : > { %6579 = vmatpush.msra.mxu2 %v4196_v48  ;;  %6580 = vmatpush.msra.mxu3 %v4196_v48  ;;  %v4169_v3 = vadd.f32 %v8153_v30, %v4103_v18  ;;  %v4088_v24 = vmul.f32 %v8144_v6, %v6340_v41  ;;  %v4104_v8 = vmul.f32 %v8144_v6, %v6372_v13  ;;  %v6343_v44 = vunpack.c.l.bf16 %v6510_v60  ;;  %v6506_v13 = vld [vmem:[#allocation5 + $0xf0] sm:$0xff]  }
 0x3d9   : > { %4206 = vmatpush.msra.mxu0 %v4195_v26  ;;  %6581 = vmatpush.msra.mxu1 %v4195_v26  ;;  %v4122_v20 = vadd.f32 %v8153_v30, %v4056_v39  ;;  %v4142_v58 = vadd.f32 %v8153_v30, %v4076_v43  ;;  %v6375_v15 = vunpack.c.l.bf16 %v6518_v47  ;;  %v4057_v55 = vmul.f32 %v8144_v6, %v6279_v21  ;;  %v6512_v39 = vld [vmem:[#allocation5 + $0xc8] sm:$0xff]  }
 0x3da   : > { %6582 = vmatpush.msra.mxu2 %v4195_v26  ;;  %6583 = vmatpush.msra.mxu3 %v4195_v26  ;;  %v4154_v49 = vadd.f32 %v8153_v30, %v4088_v24  ;;  %v4170_v12 = vadd.f32 %v8153_v30, %v4104_v8  ;;  %v4077_v19 = vmul.f32 %v8144_v6, %v6319_v59  ;;  %v6280_v4 = vunpack.c.h.bf16 %v6494_v29 }
 0x3db   : > { %4207 = vmatpush.msra.mxu0 %v4194_v38  ;;  %6584 = vmatpush.msra.mxu1 %v4194_v38  ;;  %v4089_v52 = vmul.f32 %v8144_v6, %v6343_v44  ;;  %v4105_v1 = vmul.f32 %v8144_v6, %v6375_v15  ;;  %v4123_v57 = vadd.f32 %v8153_v30, %v4057_v55  ;;  %v6320_v45 = vunpack.c.h.bf16 %v6504_v10  ;;  %v6520_v10 = vld [vmem:[#allocation5 + $0x28] sm:$0xff]  }
 0x3dc   : > { %6585 = vmatpush.msra.mxu2 %v4194_v38  ;;  %6586 = vmatpush.msra.mxu3 %v4194_v38  ;;  %v4143_v16 = vadd.f32 %v8153_v30, %v4077_v19  ;;  %v6344_v9 = vunpack.c.h.bf16 %v6510_v60  ;;  %v6376_v53 = vunpack.c.h.bf16 %v6518_v47  ;;  %v4058_v50 = vmul.f32 %v8144_v6, %v6280_v4  ;;  %v6495_v38 = vld [vmem:[#allocation5 + $0xd8] sm:$0xff]  }
 0x3dd   : > { %4208 = vmatpush.msra.mxu0 %v4193_v61  ;;  %6587 = vmatpush.msra.mxu1 %v4193_v61  ;;  %v4155_v27 = vadd.f32 %v8153_v30, %v4089_v52  ;;  %v4171_v56 = vadd.f32 %v8153_v30, %v4105_v1  ;;  %v4078_v48 = vmul.f32 %v8144_v6, %v6320_v45  ;;  %v6379_v63 = vunpack.c.l.bf16 %v6519_v36 }
 0x3de   : > { %6588 = vmatpush.msra.mxu2 %v4193_v61  ;;  %6589 = vmatpush.msra.mxu3 %v4193_v61  ;;  %v4090_v26 = vmul.f32 %v8144_v6, %v6344_v9  ;;  %v6505_v61 = vld [vmem:[#allocation5 + $0x60] sm:$0xff]   ;;  %v4124_v35 = vadd.f32 %v8153_v30, %v4058_v50  ;;  %v6284_v22 = vunpack.c.h.bf16 %v6495_v38  ;;  %v6351_v21 = vunpack.c.l.bf16 %v6512_v39 }
 0x3df   : > { %4209 = vmatpush.msra.mxu0 %v4192_v31  ;;  %6590 = vmatpush.msra.mxu1 %v4192_v31  ;;  %v4144_v33 = vadd.f32 %v8153_v30, %v4078_v48  ;;  %v6323_v0 = vunpack.c.l.bf16 %v6505_v61  ;;  %v4107_v5 = vmul.f32 %v8144_v6, %v6379_v63  ;;  %v6328_v1 = vunpack.c.h.bf16 %v6506_v13  ;;  %v6513_v50 = vld [vmem:[#allocation5 + $0xe0] sm:$0xff]  }
 0x3e0   : > { %6591 = vmatpush.msra.mxu2 %v4192_v31  ;;  %6592 = vmatpush.msra.mxu3 %v4192_v31  ;;  %v6511_v31 = vld [vmem:[#allocation5 + $0x40] sm:$0xff]   ;;  %v4093_v44 = vmul.f32 %v8144_v6, %v6351_v21 }
 0x3e1   : > { %4210 = vmatpush.msra.mxu0 %v4191_v40  ;;  %6593 = vmatpush.msra.mxu1 %v4191_v40  ;;  %v6347_v32 = vunpack.c.l.bf16 %v6511_v31  ;;  %v4079_v7 = vmul.f32 %v8144_v6, %v6323_v0  ;;  %v4173_v34 = vadd.f32 %v8153_v30, %v4107_v5  ;;  %v4082_v45 = vmul.f32 %v8144_v6, %v6328_v1 }
 0x3e2   : > { %6594 = vmatpush.msra.mxu2 %v4191_v40  ;;  %6595 = vmatpush.msra.mxu3 %v4191_v40  ;;  %v4106_v40 = vmul.f32 %v8144_v6, %v6376_v53  ;;  %v4159_v52 = vadd.f32 %v8153_v30, %v4093_v44  ;;  %v6507_v53 = vld [vmem:[#allocation5 + $0x8] sm:$0xff]   ;;  %v6356_v5 = vunpack.c.h.bf16 %v6513_v50 }
 0x3e3   : > { %4211 = vmatpush.msra.mxu0 %v4190_v54  ;;  %6596 = vmatpush.msra.mxu1 %v4190_v54 }
 0x3e4   : > { %6597 = vmatpush.msra.mxu2 %v4190_v54  ;;  %6598 = vmatpush.msra.mxu3 %v4190_v54  ;;  %v6283_v54 = vunpack.c.l.bf16 %v6495_v38  ;;  %v4172_v37 = vadd.f32 %v8153_v30, %v4106_v40 }
 0x3e5   : > { %4212 = vmatpush.msra.mxu0 %v4189_v23  ;;  %6599 = vmatpush.msra.mxu1 %v4189_v23 }
 0x3e6   : > { %6600 = vmatpush.msra.mxu2 %v4189_v23  ;;  %6601 = vmatpush.msra.mxu3 %v4189_v23  ;;  %v4156_v23 = vadd.f32 %v8153_v30, %v4090_v26 }
 0x3e7   : > { %4213 = vmatpush.msra.mxu0 %v4188_v46  ;;  %6602 = vmatpush.msra.mxu1 %v4188_v46 }
 0x3e8   : > { %6603 = vmatpush.msra.mxu2 %v4188_v46  ;;  %6604 = vmatpush.msra.mxu3 %v4188_v46  ;;  %v4059_v46 = vmul.f32 %v8144_v6, %v6283_v54  ;;  %v6355_v54 = vunpack.c.l.bf16 %v6513_v50 }
 0x3e9   : > { %4214 = vmatpush.msra.mxu0 %v4187_v51  ;;  %6605 = vmatpush.msra.mxu1 %v4187_v51 }
 0x3ea   : > { %6606 = vmatpush.msra.mxu2 %v4187_v51  ;;  %6607 = vmatpush.msra.mxu3 %v4187_v51  ;;  %v4091_v51 = vmul.f32 %v8144_v6, %v6347_v32  ;;  %v4125_v17 = vadd.f32 %v8153_v30, %v4059_v46  ;;  %v4095_v32 = vmul.f32 %v8144_v6, %v6355_v54 }
 0x3eb   : > { %4215 = vmatpush.msra.mxu0 %v4186_v42  ;;  %6608 = vmatpush.msra.mxu1 %v4186_v42 }
 0x3ec   : > { %6609 = vmatpush.msra.mxu2 %v4186_v42  ;;  %6610 = vmatpush.msra.mxu3 %v4186_v42  ;;  %v4145_v42 = vadd.f32 %v8153_v30, %v4079_v7  ;;  %v4157_v18 = vadd.f32 %v8153_v30, %v4091_v51  ;;  %v4161_v51 = vadd.f32 %v8153_v30, %v4095_v32 }
 0x3ed   : > { %4216 = vmatpush.msra.mxu0 %v4185_v62  ;;  %6611 = vmatpush.msra.mxu1 %v4185_v62 }
 0x3ee   : > { %6612 = vmatpush.msra.mxu2 %v4185_v62  ;;  %4217 = vmatmul.f32.vlgmr.msra.gmra.mxu0 %v4121_v11  ;;  %v6348_v11 = vunpack.c.h.bf16 %v6511_v31  ;;  %v4148_v31 = vadd.f32 %v8153_v30, %v4082_v45 }
 0x3ef   : > { %4277 = vmatmul.f32.vlgmr.msra.gmra.mxu1 %v4141_v28  ;;  %4313 = vmatmul.f32.vlgmr.msra.gmra.mxu2 %v4153_v14  ;;  %v6380_v28 = vunpack.c.h.bf16 %v6519_v36  ;;  %v4060_v14 = vmul.f32 %v8144_v6, %v6284_v22 }
 0x3f0   : > { %6613 = vmatpush.msra.mxu3 %v4185_v62  ;;  %v6324_v62 = vunpack.c.h.bf16 %v6505_v61  ;;  %v4092_v41 = vmul.f32 %v8144_v6, %v6348_v11  ;;  %v6521_v61 = vld [vmem:[#allocation5 + $0xa0] sm:$0xff]   ;;  %v6498_v11 = vld [vmem:[#allocation5 + $0x68] sm:$0xff]  }
 0x3f1   : > { %4361 = vmatmul.f32.vlgmr.msra.gmra.mxu3 %v4169_v3  ;;  %v6496_v3 = vld [vmem:[#allocation5 + $0x18] sm:$0xff]   ;;  %v4108_v43 = vmul.f32 %v8144_v6, %v6380_v28  ;;  %v4126_v24 = vadd.f32 %v8153_v30, %v4060_v14  ;;  %v6514_v28 = vld [vmem:[#allocation5 + $0x90] sm:$0xff]  }
 0x3f2   : > { %v4080_v25 = vmul.f32 %v8144_v6, %v6324_v62  ;;  %v6287_v29 = vunpack.c.l.bf16 %v6496_v3  ;;  %v4158_v8 = vadd.f32 %v8153_v30, %v4092_v41  ;;  %v6288_v55 = vunpack.c.h.bf16 %v6496_v3  ;;  %v6508_v14 = vld [vmem:[#allocation5 + $0x78] sm:$0xff]  }
 0x3f3   : > { %v4174_v47 = vadd.f32 %v8153_v30, %v4108_v43  ;;  %v4096_v62 = vmul.f32 %v8144_v6, %v6356_v5  ;;  %v6295_v3 = vunpack.c.l.bf16 %v6498_v11  ;;  %v6359_v43 = vunpack.c.l.bf16 %v6514_v28 }
 0x3f4   : > { %v4146_v60 = vadd.f32 %v8153_v30, %v4080_v25  ;;  %v6360_v44 = vunpack.c.h.bf16 %v6514_v28 }
 0x3f6   : > { %4220 = vmatmul.f32.gmra.mxu0 %v4122_v20  ;;  %v6327_v20 = vunpack.c.l.bf16 %v6506_v13  ;;  %v6522_v13 = vld [vmem:[#allocation5 + $0xf8] sm:$0xff]   ;;  %v4098_v1 = vmul.f32 %v8144_v6, %v6360_v44 }
 0x3f7   : > { %4280 = vmatmul.f32.gmra.mxu1 %v4142_v58  ;;  %4316 = vmatmul.f32.gmra.mxu2 %v4154_v49  ;;  %v6383_v58 = vunpack.c.l.bf16 %v6520_v10  ;;  %v4061_v49 = vmul.f32 %v8144_v6, %v6287_v29  ;;  %v6335_v29 = vunpack.c.l.bf16 %v6508_v14 }
 0x3f8   : > { %v4081_v59 = vmul.f32 %v8144_v6, %v6327_v20  ;;  %v4097_v20 = vmul.f32 %v8144_v6, %v6359_v43 }
 0x3f9   : > { %4364 = vmatmul.f32.gmra.mxu3 %v4170_v12  ;;  %v4109_v12 = vmul.f32 %v8144_v6, %v6383_v58  ;;  %v4127_v15 = vadd.f32 %v8153_v30, %v4061_v49  ;;  %v4085_v21 = vmul.f32 %v8144_v6, %v6335_v29  ;;  %v6296_v49 = vunpack.c.h.bf16 %v6498_v11 }
 0x3fa   : > { %v4147_v19 = vadd.f32 %v8153_v30, %v4081_v59  ;;  %v4163_v59 = vadd.f32 %v8153_v30, %v4097_v20  ;;  %v6680_v11 = vmov 0  }
 0x3fb   : > { %v4175_v4 = vadd.f32 %v8153_v30, %v4109_v12  ;;  %v4151_v12 = vadd.f32 %v8153_v30, %v4085_v21  ;;  %6650 = vset.pattern.permute.xlu0 %v6680_v11  ;;  %6652 = vset.pattern.permute.xlu1 %v6680_v11 }
 0x3fc   : > { %6651 = vset.pattern.permute.xlu2 %v6680_v11 }
 0x3fe   : > { %4223 = vmatmul.f32.gmra.mxu0 %v4123_v57  ;;  %v6352_v57 = vunpack.c.h.bf16 %v6512_v39  ;;  %v4162_v39 = vadd.f32 %v8153_v30, %v4096_v62 }
 0x3ff   : > { %4283 = vmatmul.f32.gmra.mxu1 %v4143_v16  ;;  %4319 = vmatmul.f32.gmra.mxu2 %v4155_v27  ;;  %v6384_v16 = vunpack.c.h.bf16 %v6520_v10  ;;  %v4062_v27 = vmul.f32 %v8144_v6, %v6288_v55 }
 0x400   : > { %v4094_v9 = vmul.f32 %v8144_v6, %v6352_v57  ;;  %v6499_v57 = vld [vmem:[#allocation5 + $0x30] sm:$0xff]  }
 0x401   : > { %4367 = vmatmul.f32.gmra.mxu3 %v4171_v56  ;;  %v6497_v56 = vld [vmem:[#allocation5 + $0x50] sm:$0xff]   ;;  %v4110_v48 = vmul.f32 %v8144_v6, %v6384_v16  ;;  %v4128_v26 = vadd.f32 %v8153_v30, %v4062_v27  ;;  %v6300_v54 = vunpack.c.h.bf16 %v6499_v57 }
 0x402   : > { %v6291_v38 = vunpack.c.l.bf16 %v6497_v56  ;;  %v4160_v40 = vadd.f32 %v8153_v30, %v4094_v9  ;;  %v6292_v46 = vunpack.c.h.bf16 %v6497_v56  ;;  %v6515_v16 = vld [vmem:[#allocation5 + $0x70] sm:$0xff]   ;;  %v6299_v9 = vunpack.c.l.bf16 %v6499_v57  ;;  %v6523_v56 = vld [vmem:[#allocation5 + $0x20] sm:$0xff]  }
 0x403   : > { %v4176_v36 = vadd.f32 %v8153_v30, %v4110_v48  ;;  %v6363_v50 = vunpack.c.l.bf16 %v6515_v16  ;;  %v4068_v32 = vmul.f32 %v8144_v6, %v6300_v54 }
 0x406   : > { %4226 = vmatmul.f32.gmra.mxu0 %v4124_v35  ;;  %v6331_v35 = vunpack.c.l.bf16 %v6507_v53 }
 0x407   : > { %4286 = vmatmul.f32.gmra.mxu1 %v4144_v33  ;;  %4322 = vmatmul.f32.gmra.mxu2 %v4156_v23  ;;  %v6387_v33 = vunpack.c.l.bf16 %v6521_v61  ;;  %v4063_v23 = vmul.f32 %v8144_v6, %v6291_v38  ;;  %v6395_v38 = vunpack.c.l.bf16 %v6523_v56 }
 0x408   : > { %v4083_v0 = vmul.f32 %v8144_v6, %v6331_v35 }
 0x409   : > { %4370 = vmatmul.f32.gmra.mxu3 %v4172_v37  ;;  %v4111_v37 = vmul.f32 %v8144_v6, %v6387_v33  ;;  %v4129_v63 = vadd.f32 %v8153_v30, %v4063_v23  ;;  %v6364_v33 = vunpack.c.h.bf16 %v6515_v16 }
 0x40a   : > { %v4149_v7 = vadd.f32 %v8153_v30, %v4083_v0  ;;  %v6396_v0 = vunpack.c.h.bf16 %v6523_v56 }
 0x40b   : > { %v4177_v22 = vadd.f32 %v8153_v30, %v4111_v37  ;;  %v4100_v37 = vmul.f32 %v8144_v6, %v6364_v33 }
 0x40e   : > { %4229 = vmatmul.f32.gmra.mxu0 %v4125_v17  ;;  %v6332_v17 = vunpack.c.h.bf16 %v6507_v53  ;;  %v4164_v53 = vadd.f32 %v8153_v30, %v4098_v1 }
 0x40f   : > { %4289 = vmatmul.f32.gmra.mxu1 %v4145_v42  ;;  %4325 = vmatmul.f32.gmra.mxu2 %v4157_v18  ;;  %v6388_v42 = vunpack.c.h.bf16 %v6521_v61  ;;  %v4064_v18 = vmul.f32 %v8144_v6, %v6292_v46  ;;  %v4067_v61 = vmul.f32 %v8144_v6, %v6299_v9  ;;  %v6516_v46 = vld [vmem:[#allocation5 + $0xc0] sm:$0xff]   ;;  %v6502_v9 = vld [vmem:[#allocation5 + $0x88] sm:$0xff]  }
 0x410   : > { %v6311_v56 = vunpack.c.l.bf16 %v6502_v9 }
 0x411   : > { %4373 = vmatmul.f32.gmra.mxu3 %v4173_v34  ;;  %v4084_v34 = vmul.f32 %v8144_v6, %v6332_v17  ;;  %v4112_v25 = vmul.f32 %v8144_v6, %v6388_v42  ;;  %v4130_v41 = vadd.f32 %v8153_v30, %v4064_v18  ;;  %v4133_v35 = vadd.f32 %v8153_v30, %v4067_v61  ;;  %v6524_v17 = vld [vmem:[#allocation5 + $0x98] sm:$0xff]  }
 0x412   : > { %v6367_v42 = vunpack.c.l.bf16 %v6516_v46  ;;  %v6399_v62 = vunpack.c.l.bf16 %v6524_v17 }
 0x413   : > { %v4178_v10 = vadd.f32 %v8153_v30, %v4112_v25 }
 0x414   : > { %v4101_v28 = vmul.f32 %v8144_v6, %v6367_v42 }
 0x416   : > { %4232 = vmatmul.f32.gmra.mxu0 %v4126_v24  ;;  %v4150_v24 = vadd.f32 %v8153_v30, %v4084_v34 }
 0x417   : > { %4292 = vmatmul.f32.gmra.mxu1 %v4146_v60  ;;  %4328 = vmatmul.f32.gmra.mxu2 %v4158_v8  ;;  %v6391_v60 = vunpack.c.l.bf16 %v6522_v13  ;;  %v4065_v8 = vmul.f32 %v8144_v6, %v6295_v3  ;;  %v4167_v3 = vadd.f32 %v8153_v30, %v4101_v28 }
 0x419   : > { %4376 = vmatmul.f32.gmra.mxu3 %v4174_v47  ;;  %v4113_v47 = vmul.f32 %v8144_v6, %v6391_v60  ;;  %v4131_v58 = vadd.f32 %v8153_v30, %v4065_v8 }
 0x41b   : > { %v4179_v55 = vadd.f32 %v8153_v30, %v4113_v47 }
 0x41e   : > { %4235 = vmatmul.f32.gmra.mxu0 %v4127_v15  ;;  %v6336_v15 = vunpack.c.h.bf16 %v6508_v14  ;;  %v4117_v14 = vmul.f32 %v8144_v6, %v6399_v62 }
 0x41f   : > { %4295 = vmatmul.f32.gmra.mxu1 %v4147_v19  ;;  %4331 = vmatmul.f32.gmra.mxu2 %v4159_v52  ;;  %v6392_v19 = vunpack.c.h.bf16 %v6522_v13  ;;  %v4066_v52 = vmul.f32 %v8144_v6, %v6296_v49 }
 0x420   : > { %v4183_v13 = vadd.f32 %v8153_v30, %v4117_v14 }
 0x421   : > { %4379 = vmatmul.f32.gmra.mxu3 %v4175_v4  ;;  %v4086_v4 = vmul.f32 %v8144_v6, %v6336_v15  ;;  %v4114_v27 = vmul.f32 %v8144_v6, %v6392_v19  ;;  %v4132_v45 = vadd.f32 %v8153_v30, %v4066_v52  ;;  %v6400_v52 = vunpack.c.h.bf16 %v6524_v17 }
 0x423   : > { %v4152_v48 = vadd.f32 %v8153_v30, %v4086_v4  ;;  %v4118_v4 = vmul.f32 %v8144_v6, %v6400_v52 }
 0x426   : > { %4238 = vmatmul.f32.gmra.mxu0 %v4128_v26  ;;  %v4180_v26 = vadd.f32 %v8153_v30, %v4114_v27 }
 0x427   : > { %4298 = vmatmul.f32.gmra.mxu1 %v4148_v31  ;;  %4334 = vmatmul.f32.gmra.mxu2 %v4160_v40  ;;  %v4099_v31 = vmul.f32 %v8144_v6, %v6363_v50  ;;  %v4115_v40 = vmul.f32 %v8144_v6, %v6395_v38 }
 0x429   : > { %4382 = vmatmul.f32.gmra.mxu3 %v4176_v36  ;;  %v4165_v36 = vadd.f32 %v8153_v30, %v4099_v31  ;;  %v4181_v23 = vadd.f32 %v8153_v30, %v4115_v40 }
 0x42e   : > { %4241 = vmatmul.f32.gmra.mxu0 %v4129_v63  ;;  %v6500_v63 = vld [vmem:[#allocation5 + $0x48] sm:$0xff]  }
 0x42f   : > { %4301 = vmatmul.f32.gmra.mxu1 %v4149_v7  ;;  %4337 = vmatmul.f32.gmra.mxu2 %v4161_v51  ;;  %v4116_v7 = vmul.f32 %v8144_v6, %v6396_v0  ;;  %v4134_v51 = vadd.f32 %v8153_v30, %v4068_v32  ;;  %v6303_v5 = vunpack.c.l.bf16 %v6500_v63 }
 0x431   : > { %4385 = vmatmul.f32.gmra.mxu3 %v4177_v22  ;;  %v4166_v22 = vadd.f32 %v8153_v30, %v4100_v37  ;;  %v4182_v18 = vadd.f32 %v8153_v30, %v4116_v7  ;;  %v4069_v34 = vmul.f32 %v8144_v6, %v6303_v5 }
 0x433   : > { %v4135_v25 = vadd.f32 %v8153_v30, %v4069_v34 }
 0x436   : > { %4244 = vmatmul.f32.gmra.mxu0 %v4130_v41  ;;  %v6304_v41 = vunpack.c.h.bf16 %v6500_v63 }
 0x437   : > { %4340 = vmatmul.f32.gmra.mxu2 %v4162_v39  ;;  %4304 = vmatmul.f32.gmra.mxu1 %v4150_v24  ;;  %v6501_v24 = vld [vmem:[#allocation5 + $0x80] sm:$0xff]  }
 0x438   : > { %v4070_v39 = vmul.f32 %v8144_v6, %v6304_v41  ;;  %v6307_v29 = vunpack.c.l.bf16 %v6501_v24  ;;  %v6308_v21 = vunpack.c.h.bf16 %v6501_v24 }
 0x439   : > { %4388 = vmatmul.f32.gmra.mxu3 %v4178_v10 }
 0x43a   : > { %v4136_v43 = vadd.f32 %v8153_v30, %v4070_v39  ;;  %v4071_v10 = vmul.f32 %v8144_v6, %v6307_v29  ;;  %v4072_v47 = vmul.f32 %v8144_v6, %v6308_v21 }
 0x43c   : > { %v4137_v8 = vadd.f32 %v8153_v30, %v4071_v10  ;;  %v4138_v44 = vadd.f32 %v8153_v30, %v4072_v47 }
 0x43e   : > { %4247 = vmatmul.f32.gmra.mxu0 %v4131_v58  ;;  %v6368_v58 = vunpack.c.h.bf16 %v6516_v46 }
 0x43f   : > { %4343 = vmatmul.f32.gmra.mxu2 %v4163_v59  ;;  %4307 = vmatmul.f32.gmra.mxu1 %v4151_v12 }
 0x440   : > { %v4102_v12 = vmul.f32 %v8144_v6, %v6368_v58 }
 0x441   : > { %4391 = vmatmul.f32.gmra.mxu3 %v4179_v55 }
 0x442   : > { %v4168_v19 = vadd.f32 %v8153_v30, %v4102_v12 }
 0x446   : > { %4250 = vmatmul.f32.gmra.mxu0 %v4132_v45  ;;  %v4184_v45 = vadd.f32 %v8153_v30, %v4118_v4 }
 0x447   : > { %4346 = vmatmul.f32.gmra.mxu2 %v4164_v53  ;;  %4310 = vmatmul.f32.gmra.mxu1 %v4152_v48  ;;  %v4073_v53 = vmul.f32 %v8144_v6, %v6311_v56 }
 0x449   : > { %4394 = vmatmul.f32.gmra.mxu3 %v4180_v26  ;;  %v4139_v26 = vadd.f32 %v8153_v30, %v4073_v53 }
 0x44e   : > { %4253 = vmatmul.f32.gmra.mxu0 %v4133_v35 }
 0x44f   : > { %4349 = vmatmul.f32.gmra.mxu2 %v4165_v36  ;;  %v6312_v36 = vunpack.c.h.bf16 %v6502_v9 }
 0x451   : > { %4397 = vmatmul.f32.gmra.mxu3 %v4181_v23  ;;  %v4074_v33 = vmul.f32 %v8144_v6, %v6312_v36 }
 0x453   : > { %v4140_v32 = vadd.f32 %v8153_v30, %v4074_v33 }
 0x456   : > { %4256 = vmatmul.f32.gmra.mxu0 %v4134_v51 }
 0x457   : > { %4352 = vmatmul.f32.gmra.mxu2 %v4166_v22 }
 0x459   : > { %4400 = vmatmul.f32.gmra.mxu3 %v4182_v18 }
 0x45e   : > { %4259 = vmatmul.f32.gmra.mxu0 %v4135_v25 }
 0x45f   : > { %4355 = vmatmul.f32.gmra.mxu2 %v4167_v3 }
 0x461   : > { %4403 = vmatmul.f32.gmra.mxu3 %v4183_v13 }
 0x466   : > { %4262 = vmatmul.f32.gmra.mxu0 %v4136_v43 }
 0x467   : > { %4358 = vmatmul.f32.gmra.mxu2 %v4168_v19 }
 0x469   : > { %4406 = vmatmul.f32.gmra.mxu3 %v4184_v45 }
 0x46b   : > { %v4218_v60 = vpop.f32.mrf.mxu0 }
 0x46c   : > { %v4278_v20 = vpop.f32.mrf.mxu1  ;;  %4476 = vperm.xlu0 %6650, %v4218_v60  }
 0x46d   : > { %4576 = vperm.xlu2 %6651, %v4278_v20  }
 0x46e   : > { %4265 = vmatmul.f32.gmra.mxu0 %v4137_v8 }
 0x472   : > { %v8279_v49 = vpop.f32.mrf.mxu2 }
 0x473   : > { %v4221_v59 = vpop.f32.mrf.mxu0 }
 0x474   : > { %v4281_v15 = vpop.f32.mrf.mxu1  ;;  %v8283_v55 = vpop.f32.mrf.mxu3  ;;  %4481 = vperm.xlu0 %6650, %v4221_v59  }
 0x476   : > { %4268 = vmatmul.f32.gmra.mxu0 %v4138_v44 }
 0x47a   : > { %v8286_v1 = vpop.f32.mrf.mxu2 }
 0x47b   : > { %v4224_v57 = vpop.f32.mrf.mxu0 }
 0x47c   : > { %v4284_v16 = vpop.f32.mrf.mxu1  ;;  %v8289_v27 = vpop.f32.mrf.mxu3  ;;  %4486 = vperm.xlu1 %6652, %v4224_v57   ;;  %4581 = vperm.xlu0 %6650, %v4281_v15  }
 0x47e   : > { %4271 = vmatmul.f32.gmra.mxu0 %v4139_v26 }
 0x482   : > { %v8293_v50 = vpop.f32.mrf.mxu2 }
 0x483   : > { %v4227_v48 = vpop.f32.mrf.mxu0 }
 0x484   : > { %v4287_v38 = vpop.f32.mrf.mxu1  ;;  %v8296_v61 = vpop.f32.mrf.mxu3  ;;  %4586 = vperm.xlu1 %6652, %v4284_v16  }
 0x485   : > { %4591 = vperm.xlu2 %6651, %v4287_v38  }
 0x486   : > { %4274 = vmatmul.f32.gmra.mxu0 %v4140_v32 }
 0x48a   : > { %v8298_v31 = vpop.f32.mrf.mxu2 }
 0x48b   : > { %v4230_v40 = vpop.f32.mrf.mxu0 }
 0x48c   : > { %v4290_v35 = vpop.f32.mrf.mxu1  ;;  %v8300_v54 = vpop.f32.mrf.mxu3  ;;  %4491 = vperm.xlu1 %6652, %v4227_v48  }
 0x48d   : > { %4496 = vperm.xlu2 %6651, %v4230_v40  }
 0x492   : > { %v8303_v23 = vpop.f32.mrf.mxu2 }
 0x493   : > { %v4233_v0 = vpop.f32.mrf.mxu0 }
 0x494   : > { %v4293_v37 = vpop.f32.mrf.mxu1  ;;  %v8306_v63 = vpop.f32.mrf.mxu3 }
 0x495   : > { %4596 = vperm.xlu2 %6651, %v4290_v35  }
 0x49a   : > { %v8308_v46 = vpop.f32.mrf.mxu2 }
 0x49b   : > { %v4236_v7 = vpop.f32.mrf.mxu0 }
 0x49c   : > { %v4296_v51 = vpop.f32.mrf.mxu1  ;;  %v8310_v5 = vpop.f32.mrf.mxu3  ;;  %4506 = vperm.xlu0 %6650, %v4236_v7  }
 0x49d   : > { %4501 = vperm.xlu2 %6651, %v4233_v0  }
 0x4a2   : > { %v8312_v17 = vpop.f32.mrf.mxu2 }
 0x4a3   : > { %v4239_v6 = vpop.f32.mrf.mxu0 }
 0x4a4   : > { %v4299_v22 = vpop.f32.mrf.mxu1  ;;  %4511 = vperm.xlu1 %6652, %v4239_v6   ;;  %v8314_v42 = vpop.f32.mrf.mxu3 }
 0x4a5   : > { %4601 = vperm.xlu2 %6651, %v4293_v37   ;;  %4611 = vperm.xlu0 %6650, %v4299_v22  }
 0x4aa   : > { %v4335_v30 = vpop.f32.mrf.mxu2 }
 0x4ab   : > { %v4242_v18 = vpop.f32.mrf.mxu0 }
 0x4ac   : > { %v4302_v62 = vpop.f32.mrf.mxu1  ;;  %v4383_v11 = vpop.f32.mrf.mxu3 }
 0x4ad   : > { %4616 = vperm.xlu1 %6652, %v4302_v62   ;;  %4606 = vperm.xlu2 %6651, %v4296_v51   ;;  %v4439_v62 = vld [vmem:[%s8748_s3 + $0xe8] sm:$0xff] }
 0x4b2   : > { %v4338_v34 = vpop.f32.mrf.mxu2 }
 0x4b3   : > { %4676 = vperm.xlu0 %6650, %v4338_v34   ;;  %v4245_v28 = vpop.f32.mrf.mxu0 }
 0x4b4   : > { %v4386_v14 = vpop.f32.mrf.mxu3  ;;  %v4305_v25 = vpop.f32.mrf.mxu1 }
 0x4b5   : > { %4516 = vperm.xlu2 %6651, %v4242_v18   ;;  %v4440_v18 = vld [vmem:[%s8748_s3 + $0xf0] sm:$0xff] }
 0x4ba   : > { %v4341_v41 = vpop.f32.mrf.mxu2 }
 0x4bb   : > { %4521 = vperm.xlu0 %6650, %v4245_v28   ;;  %v4248_v3 = vpop.f32.mrf.mxu0 }
 0x4bc   : > { %4526 = vperm.xlu1 %6652, %v4248_v3   ;;  %v4389_v13 = vpop.f32.mrf.mxu3  ;;  %v4308_v39 = vpop.f32.mrf.mxu1  ;;  %v4435_v3 = vld [vmem:[%s8748_s3 + $0xc8] sm:$0xff] }
 0x4bd   : > { %4621 = vperm.xlu2 %6651, %v4305_v25   ;;  %v4436_v25 = vld [vmem:[%s8748_s3 + $0xd0] sm:$0xff] }
 0x4c2   : > { %v4344_v43 = vpop.f32.mrf.mxu2 }
 0x4c3   : > { %4681 = vperm.xlu0 %6650, %v4341_v41   ;;  %v4251_v24 = vpop.f32.mrf.mxu0 }
 0x4c4   : > { %v4392_v29 = vpop.f32.mrf.mxu3  ;;  %v4311_v60 = vpop.f32.mrf.mxu1 }
 0x4c5   : > { %4531 = vperm.xlu2 %6651, %v4251_v24   ;;  %v4434_v24 = vld [vmem:[%s8748_s3 + $0xc0] sm:$0xff] }
 0x4c7   : > { %v8316_v47 = vpop.permute.xlu2 %4576 }
 0x4ca   : > { %v4347_v10 = vpop.f32.mrf.mxu2 }
 0x4cb   : > { %4626 = vperm.xlu0 %6650, %v4308_v39   ;;  %v4254_v8 = vpop.f32.mrf.mxu0 }
 0x4cc   : > { %v4395_v20 = vpop.f32.mrf.mxu3 }
 0x4cd   : > { %4631 = vperm.xlu2 %6651, %v4311_v60   ;;  %v4432_v60 = vld [vmem:[%s8748_s3 + $0xb0] sm:$0xff] }
 0x4d2   : > { %v4350_v21 = vpop.f32.mrf.mxu2 }
 0x4d3   : > { %4686 = vperm.xlu0 %6650, %v4344_v43   ;;  %4696 = vperm.xlu1 %6652, %v4350_v21   ;;  %v4257_v58 = vpop.f32.mrf.mxu0 }
 0x4d4   : > { %v4398_v59 = vpop.f32.mrf.mxu3 }
 0x4da   : > { %v4353_v44 = vpop.f32.mrf.mxu2 }
 0x4db   : > { %4691 = vperm.xlu0 %6650, %v4347_v10   ;;  %4776 = vperm.xlu1 %6652, %v4398_v59   ;;  %v4260_v15 = vpop.f32.mrf.mxu0 }
 0x4dc   : > { %4701 = vperm.xlu2 %6651, %v4353_v44   ;;  %v4401_v19 = vpop.f32.mrf.mxu3  ;;  %v4430_v44 = vld [vmem:[%s8748_s3 + $0xa0] sm:$0xff] }
 0x4de   : > { %v8324_v9 = vpop.permute.xlu0 %4476 }
 0x4df   : > { %v8318_v12 = vpop.permute.xlu2 %4591 }
 0x4e2   : > { %v4356_v57 = vpop.f32.mrf.mxu2 }
 0x4e3   : > { %4536 = vperm.xlu0 %6650, %v4254_v8   ;;  %4541 = vperm.xlu1 %6652, %v4257_v58   ;;  %v4263_v16 = vpop.f32.mrf.mxu0 }
 0x4e4   : > { %4546 = vperm.xlu2 %6651, %v4260_v15   ;;  %v4404_v45 = vpop.f32.mrf.mxu3 }
 0x4e6   : > { %v8332_v48 = vpop.permute.xlu0 %4481 }
 0x4e7   : > { %v8320_v52 = vpop.permute.xlu2 %4496 }
 0x4ea   : > { %v4359_v32 = vpop.f32.mrf.mxu2 }
 0x4eb   : > { %4706 = vperm.xlu0 %6650, %v4356_v57   ;;  %4781 = vperm.xlu1 %6652, %v4401_v19   ;;  %v4266_v26 = vpop.f32.mrf.mxu0 }
 0x4ec   : > { %4671 = vperm.xlu2 %6651, %v4335_v30   ;;  %v4407_v7 = vpop.f32.mrf.mxu3 }
 0x4ee   : > { %v8335_v40 = vpop.permute.xlu0 %4581  ;;  %v8339_v35 = vpop.permute.xlu1 %4486 }
 0x4ef   : > { %v8322_v4 = vpop.permute.xlu2 %4596 }
 0x4f0   : > { %v4818_v10 = vmul.f32 %v8322_v4, %v4434_v24 }
 0x4f3   : > { %4786 = vperm.xlu1 %6652, %v4404_v45   ;;  %4551 = vperm.xlu0 %6650, %v4263_v16   ;;  %v4269_v33 = vpop.f32.mrf.mxu0 }
 0x4f4   : > { %4766 = vperm.xlu2 %6651, %v4392_v29  }
 0x4f6   : > { %v4587_v37 = vpop.permute.xlu1 %4586 }
 0x4f7   : > { %v8326_v56 = vpop.permute.xlu2 %4501  ;;  %v4816_v59 = vmul.f32 %v4587_v37, %v4432_v60  ;;  %v4422_v37 = vld [vmem:[%s8748_s3 + $0x60] sm:$0xff] }
 0x4f8   : > { %v4410_v60 = vld [vmem:[%s8748_s3] sm:$0xff] }
 0x4fb   : > { %4666 = vperm.xlu1 %6652, %v8312_v17   ;;  %4771 = vperm.xlu0 %6650, %v4395_v20   ;;  %v4441_v17 = vld [vmem:[%s8748_s3 + $0xf8] sm:$0xff]  ;;  %v4431_v20 = vld [vmem:[%s8748_s3 + $0xa8] sm:$0xff] }
 0x4fc   : > { %4656 = vperm.xlu2 %6651, %v8303_v23   ;;  %v4815_v15 = vmul.f32 %v8335_v40, %v4431_v20 }
 0x4fe   : > { %v8351_v51 = vpop.permute.xlu1 %4491 }
 0x4ff   : > { %v8330_v53 = vpop.permute.xlu2 %4601 }
 0x500   : > { %v4819_v29 = vmul.f32 %v8330_v53, %v4435_v3  ;;  %v4425_v53 = vld [vmem:[%s8748_s3 + $0x78] sm:$0xff] }
 0x503   : > { %4761 = vperm.xlu1 %6652, %v4389_v13   ;;  %4661 = vperm.xlu0 %6650, %v8308_v46   ;;  %v4272_v46 = vpop.f32.mrf.mxu0 }
 0x504   : > { %4751 = vperm.xlu2 %6651, %v4383_v11  }
 0x507   : > { %v4607_v38 = vpop.permute.xlu2 %4606 }
 0x508   : > { %v4820_v43 = vmul.f32 %v4607_v38, %v4436_v25  ;;  %v4424_v38 = vld [vmem:[%s8748_s3 + $0x70] sm:$0xff] }
 0x50b   : > { %4651 = vperm.xlu1 %6652, %v8298_v31   ;;  %4756 = vperm.xlu0 %6650, %v4386_v14  }
 0x50c   : > { %4641 = vperm.xlu2 %6651, %v8286_v1  }
 0x50e   : > { %v8345_v23 = vpop.permute.xlu0 %4506 }
 0x50f   : > { %v8341_v36 = vpop.permute.xlu2 %4516 }
 0x513   : > { %4746 = vperm.xlu1 %6652, %v8314_v42   ;;  %4646 = vperm.xlu0 %6650, %v8293_v50   ;;  %v4275_v42 = vpop.f32.mrf.mxu0 }
 0x514   : > { %4561 = vperm.xlu2 %6651, %v4269_v33  }
 0x517   : > { %v4622_v0 = vpop.permute.xlu2 %4621  ;;  %v4612_v1 = vpop.permute.xlu0 %4611 }
 0x518   : > { %v4823_v28 = vmul.f32 %v4622_v0, %v4439_v62  ;;  %v4423_v0 = vld [vmem:[%s8748_s3 + $0x68] sm:$0xff] }
 0x51b   : > { %4711 = vperm.xlu1 %6652, %v4359_v32   ;;  %4741 = vperm.xlu0 %6650, %v8310_v5  }
 0x51c   : > { %4736 = vperm.xlu2 %6651, %v8306_v63   ;;  %v8359_v63 = vpop.permute.xlu1 %4511 }
 0x51f   : > { %v8349_v31 = vpop.permute.xlu2 %4531 }
 0x523   : > { %4791 = vperm.xlu1 %6652, %v4407_v7   ;;  %4566 = vperm.xlu0 %6650, %v4272_v46   ;;  %v4421_v46 = vld [vmem:[%s8748_s3 + $0x58] sm:$0xff] }
 0x524   : > { %4721 = vperm.xlu2 %6651, %v8289_v27   ;;  %v4617_v27 = vpop.permute.xlu1 %4616 }
 0x525   : > { %v8354_v50 = vpop.permute.xlu0 %4676 }
 0x527   : > { %v4632_v5 = vpop.permute.xlu2 %4631 }
 0x528   : > { %v4825_v6 = vmul.f32 %v4632_v5, %v4441_v17  ;;  %v4420_v17 = vld [vmem:[%s8748_s3 + $0x50] sm:$0xff] }
 0x52a   : > { %4944 = vmatpush.msrb.mxu2 %v4825_v6  ;;  %v4805_v6 = vmul.f32 %v8349_v31, %v4421_v46  ;;  %v4417_v31 = vld [vmem:[%s8748_s3 + $0x38] sm:$0xff] }
 0x52b   : > { %4556 = vperm.xlu1 %6652, %v4266_v26   ;;  %4731 = vperm.xlu0 %6650, %v8300_v54  }
 0x52d   : > { %v8362_v22 = vpop.permute.xlu0 %4521 }
 0x52e   : > { %v8374_v54 = vpop.permute.xlu1 %4526 }
 0x533   : > { %4716 = vperm.xlu0 %6650, %v8283_v55   ;;  %4571 = vperm.xlu1 %6652, %v4275_v42   ;;  %v4438_v55 = vld [vmem:[%s8748_s3 + $0xe0] sm:$0xff] }
 0x534   : > { %v4822_v14 = vmul.f32 %v4617_v27, %v4438_v55  ;;  %v4419_v27 = vld [vmem:[%s8748_s3 + $0x48] sm:$0xff] }
 0x535   : > { %v8365_v30 = vpop.permute.xlu0 %4681 }
 0x536   : > { %v8417_v4 = vpop.permute.xlu2 %4701 }
 0x53b   : > { %4636 = vperm.xlu1 %6652, %v8279_v49   ;;  %v4437_v49 = vld [vmem:[%s8748_s3 + $0xd8] sm:$0xff] }
 0x53c   : > { %v4821_v41 = vmul.f32 %v4612_v1, %v4437_v49  ;;  %v4801_v49 = vmul.f32 %v8359_v63, %v4417_v31  ;;  %v4413_v63 = vld [vmem:[%s8748_s3 + $0x18] sm:$0xff]  ;;  %v4470_v31 = vld [vmem:[%s8748_s3 + $0x1e0] sm:$0xff] }
 0x53d   : > { %v4627_v11 = vpop.permute.xlu0 %4626 }
 0x53e   : > { %v4824_v34 = vmul.f32 %v4627_v11, %v4440_v18  ;;  %v4547_v26 = vpop.permute.xlu2 %4546  ;;  %v4804_v18 = vmul.f32 %v8374_v54, %v4420_v17  ;;  %v4418_v11 = vld [vmem:[%s8748_s3 + $0x40] sm:$0xff]  ;;  %v4416_v54 = vld [vmem:[%s8748_s3 + $0x30] sm:$0xff] }
 0x53f   : > { %v4808_v32 = vmul.f32 %v4547_v26, %v4424_v38  ;;  %v4802_v55 = vmul.f32 %v8341_v36, %v4418_v11  ;;  %v4414_v36 = vld [vmem:[%s8748_s3 + $0x20] sm:$0xff]  ;;  %v4455_v26 = vld [vmem:[%s8748_s3 + $0x168] sm:$0xff] }
 0x540   : > { %4945 = vmatpush.msrb.mxu2 %v4824_v34  ;;  %v4803_v34 = vmul.f32 %v8362_v22, %v4419_v27  ;;  %v4415_v22 = vld [vmem:[%s8748_s3 + $0x28] sm:$0xff] }
 0x541   : > { %v4471_v27 = vld [vmem:[%s8748_s3 + $0x1e8] sm:$0xff] }
 0x542   : > { %4946 = vmatpush.msrb.mxu2 %v4823_v28 }
 0x543   : > { %4726 = vperm.xlu1 %6652, %v8296_v61   ;;  %v4433_v61 = vld [vmem:[%s8748_s3 + $0xb8] sm:$0xff] }
 0x544   : > { %4947 = vmatpush.msrb.mxu2 %v4822_v14  ;;  %v4817_v8 = vmul.f32 %v8318_v12, %v4433_v61  ;;  %v4814_v12 = vmul.f32 %v8316_v47, %v4430_v44  ;;  %v4800_v14 = vmul.f32 %v8345_v23, %v4416_v54  ;;  %v4412_v23 = vld [vmem:[%s8748_s3 + $0x10] sm:$0xff]  ;;  %v4411_v61 = vld [vmem:[%s8748_s3 + $0x8] sm:$0xff]  ;;  %v6681_v44 = vmov 1.0  }
 0x545   : > { %v8389_v13 = vpop.permute.xlu0 %4686  ;;  %v8391_v39 = vpop.permute.xlu1 %4696 }
 0x546   : > { %4948 = vmatpush.msrb.mxu2 %v4821_v41  ;;  %v8446_v42 = vpop.permute.xlu2 %4671  ;;  %v4799_v41 = vmul.f32 %v8326_v56, %v4415_v22  ;;  %v8492_v56 = vld [vmem:[%s8769_s26] sm:$0xf] }
 0x548   : > { %4949 = vmatpush.msrb.mxu2 %v4820_v43  ;;  %v4798_v43 = vmul.f32 %v8320_v52, %v4414_v36  ;;  %v4796_v52 = vmul.f32 %v8339_v35, %v4412_v23 }
 0x54a   : > { %4950 = vmatpush.msrb.mxu2 %v4819_v29  ;;  %v4797_v29 = vmul.f32 %v8351_v51, %v4413_v63  ;;  %v4794_v51 = vmul.f32 %v8324_v9, %v4410_v60  ;;  %v8770_v9 = vld [vmem:[#allocation6_spill] sm:$0xff] }
 0x54b   : > { %v4447_v63 = vld [vmem:[%s8748_s3 + $0x128] sm:$0xff] }
 0x54c   : > { %4951 = vmatpush.msrb.mxu2 %v4818_v10  ;;  %v8500_v10 = vperm.slane %v8492_v56, 0 }
 0x54d   : > { %v8408_v21 = vpop.permute.xlu0 %4691  ;;  %v8410_v58 = vpop.permute.xlu1 %4776 }
 0x54e   : > { %4952 = vmatpush.msrb.mxu2 %v4817_v8  ;;  %v8472_v25 = vpop.permute.xlu2 %4766  ;;  %v4795_v8 = vmul.f32 %v8332_v48, %v4411_v61  ;;  %vm4863_vm10 = vcmp.eq.s32.totalorder %v6788_v2, %v8500_v10  ;;  %v4457_v48 = vld [vmem:[%s8748_s3 + $0x178] sm:$0xff]  ;;  %vm4867_vm11 = vcmp.eq.s32.totalorder %v8770_v9, %v8500_v10  ;;  %v4854_v22 = vmul.f32 %v8410_v58, %v4470_v31  ;;  %v4467_v58 = vld [vmem:[%s8748_s3 + $0x1c8] sm:$0xff] }
 0x550   : > { %4953 = vmatpush.msrb.mxu2 %v4816_v59 }
 0x552   : > { %4954 = vmatpush.msrb.mxu2 %v4815_v15 }
 0x554   : > { %4955 = vmatpush.msrb.mxu2 %v4814_v12  ;;  %v4456_v12 = vld [vmem:[%s8748_s3 + $0x170] sm:$0xff] }
 0x555   : > { %v4537_v19 = vpop.permute.xlu0 %4536  ;;  %v4542_v57 = vpop.permute.xlu1 %4541 }
 0x556   : > { %v4807_v1 = vmul.f32 %v4542_v57, %v4423_v0  ;;  %v4806_v7 = vmul.f32 %v4537_v19, %v4422_v37  ;;  %v8506_v20 = vpop.permute.xlu2 %4656  ;;  %v4453_v0 = vld [vmem:[%s8748_s3 + $0x158] sm:$0xff] }
 0x55d   : > { %v8419_v16 = vpop.permute.xlu0 %4706  ;;  %v8421_v45 = vpop.permute.xlu1 %4781 }
 0x55e   : > { %v8519_v15 = vpop.permute.xlu2 %4751  ;;  %v4840_v38 = vmul.f32 %v8419_v16, %v4456_v12  ;;  %v8771_v16 = vld [vmem:[#allocation7_spill] sm:$0xff]  ;;  %v4855_v54 = vmul.f32 %v8421_v45, %v4471_v27 }
 0x55f   : > { %vm4871_vm12 = vcmp.eq.s32.totalorder %v8771_v16, %v8500_v10  ;;  %v4468_v45 = vld [vmem:[%s8748_s3 + $0x1d0] sm:$0xff] }
 0x565   : > { %v8429_v47 = vpop.permute.xlu1 %4786  ;;  %v4552_v40 = vpop.permute.xlu0 %4551 }
 0x566   : > { %v4809_v33 = vmul.f32 %v4552_v40, %v4425_v53  ;;  %v4454_v40 = vld [vmem:[%s8748_s3 + $0x160] sm:$0xff]  ;;  %v8553_v17 = vpop.permute.xlu2 %4641 }
 0x567   : > { %v4838_v37 = vmul.f32 %v8391_v39, %v4454_v40  ;;  %v4451_v39 = vld [vmem:[%s8748_s3 + $0x148] sm:$0xff] }
 0x568   : > { %4915 = vmatpush.msrb.mxu1 %v4809_v33  ;;  %v4839_v33 = vmul.f32 %v8417_v4, %v4455_v26  ;;  %v4472_v4 = vld [vmem:[%s8748_s3 + $0x1f0] sm:$0xff]  ;;  %v4427_v26 = vld [vmem:[%s8748_s3 + $0x88] sm:$0xff] }
 0x569   : > { %v4856_v11 = vmul.f32 %v8429_v47, %v4472_v4  ;;  %v4469_v47 = vld [vmem:[%s8748_s3 + $0x1d8] sm:$0xff]  ;;  %v4861_v4 = vperm.slane %v8492_v56, 2 }
 0x56a   : > { %4916 = vmatpush.msrb.mxu1 %v4808_v32  ;;  %v4473_v32 = vld [vmem:[%s8748_s3 + $0x1f8] sm:$0xff] }
 0x56b   : > { %vm4865_vm15 = vcmp.eq.s32.totalorder %v6788_v2, %v4861_v4  ;;  %vm4869_vm1 = vcmp.eq.s32.totalorder %v8770_v9, %v4861_v4  ;;  %vm4873_vm4 = vcmp.eq.s32.totalorder %v8771_v16, %v4861_v4 }
 0x56c   : > { %4917 = vmatpush.msrb.mxu1 %v4807_v1  ;;  %v4452_v1 = vld [vmem:[%s8748_s3 + $0x150] sm:$0xff] }
 0x56d   : > { %v8443_v5 = vpop.permute.xlu1 %4666  ;;  %v8452_v62 = vpop.permute.xlu0 %4771 }
 0x56e   : > { %4918 = vmatpush.msrb.mxu1 %v4806_v7  ;;  %v4837_v7 = vmul.f32 %v8408_v21, %v4453_v0  ;;  %v4450_v21 = vld [vmem:[%s8748_s3 + $0x140] sm:$0xff] }
 0x56f   : > { %v4426_v0 = vld [vmem:[%s8748_s3 + $0x80] sm:$0xff] }
 0x570   : > { %4919 = vmatpush.msrb.mxu1 %v4805_v6 }
 0x572   : > { %4920 = vmatpush.msrb.mxu1 %v4804_v18  ;;  %v4836_v18 = vmul.f32 %v8389_v13, %v4452_v1  ;;  %v4449_v13 = vld [vmem:[%s8748_s3 + $0x138] sm:$0xff] }
 0x574   : > { %4921 = vmatpush.msrb.mxu1 %v4803_v34 }
 0x575   : > { %v8465_v28 = vpop.permute.xlu1 %4761  ;;  %v8478_v3 = vpop.permute.xlu0 %4661 }
 0x576   : > { %4922 = vmatpush.msrb.mxu1 %v4802_v55  ;;  %v4835_v55 = vmul.f32 %v8365_v30, %v4451_v39  ;;  %v8772_v30 = vld [vmem:[#allocation8_spill] sm:$0xff]  ;;  %v4851_v61 = vmul.f32 %v8465_v28, %v4467_v58 }
 0x577   : > { %vm4875_vm13 = vcmp.eq.s32.totalorder %v8772_v30, %v8500_v10  ;;  %vm4877_vm7 = vcmp.eq.s32.totalorder %v8772_v30, %v4861_v4 }
 0x578   : > { %4923 = vmatpush.msrb.mxu1 %v4801_v49  ;;  %v4834_v49 = vmul.f32 %v8354_v50, %v4450_v21  ;;  %v4853_v50 = vmul.f32 %v8452_v62, %v4469_v47  ;;  %v4466_v62 = vld [vmem:[%s8748_s3 + $0x1c0] sm:$0xff]  ;;  %v4459_v21 = vld [vmem:[%s8748_s3 + $0x188] sm:$0xff] }
 0x579   : > { %v4458_v47 = vld [vmem:[%s8748_s3 + $0x180] sm:$0xff] }
 0x57a   : > { %4924 = vmatpush.msrb.mxu1 %v4800_v14  ;;  %v4448_v14 = vld [vmem:[%s8748_s3 + $0x130] sm:$0xff] }
 0x57b   : > { %v4832_v23 = vmul.f32 %v8443_v5, %v4448_v14  ;;  %v4445_v5 = vld [vmem:[%s8748_s3 + $0x118] sm:$0xff] }
 0x57c   : > { %4925 = vmatpush.msrb.mxu1 %v4799_v41  ;;  %v4833_v41 = vmul.f32 %v8446_v42, %v4449_v13  ;;  %v4446_v42 = vld [vmem:[%s8748_s3 + $0x120] sm:$0xff]  ;;  %v4862_v13 = vperm.slane %v8492_v56, 3 }
 0x57d   : > { %v8487_v24 = vpop.permute.xlu1 %4651  ;;  %v8509_v59 = vpop.permute.xlu0 %4756  ;;  %v4830_v60 = vmul.f32 %v8506_v20, %v4446_v42  ;;  %v4464_v20 = vld [vmem:[%s8748_s3 + $0x1b0] sm:$0xff] }
 0x57e   : > { %4926 = vmatpush.msrb.mxu1 %v4798_v43  ;;  %v4852_v43 = vmul.f32 %v8472_v25, %v4468_v45  ;;  %v4429_v25 = vld [vmem:[%s8748_s3 + $0x98] sm:$0xff]  ;;  %v4850_v28 = vmul.f32 %v8509_v59, %v4466_v62  ;;  %v4829_v12 = vmul.f32 %v8487_v24, %v4445_v5  ;;  %v4463_v24 = vld [vmem:[%s8748_s3 + $0x1a8] sm:$0xff]  ;;  %vm4866_vm2 = vcmp.eq.s32.totalorder %v6788_v2, %v4862_v13 }
 0x57f   : > { %vm4870_vm5 = vcmp.eq.s32.totalorder %v8770_v9, %v4862_v13  ;;  %vm4874_vm8 = vcmp.eq.s32.totalorder %v8771_v16, %v4862_v13  ;;  %vm4878_vm9 = vcmp.eq.s32.totalorder %v8772_v30, %v4862_v13 }
 0x580   : > { %4927 = vmatpush.msrb.mxu1 %v4797_v29  ;;  %v4562_v29 = vpop.permute.xlu2 %4561 }
 0x582   : > { %4928 = vmatpush.msrb.mxu1 %v4796_v52  ;;  %v4831_v52 = vmul.f32 %v8478_v3, %v4447_v63  ;;  %v4444_v3 = vld [vmem:[%s8748_s3 + $0x110] sm:$0xff]  ;;  %v4911_v63 = vld [vmem:[#allocation4] sm:$0xff] }
 0x584   : > { %4929 = vmatpush.msrb.mxu1 %v4795_v8  ;;  %v4465_v8 = vld [vmem:[%s8748_s3 + $0x1b8] sm:$0xff] }
 0x585   : > { %v8513_v35 = vpop.permute.xlu1 %4746  ;;  %v8526_v57 = vpop.permute.xlu0 %4646  ;;  %v4849_v59 = vmul.f32 %v8519_v15, %v4465_v8 }
 0x586   : > { %4930 = vmatpush.msrb.mxu1 %v4794_v51  ;;  %v4428_v51 = vld [vmem:[%s8748_s3 + $0x90] sm:$0xff]  ;;  %v4848_v15 = vmul.f32 %v8513_v35, %v4464_v20  ;;  %v4442_v35 = vld [vmem:[%s8748_s3 + $0x100] sm:$0xff]  ;;  %v4913_v20 = vld [vmem:[#allocation4 + $0x10] sm:$0xff] }
 0x587   : > { %5686 = vmatmul.msk.f32.vlgmr.msrb.gmra.mxu1 %vm4863_vm10, %v6681_v44  ;;  %vm5035_vm10 = vcmask 23552  }
 0x588   : > { %v4737_v1 = vpop.permute.xlu2 %4736 }
 0x58d   : > { %v4712_v19 = vpop.permute.xlu1 %4711  ;;  %v8564_v34 = vpop.permute.xlu0 %4741 }
 0x58e   : > { %v4841_v53 = vmul.f32 %v4712_v19, %v4457_v48 }
 0x58f   : > { %5687 = vmatmul.msk.f32.gmra.mxu1 %vm4867_vm11, %v6681_v44 }
 0x590   : > { %4973 = vmatpush.msrb.mxu3 %v4841_v53  ;;  %v4443_v53 = vld [vmem:[%s8748_s3 + $0x108] sm:$0xff]  ;;  %v4722_v31 = vpop.permute.xlu2 %4721 }
 0x592   : > { %4974 = vmatpush.msrb.mxu3 %v4840_v38  ;;  %v4828_v38 = vmul.f32 %v8526_v57, %v4444_v3  ;;  %v4462_v57 = vld [vmem:[%s8748_s3 + $0x1a0] sm:$0xff] }
 0x593   : > { %v4846_v39 = vmul.f32 %v4737_v1, %v4462_v57  ;;  %v4914_v1 = vld [vmem:[#allocation4 + $0x18] sm:$0xff] }
 0x594   : > { %4975 = vmatpush.msrb.mxu3 %v4839_v33  ;;  %v4860_v33 = vperm.slane %v8492_v56, 1 }
 0x595   : > { %v4792_v46 = vpop.permute.xlu1 %4791  ;;  %v4567_v10 = vpop.permute.xlu0 %4566 }
 0x596   : > { %v4857_v6 = vmul.f32 %v4792_v46, %v4473_v32  ;;  %4976 = vmatpush.msrb.mxu3 %v4838_v37  ;;  %v4812_v40 = vmul.f32 %v4567_v10, %v4428_v51  ;;  %v4827_v32 = vmul.f32 %v8553_v17, %v4443_v53  ;;  %v4811_v37 = vmul.f32 %v4562_v29, %v4427_v26  ;;  %v4461_v17 = vld [vmem:[%s8748_s3 + $0x198] sm:$0xff]  ;;  %v5051_v51 = vld [vmem:[%s8749_s4] sm:$0xff] }
 0x597   : > { %5688 = vmatmul.msk.f32.gmra.mxu1 %vm4871_vm12, %v6681_v44  ;;  %v4847_v46 = vmul.f32 %v8564_v34, %v4463_v24  ;;  %vm4864_vm14 = vcmp.eq.s32.totalorder %v6788_v2, %v4860_v33  ;;  %v4460_v34 = vld [vmem:[%s8748_s3 + $0x190] sm:$0xff]  ;;  %vm4868_vm0 = vcmp.eq.s32.totalorder %v8770_v9, %v4860_v33  ;;  %vm4872_vm3 = vcmp.eq.s32.totalorder %v8771_v16, %v4860_v33 }
 0x598   : > { %4977 = vmatpush.msrb.mxu3 %v4837_v7  ;;  %5002 = vmatpush.msra.mxu1 %v4857_v6  ;;  %vm4876_vm6 = vcmp.eq.s32.totalorder %v8772_v30, %v4860_v33  ;;  %v5056_v33 = vld [vmem:[%s8750_s5 + $0x8] sm:$0xff] }
 0x59a   : > { %4978 = vmatpush.msrb.mxu3 %v4836_v18  ;;  %5003 = vmatpush.msra.mxu1 %v4856_v11 }
 0x59c   : > { %4979 = vmatpush.msrb.mxu3 %v4835_v55  ;;  %5004 = vmatpush.msra.mxu1 %v4855_v54 }
 0x59d   : > { %v4557_v36 = vpop.permute.xlu1 %4556  ;;  %v4732_v6 = vpop.permute.xlu0 %4731 }
 0x59e   : > { %4980 = vmatpush.msrb.mxu3 %v4834_v49  ;;  %5005 = vmatpush.msra.mxu1 %v4854_v22  ;;  %v4810_v7 = vmul.f32 %v4557_v36, %v4426_v0  ;;  %v4845_v11 = vmul.f32 %v4732_v6, %v4461_v17  ;;  %v4843_v22 = vmul.f32 %v4722_v31, %v4459_v21  ;;  %v5057_v6 = vld [vmem:[%s8750_s5 + $0x10] sm:$0xff]  ;;  %v5058_v21 = vld [vmem:[%s8750_s5 + $0x18] sm:$0xff] }
 0x59f   : > { %5689 = vmatmul.msk.f32.gmra.mxu1 %vm4875_vm13, %v6681_v44 }
 0x5a0   : > { %4981 = vmatpush.msrb.mxu3 %v4833_v41  ;;  %5006 = vmatpush.msra.mxu1 %v4853_v50 }
 0x5a2   : > { %4982 = vmatpush.msrb.mxu3 %v4832_v23  ;;  %5007 = vmatpush.msra.mxu1 %v4852_v43 }
 0x5a4   : > { %4983 = vmatpush.msrb.mxu3 %v4831_v52  ;;  %5008 = vmatpush.msra.mxu1 %v4851_v61 }
 0x5a5   : > { %v4572_v48 = vpop.permute.xlu1 %4571  ;;  %v4717_v49 = vpop.permute.xlu0 %4716 }
 0x5a6   : > { %v4813_v19 = vmul.f32 %v4572_v48, %v4429_v25  ;;  %4984 = vmatpush.msrb.mxu3 %v4830_v60  ;;  %5009 = vmatpush.msra.mxu1 %v4850_v28  ;;  %v4842_v45 = vmul.f32 %v4717_v49, %v4458_v47  ;;  %v5055_v28 = vld [vmem:[%s8750_s5] sm:$0xff] }
 0x5a8   : > { %4956 = vmatpush.msrb.mxu2 %v4813_v19  ;;  %4985 = vmatpush.msrb.mxu3 %v4829_v12 }
 0x5a9   : > { %5010 = vmatpush.msra.mxu1 %v4849_v59 }
 0x5aa   : > { %4957 = vmatpush.msrb.mxu2 %v4812_v40  ;;  %4986 = vmatpush.msrb.mxu3 %v4828_v38 }
 0x5ab   : > { %5011 = vmatpush.msra.mxu1 %v4848_v15 }
 0x5ac   : > { %4958 = vmatpush.msrb.mxu2 %v4811_v37  ;;  %4987 = vmatpush.msrb.mxu3 %v4827_v32  ;;  %v5052_v32 = vld [vmem:[%s8749_s4 + $0x8] sm:$0xff] }
 0x5ad   : > { %5012 = vmatpush.msra.mxu1 %v4847_v46  ;;  %v4637_v27 = vpop.permute.xlu1 %4636 }
 0x5ae   : > { %v4826_v18 = vmul.f32 %v4637_v27, %v4442_v35  ;;  %4959 = vmatpush.msrb.mxu2 %v4810_v7  ;;  %v5053_v27 = vld [vmem:[%s8749_s4 + $0x10] sm:$0xff] }
 0x5af   : > { %5013 = vmatpush.msra.mxu1 %v4846_v39  ;;  %5690 = vmatmul.msk.f32.vlgmr.msrb.gmra.mxu2 %vm4864_vm14, %v6681_v44 }
 0x5b0   : > { %4988 = vmatpush.msrb.mxu3 %v4826_v18 }
 0x5b1   : > { %5014 = vmatpush.msra.mxu1 %v4845_v11  ;;  %5694 = vmatmul.msk.f32.vlgmr.msrb.gmra.mxu3 %vm4865_vm15, %v6681_v44 }
 0x5b5   : > { %v4727_v55 = vpop.permute.xlu1 %4726 }
 0x5b6   : > { %v4844_v54 = vmul.f32 %v4727_v55, %v4460_v34  ;;  %v5054_v55 = vld [vmem:[%s8749_s4 + $0x18] sm:$0xff] }
 0x5b7   : > { %5691 = vmatmul.msk.f32.gmra.mxu2 %vm4868_vm0, %v6681_v44 }
 0x5b8   : > { %5015 = vmatpush.msra.mxu1 %v4844_v54 }
 0x5b9   : > { %5695 = vmatmul.msk.f32.gmra.mxu3 %vm4869_vm1, %v6681_v44 }
 0x5ba   : > { %5016 = vmatpush.msra.mxu1 %v4843_v22 }
 0x5bc   : > { %5017 = vmatpush.msra.mxu1 %v4842_v45 }
 0x5bd   : > { %5698 = vmatmul.msk.f32.vlgmr.msra.gmra.mxu1 %vm4866_vm2, %v6681_v44 }
 0x5bf   : > { %5692 = vmatmul.msk.f32.gmra.mxu2 %vm4872_vm3, %v6681_v44 }
 0x5c1   : > { %5696 = vmatmul.msk.f32.gmra.mxu3 %vm4873_vm4, %v6681_v44 }
 0x5c5   : > { %5699 = vmatmul.msk.f32.gmra.mxu1 %vm4870_vm5, %v6681_v44 }
 0x5c7   : > { %5693 = vmatmul.msk.f32.gmra.mxu2 %vm4876_vm6, %v6681_v44 }
 0x5c9   : > { %5697 = vmatmul.msk.f32.gmra.mxu3 %vm4877_vm7, %v6681_v44 }
 0x5cd   : > { %5700 = vmatmul.msk.f32.gmra.mxu1 %vm4874_vm8, %v6681_v44 }
 0x5d5   : > { %5701 = vmatmul.msk.f32.gmra.mxu1 %vm4878_vm9, %v6681_v44  ;;  %v4912_v44 = vld [vmem:[#allocation4 + $0x8] sm:$0xff] }
 0x604   : > { %v4932_v2 = vpop.f32.mrf.mxu1 }
 0x60c   : > { %v4935_v56 = vpop.f32.mrf.mxu1 }
 0x614   : > { %v4938_v9 = vpop.f32.mrf.mxu1 }
 0x61c   : > { %v4941_v14 = vpop.f32.mrf.mxu1 }
 0x632   : > { %v4961_v36 = vpop.f32.mrf.mxu2 }
 0x633   : > { %v4962_v50 = vadd.f32 %v4961_v36, %v4932_v2 }
 0x634   : > { %v4990_v41 = vpop.f32.mrf.mxu3 }
 0x635   : > { %v4991_v58 = vadd.f32 %v4990_v41, %v4962_v50 }
 0x63a   : > { %v5019_v43 = vpop.f32.mrf.mxu1  ;;  %v4964_v23 = vpop.f32.mrf.mxu2 }
 0x63b   : > { %v5020_v29 = vadd.f32 %v5019_v43, %v4991_v58  ;;  %v4965_v62 = vadd.f32 %v4964_v23, %v4935_v56 }
 0x63c   : > { %v4993_v16 = vpop.f32.mrf.mxu3 }
 0x63d   : > { %v5031_v42 = vadd.f32 %v5020_v29, %v4911_v63  ;;  %v4994_v30 = vadd.f32 %v4993_v16, %v4965_v62 }
 0x63f   : > { %5036 = vst.msk [vmem:[#allocation4] sm:$0xff] %vm5035_vm10, %v5031_v42 }
 0x642   : > { %v5022_v61 = vpop.f32.mrf.mxu1  ;;  %v4967_v52 = vpop.f32.mrf.mxu2 }
 0x643   : > { %v5023_v10 = vadd.f32 %v5022_v61, %v4994_v30  ;;  %v4968_v60 = vadd.f32 %v4967_v52, %v4938_v9 }
 0x644   : > { %v4996_v5 = vpop.f32.mrf.mxu3 }
 0x645   : > { %v5032_v25 = vadd.f32 %v5023_v10, %v4912_v44  ;;  %v4997_v12 = vadd.f32 %v4996_v5, %v4968_v60 }
 0x646   : > { %v5043_v8 = vld [vmem:[#allocation4] sm:$0xff] }
 0x647   : > { %v5047_v3 = vmul.f32 0.01, %v5043_v8  ;;  %5037 = vst.msk [vmem:[#allocation4 + $0x8] sm:$0xff] %vm5035_vm10, %v5032_v25 }
 0x649   : > { %v5059_v48 = vmul.f32 %v5055_v28, %v5047_v3 }
 0x64a   : > { %v5025_v19 = vpop.f32.mrf.mxu1  ;;  %v4970_v59 = vpop.f32.mrf.mxu2 }
 0x64b   : > { %v5063_v53 = vadd.f32 %v5059_v48, %v5051_v51  ;;  %v5026_v26 = vadd.f32 %v5025_v19, %v4997_v12  ;;  %v4971_v24 = vadd.f32 %v4970_v59, %v4941_v14 }
 0x64c   : > { %v4999_v15 = vpop.f32.mrf.mxu3 }
 0x64d   : > { %5067 = vst.msk [vmem:[%s8761_s16] sm:$0xff] %vm5035_vm10, %v5063_v53  ;;  %v5033_v38 = vadd.f32 %v5026_v26, %v4913_v20  ;;  %v5000_v57 = vadd.f32 %v4999_v15, %v4971_v24 }
 0x64e   : > { %v5044_v40 = vld [vmem:[#allocation4 + $0x8] sm:$0xff] }
 0x64f   : > { %v5048_v0 = vmul.f32 0.01, %v5044_v40  ;;  %5038 = vst.msk [vmem:[#allocation4 + $0x10] sm:$0xff] %vm5035_vm10, %v5033_v38 }
 0x651   : > { %v5060_v37 = vmul.f32 %v5056_v33, %v5048_v0 }
 0x652   : > { %v5028_v4 = vpop.f32.mrf.mxu1 }
 0x653   : > { %v5064_v46 = vadd.f32 %v5060_v37, %v5052_v32  ;;  %v5029_v35 = vadd.f32 %v5028_v4, %v5000_v57 }
 0x655   : > { %5068 = vst.msk [vmem:[%s8761_s16 + $0x8] sm:$0xff] %vm5035_vm10, %v5064_v46  ;;  %v5034_v7 = vadd.f32 %v5029_v35, %v4914_v1 }
 0x656   : > { %v5045_v17 = vld [vmem:[#allocation4 + $0x10] sm:$0xff] }
 0x657   : > { %v5049_v39 = vmul.f32 0.01, %v5045_v17  ;;  %5039 = vst.msk [vmem:[#allocation4 + $0x18] sm:$0xff] %vm5035_vm10, %v5034_v7 }
 0x659   : > { %v5061_v18 = vmul.f32 %v5057_v6, %v5049_v39 }
 0x65b   : > { %v5065_v11 = vadd.f32 %v5061_v18, %v5053_v27 }
 0x65d   : > { %5069 = vst.msk [vmem:[%s8761_s16 + $0x10] sm:$0xff] %vm5035_vm10, %v5065_v11 }
 0x65e   : > { %v5046_v34 = vld [vmem:[#allocation4 + $0x18] sm:$0xff] }
 0x65f   : > { %v5050_v31 = vmul.f32 0.01, %v5046_v34 }
 0x661   : > { %v5062_v54 = vmul.f32 %v5058_v21, %v5050_v31 }
 0x663   : > { %v5066_v13 = vadd.f32 %v5062_v54, %v5054_v55 }
 0x665   : > { %5070 = vst.msk [vmem:[%s8761_s16 + $0x18] sm:$0xff] %vm5035_vm10, %v5066_v13 }
 0x666 PF: > { %s26_s23 = sadd.s32 1, %s6677_s23   ;;  %s8773_s21 = smov %s6673_s22 }
 0x667   : > { %p23_p8 = scmp.ge.s32.totalorder %s26_s23, 5   ;;  %s8774_s22 = smov %s8776_s24 }
 0x669   :  { %25 = sbr.rel (!%p23_p8) target bundleno = 2 (0x2), region = 150 }

</bundles_post_ra>
